<compile_context>
chip_gen: v7x
topology: tpu7x:2x2x1
jax: 0.10.0
libtpu: 0.0.40
codegen_flags: <defaults>
</compile_context>

<pallas_src>
import jax
import jax.numpy as jnp
import numpy as np
from jax.experimental import pallas as pl
from jax.experimental.pallas import tpu as pltpu

EPS = 1e-5


# ---------------------------------------------------------------------------
# host-side helper: PyTorch bilinear (align_corners=False) interpolation matrix
# ---------------------------------------------------------------------------
def _interp_matrix_np(out_size, in_size):
    i = np.arange(out_size, dtype=np.float64)
    src = np.maximum((i + 0.5) * (in_size / out_size) - 0.5, 0.0)
    p0 = np.minimum(np.floor(src).astype(np.int64), in_size - 1)
    p1 = np.minimum(p0 + 1, in_size - 1)
    w1 = src - p0
    w0 = 1.0 - w1
    m = np.zeros((out_size, in_size), dtype=np.float64)
    m[np.arange(out_size), p0] += w0
    m[np.arange(out_size), p1] += w1
    return m.astype(np.float32)


# ---------------------------------------------------------------------------
# Kernel 1: high path — 1x1 conv (bf16 MXU, batched over N, channels-first)
#           + batch-norm (batch statistics) + ReLU + global average pool.
#           Single grid point: the high feature is small and fits in VMEM, and
#           the BN statistics are global over (N, h2, w2).
# ---------------------------------------------------------------------------
def _high_path_kernel(h_ref, w1_ref, hnorm_ref, atten_ref):
    N, Cin, S = h_ref.shape                 # h_ref: (N, Cin_high, h2*w2) f32
    Cout = w1_ref.shape[0]                  # w1_ref: (Cout, Cin_high) bf16

    x = h_ref[...].astype(jnp.bfloat16)                               # cast in VMEM
    w1b = jnp.broadcast_to(w1_ref[...], (N, Cout, Cin))               # bf16
    # 1x1 conv == batched matmul over N, f32 accumulation on the MXU
    y = jnp.einsum('noc,ncs->nos', w1b, x,
                   preferred_element_type=jnp.float32)                # (N, Cout, S)

    # batch-norm statistics per channel over (N, spatial): lane reduce then
    # a cheap cross-batch add (two standard single-axis reductions).
    inv_cnt = 1.0 / (N * S)
    s1 = jnp.sum(y, axis=2, keepdims=True)                            # (N, Cout, 1)
    mean = jnp.sum(s1, axis=0, keepdims=True) * inv_cnt               # (1, Cout, 1)
    d = y - mean
    s2 = jnp.sum(d * d, axis=2, keepdims=True)
    var = jnp.sum(s2, axis=0, keepdims=True) * inv_cnt                # (1, Cout, 1)

    yn = jnp.maximum(d * jax.lax.rsqrt(var + EPS), 0.0)               # BN + ReLU, f32
    hnorm_ref[...] = yn.astype(hnorm_ref.dtype)                       # (N, Cout, S) bf16
    atten_ref[...] = jnp.mean(yn, axis=2).astype(atten_ref.dtype)     # (N, Cout) f32


# ---------------------------------------------------------------------------
# Kernel 2: fused low path (channels-first, writes NCHW directly), one grid
#           step per batch element:
#   3x3 conv as a single K=9*Cin batched-over-rows matmul (im2col built once in
#   a VMEM scratch), scaled by channel attention, plus separable bilinear
#   upsample of the normalized high feature (two small matmuls, no Kronecker).
# ---------------------------------------------------------------------------
def _fuse_kernel(xpad_ref, w3t_ref, hnorm_ref, atten_ref, rh_ref, rwt_ref,
                 out_ref, col_ref):
    _, Hp, Cin, Wp = xpad_ref.shape
    H, W = Hp - 2, Wp - 2
    _, Cout, h2, w2 = hnorm_ref.shape

    # ---- im2col: col[i, t*Cin + ci, j] = xpad[dy+i, ci, dx+j],  t = dy*3+dx ----
    for t in range(9):
        dy, dx = t // 3, t % 3
        col_ref[:, t * Cin:(t + 1) * Cin, :] = xpad_ref[0, dy:dy + H, :, dx:dx + W]

    # single batched matmul (batch = H output rows, K = 9*Cin), bf16 -> f32
    w3b = jnp.broadcast_to(w3t_ref[...], (H, Cout, 9 * Cin))
    conv = jnp.einsum('hok,hkw->how', w3b, col_ref[...],
                      preferred_element_type=jnp.float32)             # (H, Cout, W)

    # ---- bilinear upsample: two separable matmuls, channels-first ----
    hn = hnorm_ref[0].reshape(Cout * h2, w2)                          # bf16
    b = jnp.dot(hn, rwt_ref[...], preferred_element_type=jnp.float32)  # (Cout*h2, W)
    b3 = b.astype(jnp.bfloat16).reshape(Cout, h2, W)
    rhb = jnp.broadcast_to(rh_ref[...], (Cout, H, h2))
    up = jnp.einsum('cip,cpj->cij', rhb, b3,
                    preferred_element_type=jnp.float32)               # (Cout, H, W)

    # ---- combine: attention scaling hoisted to one vectorized multiply ----
    att = atten_ref[0]                                                # (Cout, 1) f32
    convs = conv * att[None, :, :]                                    # (H, Cout, W)

    # layout-transposing assembly into the NCHW output block: one contiguous
    # (H, W) plane store per output channel.
    for c in range(Cout):
        out_ref[0, c, :, :] = (convs[:, c, :] + up[c]).astype(out_ref.dtype)


# ---------------------------------------------------------------------------
# Wrapper: AlignModule_GAU_2 forward (inputs and output in PyTorch NCHW)
# ---------------------------------------------------------------------------
@jax.jit
def align_module_gau_2(low_nchw, high_nchw, w_low, w_high):
    N, Cin_low, H, W = low_nchw.shape
    _, Cin_high, h2, w2 = high_nchw.shape
    Cout = w_low.shape[0]
    bf16 = jnp.bfloat16
    vmem_limit = 32 * 1024 * 1024

    # ---- high path: channels-first, only free metadata reshapes outside ----
    high_flat = high_nchw.reshape(N, Cin_high, h2 * w2)               # f32, free
    w1 = w_high.reshape(Cout, Cin_high).astype(bf16)

    hnorm, atten = pl.pallas_call(
        _high_path_kernel,
        grid=(1,),
        in_specs=[
            pl.BlockSpec((N, Cin_high, h2 * w2), lambda i: (0, 0, 0)),
            pl.BlockSpec((Cout, Cin_high), lambda i: (0, 0)),
        ],
        out_specs=[
            pl.BlockSpec((N, Cout, h2 * w2), lambda i: (0, 0, 0)),
            pl.BlockSpec((N, Cout), lambda i: (0, 0)),
        ],
        out_shape=(
            jax.ShapeDtypeStruct((N, Cout, h2 * w2), jnp.bfloat16),
            jax.ShapeDtypeStruct((N, Cout), jnp.float32),
        ),
        compiler_params=pltpu.CompilerParams(
            dimension_semantics=("arbitrary",),
            vmem_limit_bytes=vmem_limit),
    )(high_flat, w1)

    hnorm_cf = hnorm.reshape(N, Cout, h2, w2)                         # free reshape
    atten3 = atten[:, :, None]                                        # (N, Cout, 1) f32

    # ---- low path inputs: (N, Hp, Cin, Wp) keeps output width on lanes and
    #      makes every im2col copy a transpose-free static slice ----
    low_t = jnp.transpose(low_nchw, (0, 2, 1, 3)).astype(bf16)        # (N, H, Cin, W)
    xpad = jnp.pad(low_t, ((0, 0), (1, 1), (0, 0), (1, 1)))           # (N, Hp, Cin, Wp)
    w3t = jnp.transpose(w_low, (0, 2, 3, 1)).reshape(Cout, 9 * Cin_low).astype(bf16)

    # host-precomputed separable interpolation matrices (no kron, no one_hot)
    rh = jnp.asarray(_interp_matrix_np(H, h2), dtype=bf16)            # (H, h2)
    rwt = jnp.asarray(_interp_matrix_np(W, w2).T, dtype=bf16)         # (w2, W)

    out = pl.pallas_call(
        _fuse_kernel,
        grid=(N,),
        in_specs=[
            pl.BlockSpec((1, H + 2, Cin_low, W + 2), lambda n: (n, 0, 0, 0)),
            pl.BlockSpec((Cout, 9 * Cin_low), lambda n: (0, 0)),
            pl.BlockSpec((1, Cout, h2, w2), lambda n: (n, 0, 0, 0)),
            pl.BlockSpec((1, Cout, 1), lambda n: (n, 0, 0)),
            pl.BlockSpec((H, h2), lambda n: (0, 0)),
            pl.BlockSpec((w2, W), lambda n: (0, 0)),
        ],
        out_specs=pl.BlockSpec((1, Cout, H, W), lambda n: (n, 0, 0, 0)),
        out_shape=jax.ShapeDtypeStruct((N, Cout, H, W), jnp.float32),
        scratch_shapes=[pltpu.VMEM((H, 9 * Cin_low, W), jnp.bfloat16)],
        compiler_params=pltpu.CompilerParams(
            dimension_semantics=("parallel",),
            vmem_limit_bytes=vmem_limit),
    )(xpad, w3t, hnorm_cf, atten3, rh, rwt)

    return out  # already NCHW


# ---------------------------------------------------------------------------
# Pure-JAX f32 reference (NCHW) for the correctness check
# ---------------------------------------------------------------------------
def reference(low_nchw, high_nchw, w_low, w_high):
    N, _, H, W = low_nchw.shape
    _, _, h2, w2 = high_nchw.shape
    dn = ('NCHW', 'OIHW', 'NCHW')
    low = jax.lax.conv_general_dilated(low_nchw, w_low, (1, 1), 'SAME',
                                       dimension_numbers=dn)
    hi = jax.lax.conv_general_dilated(high_nchw, w_high, (1, 1), 'VALID',
                                      dimension_numbers=dn)
    mean = jnp.mean(hi, axis=(0, 2, 3), keepdims=True)
    var = jnp.mean((hi - mean) ** 2, axis=(0, 2, 3), keepdims=True)
    hi = jnp.maximum((hi - mean) * jax.lax.rsqrt(var + EPS), 0.0)
    atten = jnp.mean(hi, axis=(2, 3), keepdims=True)
    rh = jnp.asarray(_interp_matrix_np(H, h2))
    rw = jnp.asarray(_interp_matrix_np(W, w2))
    up = jnp.einsum('ip,ncpq,jq->ncij', rh, hi, rw)
    return low * atten + up


if __name__ == "__main__":
    key = jax.random.PRNGKey(0)
    k1, k2, k3, k4 = jax.random.split(key, 4)

    N, Cin_low, Cin_high, Cout = 2, 4, 6, 8
    H = W = 16
    h2 = w2 = 8

    low_feature = jax.random.normal(k1, (N, Cin_low, H, W), jnp.float32)
    h_feature = jax.random.normal(k2, (N, Cin_high, h2, w2), jnp.float32)
    w_low = jax.random.normal(k3, (Cout, Cin_low, 3, 3), jnp.float32) * 0.1
    w_high = jax.random.normal(k4, (Cout, Cin_high, 1, 1), jnp.float32) * 0.1

    out = align_module_gau_2(low_feature, h_feature, w_low, w_high)
    out = jax.block_until_ready(out)

    ref = reference(low_feature, h_feature, w_low, w_high)
    assert out.shape == (N, Cout, H, W)
    # bf16 MXU operands -> compare against the f32 reference with a looser tolerance
    np.testing.assert_allclose(np.asarray(out), np.asarray(ref),
                               rtol=3e-2, atol=3e-2)
    print("KERNEL_OK")
</pallas_src>

<mosaic_0001>
module attributes {stable_mosaic.version = 11 : i64} {
  func.func @_high_path_kernel(%arg0: i32, %arg1: memref<2x6x64xf32, #tpu.memory_space<vmem>>, %arg2: memref<8x6xbf16, #tpu.memory_space<vmem>>, %arg3: memref<2x8x64xbf16, #tpu.memory_space<vmem>>, %arg4: memref<2x8xf32, #tpu.memory_space<vmem>>) attributes {dimension_semantics = [#tpu.dimension_semantics<arbitrary>], iteration_bounds = array<i64: 1>, scalar_prefetch = 0 : i64, scratch_operands = 0 : i64, tpu.core_type = #tpu.core_type<tc>, window_params = [{pipeline_mode = #tpu.pipeline_mode<synchronous>, transform_indices = @transform_0, window_bounds = array<i64: 2, 6, 64>}, {pipeline_mode = #tpu.pipeline_mode<synchronous>, transform_indices = @transform_1, window_bounds = array<i64: 8, 6>}, {pipeline_mode = #tpu.pipeline_mode<synchronous>, transform_indices = @transform_2, window_bounds = array<i64: 2, 8, 64>}, {pipeline_mode = #tpu.pipeline_mode<synchronous>, transform_indices = @transform_3, window_bounds = array<i64: 2, 8>}]} {
    %c0 = arith.constant 0 : index
    %c0_0 = arith.constant 0 : index
    %c0_1 = arith.constant 0 : index
    %0 = vector.load %arg1[%c0, %c0_0, %c0_1] : memref<2x6x64xf32, #tpu.memory_space<vmem>>, vector<2x6x64xf32>
    %1 = arith.truncf %0 : vector<2x6x64xf32> to vector<2x6x64xbf16>
    %c0_2 = arith.constant 0 : index
    %c0_3 = arith.constant 0 : index
    %2 = vector.load %arg2[%c0_2, %c0_3] : memref<8x6xbf16, #tpu.memory_space<vmem>>, vector<8x6xbf16>
    %3 = vector.shape_cast %2 : vector<8x6xbf16> to vector<1x8x6xbf16>
    %4 = vector.broadcast %3 : vector<1x8x6xbf16> to vector<2x8x6xbf16>
    "tpu.trace_start"() <{level = 10 : i32, message = "noc,ncs->nos"}> : () -> ()
    %cst = arith.constant dense<0.000000e+00> : vector<2x8x64xf32>
    %5 = tpu.matmul %4, %1, %cst {dimension_numbers = #tpu.dot_dimension_numbers<[2], [1], [1], [2], [0, 0, 0, 1, 1, 2], [0], [0]>} : vector<2x8x6xbf16>, vector<2x6x64xbf16>, vector<2x8x64xf32> -> vector<2x8x64xf32>
    "tpu.trace_stop"() : () -> ()
    %cst_4 = arith.constant dense<0.000000e+00> : vector<2x8xf32>
    %6 = vector.multi_reduction <add>, %5, %cst_4 [2] : vector<2x8x64xf32> to vector<2x8xf32>
    %7 = vector.shape_cast %6 : vector<2x8xf32> to vector<2x8x1xf32>
    %cst_5 = arith.constant dense<0.000000e+00> : vector<8x1xf32>
    %8 = vector.multi_reduction <add>, %7, %cst_5 [0] : vector<2x8x1xf32> to vector<8x1xf32>
    %9 = vector.shape_cast %8 : vector<8x1xf32> to vector<1x8x1xf32>
    %cst_6 = arith.constant 7.812500e-03 : f32
    %10 = vector.broadcast %cst_6 : f32 to vector<1x8x1xf32>
    %11 = arith.mulf %9, %10 : vector<1x8x1xf32>
    %12 = vector.broadcast %11 : vector<1x8x1xf32> to vector<2x8x64xf32>
    %13 = arith.subf %5, %12 : vector<2x8x64xf32>
    %14 = arith.mulf %13, %13 : vector<2x8x64xf32>
    %cst_7 = arith.constant dense<0.000000e+00> : vector<2x8xf32>
    %15 = vector.multi_reduction <add>, %14, %cst_7 [2] : vector<2x8x64xf32> to vector<2x8xf32>
    %16 = vector.shape_cast %15 : vector<2x8xf32> to vector<2x8x1xf32>
    %cst_8 = arith.constant dense<0.000000e+00> : vector<8x1xf32>
    %17 = vector.multi_reduction <add>, %16, %cst_8 [0] : vector<2x8x1xf32> to vector<8x1xf32>
    %18 = vector.shape_cast %17 : vector<8x1xf32> to vector<1x8x1xf32>
    %cst_9 = arith.constant 7.812500e-03 : f32
    %19 = vector.broadcast %cst_9 : f32 to vector<1x8x1xf32>
    %20 = arith.mulf %18, %19 : vector<1x8x1xf32>
    %cst_10 = arith.constant 9.99999974E-6 : f32
    %21 = vector.broadcast %cst_10 : f32 to vector<1x8x1xf32>
    %22 = arith.addf %20, %21 : vector<1x8x1xf32>
    %23 = math.rsqrt %22 : vector<1x8x1xf32>
    %24 = vector.broadcast %23 : vector<1x8x1xf32> to vector<2x8x64xf32>
    %25 = arith.mulf %13, %24 : vector<2x8x64xf32>
    %cst_11 = arith.constant 0.000000e+00 : f32
    %26 = vector.broadcast %cst_11 : f32 to vector<2x8x64xf32>
    %27 = arith.maximumf %25, %26 : vector<2x8x64xf32>
    %28 = arith.truncf %27 : vector<2x8x64xf32> to vector<2x8x64xbf16>
    %c0_12 = arith.constant 0 : index
    %c0_13 = arith.constant 0 : index
    %c0_14 = arith.constant 0 : index
    %29 = vector.load %arg3[%c0_12, %c0_13, %c0_14] : memref<2x8x64xbf16, #tpu.memory_space<vmem>>, vector<2x8x64xbf16>
    tpu.vector_store %arg3[%c0_12, %c0_13, %c0_14], %28 {strides = array<i32>} : memref<2x8x64xbf16, #tpu.memory_space<vmem>>, vector<2x8x64xbf16>,
    %cst_15 = arith.constant dense<0.000000e+00> : vector<2x8xf32>
    %30 = vector.multi_reduction <add>, %27, %cst_15 [2] : vector<2x8x64xf32> to vector<2x8xf32>
    %cst_16 = arith.constant 6.400000e+01 : f32
    %31 = vector.broadcast %cst_16 : f32 to vector<2x8xf32>
    %32 = arith.divf %30, %31 : vector<2x8xf32>
    %c0_17 = arith.constant 0 : index
    %c0_18 = arith.constant 0 : index
    %33 = vector.load %arg4[%c0_17, %c0_18] : memref<2x8xf32, #tpu.memory_space<vmem>>, vector<2x8xf32>
    tpu.vector_store %arg4[%c0_17, %c0_18], %32 {strides = array<i32>} : memref<2x8xf32, #tpu.memory_space<vmem>>, vector<2x8xf32>,
    return
  }
  func.func @transform_0(%arg0: i32) -> (i32, i32, i32) {
    %c0_i32 = arith.constant 0 : i32
    %c0_i32_0 = arith.constant 0 : i32
    %c0_i32_1 = arith.constant 0 : i32
    %c0_i32_2 = arith.constant 0 : i32
    return %c0_i32, %c0_i32_0, %c0_i32_1 : i32, i32, i32
  }
  func.func @transform_1(%arg0: i32) -> (i32, i32) {
    %c0_i32 = arith.constant 0 : i32
    %c0_i32_0 = arith.constant 0 : i32
    %c0_i32_1 = arith.constant 0 : i32
    return %c0_i32, %c0_i32_0 : i32, i32
  }
  func.func @transform_2(%arg0: i32) -> (i32, i32, i32) {
    %c0_i32 = arith.constant 0 : i32
    %c0_i32_0 = arith.constant 0 : i32
    %c0_i32_1 = arith.constant 0 : i32
    %c0_i32_2 = arith.constant 0 : i32
    return %c0_i32, %c0_i32_0, %c0_i32_1 : i32, i32, i32
  }
  func.func @transform_3(%arg0: i32) -> (i32, i32) {
    %c0_i32 = arith.constant 0 : i32
    %c0_i32_0 = arith.constant 0 : i32
    %c0_i32_1 = arith.constant 0 : i32
    return %c0_i32, %c0_i32_0 : i32, i32
  }
}

module attributes {stable_mosaic.version = 11 : i64} {
  func.func @_fuse_kernel(%arg0: i32, %arg1: memref<1x18x4x18xbf16, #tpu.memory_space<vmem>>, %arg2: memref<8x36xbf16, #tpu.memory_space<vmem>>, %arg3: memref<1x8x8x8xbf16, #tpu.memory_space<vmem>>, %arg4: memref<1x8x1xf32, #tpu.memory_space<vmem>>, %arg5: memref<16x8xbf16, #tpu.memory_space<vmem>>, %arg6: memref<8x16xbf16, #tpu.memory_space<vmem>>, %arg7: memref<1x8x16x16xf32, #tpu.memory_space<vmem>>, %arg8: memref<16x36x16xbf16, #tpu.memory_space<vmem>>) attributes {dimension_semantics = [#tpu.dimension_semantics<parallel>], iteration_bounds = array<i64: 2>, scalar_prefetch = 0 : i64, scratch_operands = 1 : i64, tpu.core_type = #tpu.core_type<tc>, window_params = [{transform_indices = @transform_0, window_bounds = array<i64: 1, 18, 4, 18>}, {pipeline_mode = #tpu.pipeline_mode<synchronous>, transform_indices = @transform_1, window_bounds = array<i64: 8, 36>}, {transform_indices = @transform_2, window_bounds = array<i64: 1, 8, 8, 8>}, {transform_indices = @transform_3, window_bounds = array<i64: 1, 8, 1>}, {pipeline_mode = #tpu.pipeline_mode<synchronous>, transform_indices = @transform_4, window_bounds = array<i64: 16, 8>}, {pipeline_mode = #tpu.pipeline_mode<synchronous>, transform_indices = @transform_5, window_bounds = array<i64: 8, 16>}, {transform_indices = @transform_6, window_bounds = array<i64: 1, 8, 16, 16>}]} {
    %c0 = arith.constant 0 : index
    %c0_0 = arith.constant 0 : index
    %c0_1 = arith.constant 0 : index
    %c0_2 = arith.constant 0 : index
    %0 = vector.load %arg1[%c0, %c0_0, %c0_1, %c0_2] : memref<1x18x4x18xbf16, #tpu.memory_space<vmem>>, vector<1x16x4x16xbf16>
    %1 = vector.shape_cast %0 : vector<1x16x4x16xbf16> to vector<16x4x16xbf16>
    %c0_3 = arith.constant 0 : index
    %c0_4 = arith.constant 0 : index
    %c0_5 = arith.constant 0 : index
    %2 = vector.load %arg8[%c0_3, %c0_4, %c0_5] : memref<16x36x16xbf16, #tpu.memory_space<vmem>>, vector<16x4x16xbf16>
    tpu.vector_store %arg8[%c0_3, %c0_4, %c0_5], %1 {strides = array<i32>} : memref<16x36x16xbf16, #tpu.memory_space<vmem>>, vector<16x4x16xbf16>,
    %c0_6 = arith.constant 0 : index
    %c0_7 = arith.constant 0 : index
    %c0_8 = arith.constant 0 : index
    %c1 = arith.constant 1 : index
    %3 = vector.load %arg1[%c0_6, %c0_7, %c0_8, %c1] : memref<1x18x4x18xbf16, #tpu.memory_space<vmem>>, vector<1x16x4x16xbf16>
    %4 = vector.shape_cast %3 : vector<1x16x4x16xbf16> to vector<16x4x16xbf16>
    %c0_9 = arith.constant 0 : index
    %c4 = arith.constant 4 : index
    %c0_10 = arith.constant 0 : index
    %5 = vector.load %arg8[%c0_9, %c4, %c0_10] : memref<16x36x16xbf16, #tpu.memory_space<vmem>>, vector<16x4x16xbf16>
    tpu.vector_store %arg8[%c0_9, %c4, %c0_10], %4 {strides = array<i32>} : memref<16x36x16xbf16, #tpu.memory_space<vmem>>, vector<16x4x16xbf16>,
    %c0_11 = arith.constant 0 : index
    %c0_12 = arith.constant 0 : index
    %c0_13 = arith.constant 0 : index
    %c2 = arith.constant 2 : index
    %6 = vector.load %arg1[%c0_11, %c0_12, %c0_13, %c2] : memref<1x18x4x18xbf16, #tpu.memory_space<vmem>>, vector<1x16x4x16xbf16>
    %7 = vector.shape_cast %6 : vector<1x16x4x16xbf16> to vector<16x4x16xbf16>
    %c0_14 = arith.constant 0 : index
    %c8 = arith.constant 8 : index
    %c0_15 = arith.constant 0 : index
    %8 = vector.load %arg8[%c0_14, %c8, %c0_15] : memref<16x36x16xbf16, #tpu.memory_space<vmem>>, vector<16x4x16xbf16>
    tpu.vector_store %arg8[%c0_14, %c8, %c0_15], %7 {strides = array<i32>} : memref<16x36x16xbf16, #tpu.memory_space<vmem>>, vector<16x4x16xbf16>,
    %c0_16 = arith.constant 0 : index
    %c1_17 = arith.constant 1 : index
    %c0_18 = arith.constant 0 : index
    %c0_19 = arith.constant 0 : index
    %9 = vector.load %arg1[%c0_16, %c1_17, %c0_18, %c0_19] : memref<1x18x4x18xbf16, #tpu.memory_space<vmem>>, vector<1x16x4x16xbf16>
    %10 = vector.shape_cast %9 : vector<1x16x4x16xbf16> to vector<16x4x16xbf16>
    %c0_20 = arith.constant 0 : index
    %c12 = arith.constant 12 : index
    %c0_21 = arith.constant 0 : index
    %11 = vector.load %arg8[%c0_20, %c12, %c0_21] : memref<16x36x16xbf16, #tpu.memory_space<vmem>>, vector<16x4x16xbf16>
    tpu.vector_store %arg8[%c0_20, %c12, %c0_21], %10 {strides = array<i32>} : memref<16x36x16xbf16, #tpu.memory_space<vmem>>, vector<16x4x16xbf16>,
    %c0_22 = arith.constant 0 : index
    %c1_23 = arith.constant 1 : index
    %c0_24 = arith.constant 0 : index
    %c1_25 = arith.constant 1 : index
    %12 = vector.load %arg1[%c0_22, %c1_23, %c0_24, %c1_25] : memref<1x18x4x18xbf16, #tpu.memory_space<vmem>>, vector<1x16x4x16xbf16>
    %13 = vector.shape_cast %12 : vector<1x16x4x16xbf16> to vector<16x4x16xbf16>
    %c0_26 = arith.constant 0 : index
    %c16 = arith.constant 16 : index
    %c0_27 = arith.constant 0 : index
    %14 = vector.load %arg8[%c0_26, %c16, %c0_27] : memref<16x36x16xbf16, #tpu.memory_space<vmem>>, vector<16x4x16xbf16>
    tpu.vector_store %arg8[%c0_26, %c16, %c0_27], %13 {strides = array<i32>} : memref<16x36x16xbf16, #tpu.memory_space<vmem>>, vector<16x4x16xbf16>,
    %c0_28 = arith.constant 0 : index
    %c1_29 = arith.constant 1 : index
    %c0_30 = arith.constant 0 : index
    %c2_31 = arith.constant 2 : index
    %15 = vector.load %arg1[%c0_28, %c1_29, %c0_30, %c2_31] : memref<1x18x4x18xbf16, #tpu.memory_space<vmem>>, vector<1x16x4x16xbf16>
    %16 = vector.shape_cast %15 : vector<1x16x4x16xbf16> to vector<16x4x16xbf16>
    %c0_32 = arith.constant 0 : index
    %c20 = arith.constant 20 : index
    %c0_33 = arith.constant 0 : index
    %17 = vector.load %arg8[%c0_32, %c20, %c0_33] : memref<16x36x16xbf16, #tpu.memory_space<vmem>>, vector<16x4x16xbf16>
    tpu.vector_store %arg8[%c0_32, %c20, %c0_33], %16 {strides = array<i32>} : memref<16x36x16xbf16, #tpu.memory_space<vmem>>, vector<16x4x16xbf16>,
    %c0_34 = arith.constant 0 : index
    %c2_35 = arith.constant 2 : index
    %c0_36 = arith.constant 0 : index
    %c0_37 = arith.constant 0 : index
    %18 = vector.load %arg1[%c0_34, %c2_35, %c0_36, %c0_37] : memref<1x18x4x18xbf16, #tpu.memory_space<vmem>>, vector<1x16x4x16xbf16>
    %19 = vector.shape_cast %18 : vector<1x16x4x16xbf16> to vector<16x4x16xbf16>
    %c0_38 = arith.constant 0 : index
    %c24 = arith.constant 24 : index
    %c0_39 = arith.constant 0 : index
    %20 = vector.load %arg8[%c0_38, %c24, %c0_39] : memref<16x36x16xbf16, #tpu.memory_space<vmem>>, vector<16x4x16xbf16>
    tpu.vector_store %arg8[%c0_38, %c24, %c0_39], %19 {strides = array<i32>} : memref<16x36x16xbf16, #tpu.memory_space<vmem>>, vector<16x4x16xbf16>,
    %c0_40 = arith.constant 0 : index
    %c2_41 = arith.constant 2 : index
    %c0_42 = arith.constant 0 : index
    %c1_43 = arith.constant 1 : index
    %21 = vector.load %arg1[%c0_40, %c2_41, %c0_42, %c1_43] : memref<1x18x4x18xbf16, #tpu.memory_space<vmem>>, vector<1x16x4x16xbf16>
    %22 = vector.shape_cast %21 : vector<1x16x4x16xbf16> to vector<16x4x16xbf16>
    %c0_44 = arith.constant 0 : index
    %c28 = arith.constant 28 : index
    %c0_45 = arith.constant 0 : index
    %23 = vector.load %arg8[%c0_44, %c28, %c0_45] : memref<16x36x16xbf16, #tpu.memory_space<vmem>>, vector<16x4x16xbf16>
    tpu.vector_store %arg8[%c0_44, %c28, %c0_45], %22 {strides = array<i32>} : memref<16x36x16xbf16, #tpu.memory_space<vmem>>, vector<16x4x16xbf16>,
    %c0_46 = arith.constant 0 : index
    %c2_47 = arith.constant 2 : index
    %c0_48 = arith.constant 0 : index
    %c2_49 = arith.constant 2 : index
    %24 = vector.load %arg1[%c0_46, %c2_47, %c0_48, %c2_49] : memref<1x18x4x18xbf16, #tpu.memory_space<vmem>>, vector<1x16x4x16xbf16>
    %25 = vector.shape_cast %24 : vector<1x16x4x16xbf16> to vector<16x4x16xbf16>
    %c0_50 = arith.constant 0 : index
    %c32 = arith.constant 32 : index
    %c0_51 = arith.constant 0 : index
    %26 = vector.load %arg8[%c0_50, %c32, %c0_51] : memref<16x36x16xbf16, #tpu.memory_space<vmem>>, vector<16x4x16xbf16>
    tpu.vector_store %arg8[%c0_50, %c32, %c0_51], %25 {strides = array<i32>} : memref<16x36x16xbf16, #tpu.memory_space<vmem>>, vector<16x4x16xbf16>,
    %c0_52 = arith.constant 0 : index
    %c0_53 = arith.constant 0 : index
    %27 = vector.load %arg2[%c0_52, %c0_53] : memref<8x36xbf16, #tpu.memory_space<vmem>>, vector<8x36xbf16>
    %28 = vector.shape_cast %27 : vector<8x36xbf16> to vector<1x8x36xbf16>
    %29 = vector.broadcast %28 : vector<1x8x36xbf16> to vector<16x8x36xbf16>
    %c0_54 = arith.constant 0 : index
    %c0_55 = arith.constant 0 : index
    %c0_56 = arith.constant 0 : index
    %30 = vector.load %arg8[%c0_54, %c0_55, %c0_56] : memref<16x36x16xbf16, #tpu.memory_space<vmem>>, vector<16x36x16xbf16>
    "tpu.trace_start"() <{level = 10 : i32, message = "hok,hkw->how"}> : () -> ()
    %cst = arith.constant dense<0.000000e+00> : vector<16x8x16xf32>
    %31 = tpu.matmul %29, %30, %cst {dimension_numbers = #tpu.dot_dimension_numbers<[2], [1], [1], [2], [0, 0, 0, 1, 1, 2], [0], [0]>} : vector<16x8x36xbf16>, vector<16x36x16xbf16>, vector<16x8x16xf32> -> vector<16x8x16xf32>
    "tpu.trace_stop"() : () -> ()
    %c0_57 = arith.constant 0 : index
    %c0_58 = arith.constant 0 : index
    %c0_59 = arith.constant 0 : index
    %c0_60 = arith.constant 0 : index
    %32 = vector.load %arg3[%c0_57, %c0_58, %c0_59, %c0_60] : memref<1x8x8x8xbf16, #tpu.memory_space<vmem>>, vector<1x8x8x8xbf16>
    %33 = vector.shape_cast %32 : vector<1x8x8x8xbf16> to vector<8x8x8xbf16>
    %34 = vector.shape_cast %33 : vector<8x8x8xbf16> to vector<64x8xbf16>
    %c0_61 = arith.constant 0 : index
    %c0_62 = arith.constant 0 : index
    %35 = vector.load %arg6[%c0_61, %c0_62] : memref<8x16xbf16, #tpu.memory_space<vmem>>, vector<8x16xbf16>
    %cst_63 = arith.constant dense<0.000000e+00> : vector<64x16xf32>
    %36 = tpu.matmul %34, %35, %cst_63 {dimension_numbers = #tpu.dot_dimension_numbers<[1], [0], [0], [1], [0, 0, 1, 1], [], []>} : vector<64x8xbf16>, vector<8x16xbf16>, vector<64x16xf32> -> vector<64x16xf32>
    %37 = arith.truncf %36 : vector<64x16xf32> to vector<64x16xbf16>
    %38 = vector.shape_cast %37 : vector<64x16xbf16> to vector<8x8x16xbf16>
    %c0_64 = arith.constant 0 : index
    %c0_65 = arith.constant 0 : index
    %39 = vector.load %arg5[%c0_64, %c0_65] : memref<16x8xbf16, #tpu.memory_space<vmem>>, vector<16x8xbf16>
    %40 = vector.shape_cast %39 : vector<16x8xbf16> to vector<1x16x8xbf16>
    %41 = vector.broadcast %40 : vector<1x16x8xbf16> to vector<8x16x8xbf16>
    "tpu.trace_start"() <{level = 10 : i32, message = "cip,cpj->cij"}> : () -> ()
    %cst_66 = arith.constant dense<0.000000e+00> : vector<8x16x16xf32>
    %42 = tpu.matmul %41, %38, %cst_66 {dimension_numbers = #tpu.dot_dimension_numbers<[2], [1], [1], [2], [0, 0, 0, 1, 1, 2], [0], [0]>} : vector<8x16x8xbf16>, vector<8x8x16xbf16>, vector<8x16x16xf32> -> vector<8x16x16xf32>
    "tpu.trace_stop"() : () -> ()
    %c0_67 = arith.constant 0 : index
    %c0_68 = arith.constant 0 : index
    %c0_69 = arith.constant 0 : index
    %43 = vector.load %arg4[%c0_67, %c0_68, %c0_69] : memref<1x8x1xf32, #tpu.memory_space<vmem>>, vector<1x8x1xf32>
    %44 = vector.shape_cast %43 : vector<1x8x1xf32> to vector<8x1xf32>
    %45 = vector.shape_cast %44 : vector<8x1xf32> to vector<1x8x1xf32>
    %46 = vector.broadcast %45 : vector<1x8x1xf32> to vector<16x8x16xf32>
    %47 = arith.mulf %31, %46 : vector<16x8x16xf32>
    %48 = vector.extract_strided_slice %47 {offsets = [0, 0, 0], sizes = [16, 1, 16], strides = [1, 1, 1]} : vector<16x8x16xf32> to vector<16x1x16xf32>
    %49 = vector.shape_cast %48 : vector<16x1x16xf32> to vector<16x16xf32>
    %50 = vector.extract_strided_slice %42 {offsets = [0, 0, 0], sizes = [1, 16, 16], strides = [1, 1, 1]} : vector<8x16x16xf32> to vector<1x16x16xf32>
    %51 = vector.shape_cast %50 : vector<1x16x16xf32> to vector<16x16xf32>
    %52 = arith.addf %49, %51 : vector<16x16xf32>
    %c0_70 = arith.constant 0 : index
    %c0_71 = arith.constant 0 : index
    %c0_72 = arith.constant 0 : index
    %c0_73 = arith.constant 0 : index
    %53 = vector.load %arg7[%c0_70, %c0_71, %c0_72, %c0_73] : memref<1x8x16x16xf32, #tpu.memory_space<vmem>>, vector<1x1x16x16xf32>
    %54 = vector.shape_cast %53 : vector<1x1x16x16xf32> to vector<16x16xf32>
    %55 = vector.shape_cast %52 : vector<16x16xf32> to vector<1x1x16x16xf32>
    tpu.vector_store %arg7[%c0_70, %c0_71, %c0_72, %c0_73], %55 {strides = array<i32>} : memref<1x8x16x16xf32, #tpu.memory_space<vmem>>, vector<1x1x16x16xf32>,
    %56 = vector.extract_strided_slice %47 {offsets = [0, 1, 0], sizes = [16, 1, 16], strides = [1, 1, 1]} : vector<16x8x16xf32> to vector<16x1x16xf32>
    %57 = vector.shape_cast %56 : vector<16x1x16xf32> to vector<16x16xf32>
    %58 = vector.extract_strided_slice %42 {offsets = [1, 0, 0], sizes = [1, 16, 16], strides = [1, 1, 1]} : vector<8x16x16xf32> to vector<1x16x16xf32>
    %59 = vector.shape_cast %58 : vector<1x16x16xf32> to vector<16x16xf32>
    %60 = arith.addf %57, %59 : vector<16x16xf32>
    %c0_74 = arith.constant 0 : index
    %c1_75 = arith.constant 1 : index
    %c0_76 = arith.constant 0 : index
    %c0_77 = arith.constant 0 : index
    %61 = vector.load %arg7[%c0_74, %c1_75, %c0_76, %c0_77] : memref<1x8x16x16xf32, #tpu.memory_space<vmem>>, vector<1x1x16x16xf32>
    %62 = vector.shape_cast %61 : vector<1x1x16x16xf32> to vector<16x16xf32>
    %63 = vector.shape_cast %60 : vector<16x16xf32> to vector<1x1x16x16xf32>
    tpu.vector_store %arg7[%c0_74, %c1_75, %c0_76, %c0_77], %63 {strides = array<i32>} : memref<1x8x16x16xf32, #tpu.memory_space<vmem>>, vector<1x1x16x16xf32>,
    %64 = vector.extract_strided_slice %47 {offsets = [0, 2, 0], sizes = [16, 1, 16], strides = [1, 1, 1]} : vector<16x8x16xf32> to vector<16x1x16xf32>
    %65 = vector.shape_cast %64 : vector<16x1x16xf32> to vector<16x16xf32>
    %66 = vector.extract_strided_slice %42 {offsets = [2, 0, 0], sizes = [1, 16, 16], strides = [1, 1, 1]} : vector<8x16x16xf32> to vector<1x16x16xf32>
    %67 = vector.shape_cast %66 : vector<1x16x16xf32> to vector<16x16xf32>
    %68 = arith.addf %65, %67 : vector<16x16xf32>
    %c0_78 = arith.constant 0 : index
    %c2_79 = arith.constant 2 : index
    %c0_80 = arith.constant 0 : index
    %c0_81 = arith.constant 0 : index
    %69 = vector.load %arg7[%c0_78, %c2_79, %c0_80, %c0_81] : memref<1x8x16x16xf32, #tpu.memory_space<vmem>>, vector<1x1x16x16xf32>
    %70 = vector.shape_cast %69 : vector<1x1x16x16xf32> to vector<16x16xf32>
    %71 = vector.shape_cast %68 : vector<16x16xf32> to vector<1x1x16x16xf32>
    tpu.vector_store %arg7[%c0_78, %c2_79, %c0_80, %c0_81], %71 {strides = array<i32>} : memref<1x8x16x16xf32, #tpu.memory_space<vmem>>, vector<1x1x16x16xf32>,
    %72 = vector.extract_strided_slice %47 {offsets = [0, 3, 0], sizes = [16, 1, 16], strides = [1, 1, 1]} : vector<16x8x16xf32> to vector<16x1x16xf32>
    %73 = vector.shape_cast %72 : vector<16x1x16xf32> to vector<16x16xf32>
    %74 = vector.extract_strided_slice %42 {offsets = [3, 0, 0], sizes = [1, 16, 16], strides = [1, 1, 1]} : vector<8x16x16xf32> to vector<1x16x16xf32>
    %75 = vector.shape_cast %74 : vector<1x16x16xf32> to vector<16x16xf32>
    %76 = arith.addf %73, %75 : vector<16x16xf32>
    %c0_82 = arith.constant 0 : index
    %c3 = arith.constant 3 : index
    %c0_83 = arith.constant 0 : index
    %c0_84 = arith.constant 0 : index
    %77 = vector.load %arg7[%c0_82, %c3, %c0_83, %c0_84] : memref<1x8x16x16xf32, #tpu.memory_space<vmem>>, vector<1x1x16x16xf32>
    %78 = vector.shape_cast %77 : vector<1x1x16x16xf32> to vector<16x16xf32>
    %79 = vector.shape_cast %76 : vector<16x16xf32> to vector<1x1x16x16xf32>
    tpu.vector_store %arg7[%c0_82, %c3, %c0_83, %c0_84], %79 {strides = array<i32>} : memref<1x8x16x16xf32, #tpu.memory_space<vmem>>, vector<1x1x16x16xf32>,
    %80 = vector.extract_strided_slice %47 {offsets = [0, 4, 0], sizes = [16, 1, 16], strides = [1, 1, 1]} : vector<16x8x16xf32> to vector<16x1x16xf32>
    %81 = vector.shape_cast %80 : vector<16x1x16xf32> to vector<16x16xf32>
    %82 = vector.extract_strided_slice %42 {offsets = [4, 0, 0], sizes = [1, 16, 16], strides = [1, 1, 1]} : vector<8x16x16xf32> to vector<1x16x16xf32>
    %83 = vector.shape_cast %82 : vector<1x16x16xf32> to vector<16x16xf32>
    %84 = arith.addf %81, %83 : vector<16x16xf32>
    %c0_85 = arith.constant 0 : index
    %c4_86 = arith.constant 4 : index
    %c0_87 = arith.constant 0 : index
    %c0_88 = arith.constant 0 : index
    %85 = vector.load %arg7[%c0_85, %c4_86, %c0_87, %c0_88] : memref<1x8x16x16xf32, #tpu.memory_space<vmem>>, vector<1x1x16x16xf32>
    %86 = vector.shape_cast %85 : vector<1x1x16x16xf32> to vector<16x16xf32>
    %87 = vector.shape_cast %84 : vector<16x16xf32> to vector<1x1x16x16xf32>
    tpu.vector_store %arg7[%c0_85, %c4_86, %c0_87, %c0_88], %87 {strides = array<i32>} : memref<1x8x16x16xf32, #tpu.memory_space<vmem>>, vector<1x1x16x16xf32>,
    %88 = vector.extract_strided_slice %47 {offsets = [0, 5, 0], sizes = [16, 1, 16], strides = [1, 1, 1]} : vector<16x8x16xf32> to vector<16x1x16xf32>
    %89 = vector.shape_cast %88 : vector<16x1x16xf32> to vector<16x16xf32>
    %90 = vector.extract_strided_slice %42 {offsets = [5, 0, 0], sizes = [1, 16, 16], strides = [1, 1, 1]} : vector<8x16x16xf32> to vector<1x16x16xf32>
    %91 = vector.shape_cast %90 : vector<1x16x16xf32> to vector<16x16xf32>
    %92 = arith.addf %89, %91 : vector<16x16xf32>
    %c0_89 = arith.constant 0 : index
    %c5 = arith.constant 5 : index
    %c0_90 = arith.constant 0 : index
    %c0_91 = arith.constant 0 : index
    %93 = vector.load %arg7[%c0_89, %c5, %c0_90, %c0_91] : memref<1x8x16x16xf32, #tpu.memory_space<vmem>>, vector<1x1x16x16xf32>
    %94 = vector.shape_cast %93 : vector<1x1x16x16xf32> to vector<16x16xf32>
    %95 = vector.shape_cast %92 : vector<16x16xf32> to vector<1x1x16x16xf32>
    tpu.vector_store %arg7[%c0_89, %c5, %c0_90, %c0_91], %95 {strides = array<i32>} : memref<1x8x16x16xf32, #tpu.memory_space<vmem>>, vector<1x1x16x16xf32>,
    %96 = vector.extract_strided_slice %47 {offsets = [0, 6, 0], sizes = [16, 1, 16], strides = [1, 1, 1]} : vector<16x8x16xf32> to vector<16x1x16xf32>
    %97 = vector.shape_cast %96 : vector<16x1x16xf32> to vector<16x16xf32>
    %98 = vector.extract_strided_slice %42 {offsets = [6, 0, 0], sizes = [1, 16, 16], strides = [1, 1, 1]} : vector<8x16x16xf32> to vector<1x16x16xf32>
    %99 = vector.shape_cast %98 : vector<1x16x16xf32> to vector<16x16xf32>
    %100 = arith.addf %97, %99 : vector<16x16xf32>
    %c0_92 = arith.constant 0 : index
    %c6 = arith.constant 6 : index
    %c0_93 = arith.constant 0 : index
    %c0_94 = arith.constant 0 : index
    %101 = vector.load %arg7[%c0_92, %c6, %c0_93, %c0_94] : memref<1x8x16x16xf32, #tpu.memory_space<vmem>>, vector<1x1x16x16xf32>
    %102 = vector.shape_cast %101 : vector<1x1x16x16xf32> to vector<16x16xf32>
    %103 = vector.shape_cast %100 : vector<16x16xf32> to vector<1x1x16x16xf32>
    tpu.vector_store %arg7[%c0_92, %c6, %c0_93, %c0_94], %103 {strides = array<i32>} : memref<1x8x16x16xf32, #tpu.memory_space<vmem>>, vector<1x1x16x16xf32>,
    %104 = vector.extract_strided_slice %47 {offsets = [0, 7, 0], sizes = [16, 1, 16], strides = [1, 1, 1]} : vector<16x8x16xf32> to vector<16x1x16xf32>
    %105 = vector.shape_cast %104 : vector<16x1x16xf32> to vector<16x16xf32>
    %106 = vector.extract_strided_slice %42 {offsets = [7, 0, 0], sizes = [1, 16, 16], strides = [1, 1, 1]} : vector<8x16x16xf32> to vector<1x16x16xf32>
    %107 = vector.shape_cast %106 : vector<1x16x16xf32> to vector<16x16xf32>
    %108 = arith.addf %105, %107 : vector<16x16xf32>
    %c0_95 = arith.constant 0 : index
    %c7 = arith.constant 7 : index
    %c0_96 = arith.constant 0 : index
    %c0_97 = arith.constant 0 : index
    %109 = vector.load %arg7[%c0_95, %c7, %c0_96, %c0_97] : memref<1x8x16x16xf32, #tpu.memory_space<vmem>>, vector<1x1x16x16xf32>
    %110 = vector.shape_cast %109 : vector<1x1x16x16xf32> to vector<16x16xf32>
    %111 = vector.shape_cast %108 : vector<16x16xf32> to vector<1x1x16x16xf32>
    tpu.vector_store %arg7[%c0_95, %c7, %c0_96, %c0_97], %111 {strides = array<i32>} : memref<1x8x16x16xf32, #tpu.memory_space<vmem>>, vector<1x1x16x16xf32>,
    return
  }
  func.func @transform_0(%arg0: i32) -> (i32, i32, i32, i32) {
    %c0_i32 = arith.constant 0 : i32
    %c0_i32_0 = arith.constant 0 : i32
    %c0_i32_1 = arith.constant 0 : i32
    %c0_i32_2 = arith.constant 0 : i32
    return %arg0, %c0_i32, %c0_i32_0, %c0_i32_1 : i32, i32, i32, i32
  }
  func.func @transform_1(%arg0: i32) -> (i32, i32) {
    %c0_i32 = arith.constant 0 : i32
    %c0_i32_0 = arith.constant 0 : i32
    %c0_i32_1 = arith.constant 0 : i32
    return %c0_i32, %c0_i32_0 : i32, i32
  }
  func.func @transform_2(%arg0: i32) -> (i32, i32, i32, i32) {
    %c0_i32 = arith.constant 0 : i32
    %c0_i32_0 = arith.constant 0 : i32
    %c0_i32_1 = arith.constant 0 : i32
    %c0_i32_2 = arith.constant 0 : i32
    return %arg0, %c0_i32, %c0_i32_0, %c0_i32_1 : i32, i32, i32, i32
  }
  func.func @transform_3(%arg0: i32) -> (i32, i32, i32) {
    %c0_i32 = arith.constant 0 : i32
    %c0_i32_0 = arith.constant 0 : i32
    %c0_i32_1 = arith.constant 0 : i32
    return %arg0, %c0_i32, %c0_i32_0 : i32, i32, i32
  }
  func.func @transform_4(%arg0: i32) -> (i32, i32) {
    %c0_i32 = arith.constant 0 : i32
    %c0_i32_0 = arith.constant 0 : i32
    %c0_i32_1 = arith.constant 0 : i32
    return %c0_i32, %c0_i32_0 : i32, i32
  }
  func.func @transform_5(%arg0: i32) -> (i32, i32) {
    %c0_i32 = arith.constant 0 : i32
    %c0_i32_0 = arith.constant 0 : i32
    %c0_i32_1 = arith.constant 0 : i32
    return %c0_i32, %c0_i32_0 : i32, i32
  }
  func.func @transform_6(%arg0: i32) -> (i32, i32, i32, i32) {
    %c0_i32 = arith.constant 0 : i32
    %c0_i32_0 = arith.constant 0 : i32
    %c0_i32_1 = arith.constant 0 : i32
    %c0_i32_2 = arith.constant 0 : i32
    return %arg0, %c0_i32, %c0_i32_0, %c0_i32_1 : i32, i32, i32, i32
  }
}

</mosaic_0001>

<bundles_post_ra>
// kernel: align_module_gau_2.2
= control target key start
LH: loop header
LB: loop body
LE: loop exit
PB: predicated region body
PF: predicated region fallthrough
CT: control target
= control target key end

     0   :  { %v198_v0 = vmov 0.0   ;;  %vm23_vm0 = vcmask 1042432   ;;  %vm199_vm1 = vmmov 0   ;;  %vm19_vm2 = vcmask 48128   ;;  %s244_s0 = inlined_call_operand.vmem [shape: f32[2,6,64], index: 0, kind: input, shape index: {}]   ;;  %s245_s1 = inlined_call_operand.vmem [shape: bf16[8,6], index: 1, kind: input, shape index: {}]   ;;  %s246_s2 = inlined_call_operand.vmem [shape: bf16[2,8,64], index: 2, kind: output, shape index: {0}]   ;;  %s247_s3 = inlined_call_operand.vmem [shape: f32[2,8], index: 3, kind: output, shape index: {1}]  }
   0x1   :  { %182 = vmatprep.subr.bf16.mxu0 %v198_v0  ;;  %v14_v1 = vld [vmem:[%s244_s0] sm:$0x3f]  ;;  %188 = vmatprep.subr.bf16.mxu1 %v198_v0  ;;  %v15_v2 = vld [vmem:[%s244_s0 + $0x8] sm:$0x3f]  ;;  %vm110_vm3 = vcmask 523264   ;;  %vm139_vm4 = vcmask 519168   ;;  %v153_v42 = vlaneseq }
   0x2   :  { %v16_v3 = vpack.c.bf16 %v14_v1, %v14_v1  ;;  %v17_v4 = vpack.c.bf16 %v15_v2, %v15_v2  ;;  %184 = vmatprep.mubr.msk.bf16.mxu0 %vm199_vm1, %v198_v0  ;;  %190 = vmatprep.mubr.msk.bf16.mxu1 %vm199_vm1, %v198_v0  ;;  %v18_v7 = vld [vmem:[%s245_s1] sm:$0xf]  ;;  %vm163_vm5 = vcmask 1041409   ;;  %vm166_vm6 = vcmask 58368  }
   0x3   :  { %v154_v43 = vand.u32 127, %v153_v42  ;;  %v156_v44 = vshrl.u32 %v153_v42, 7 }
   0x4   :  { %v25_v5 = vsel %vm23_vm0, %v16_v3, 0  ;;  %v68_v6 = vsel %vm23_vm0, %v17_v4, 0 }
   0x5   :  { %183 = vmatpush3.bf16.msra.mxu0 %v25_v5  ;;  %189 = vmatpush3.bf16.msra.mxu1 %v68_v6  ;;  %v157_v45 = vsub.s32 %v154_v43, %v156_v44 }
   0x8   :  { %185 = vmatmul.mubr.msk.bf16.vlgmr.msra.gmra.mrb[0].mxu0 %vm19_vm2, %v18_v7  ;;  %191 = vmatmul.mubr.msk.bf16.vlgmr.msra.gmra.mrb[0].mxu1 %vm19_vm2, %v18_v7 }
  0xdb   :  { %v61_v8 = vpop.f32.mrb[0].mxu0  ;;  %v104_v9 = vpop.f32.mrb[0].mxu1 }
  0xdc   :  { %v186_v10 = vpop.f32.mrb[1].mxu0  ;;  %v192_v11 = vpop.f32.mrb[1].mxu1  ;;  %v111_v12 = vsel %vm110_vm3, %v61_v8, 0.0  ;;  %v114_v17 = vsel %vm110_vm3, %v104_v9, 0.0 }
  0xdd   :  { %112 = vadd.xlane.f32.xlu0 %v111_v12  ;;  %v64_v13 = vpop.f32.mrb[2].mxu0  ;;  %v107_v14 = vpop.f32.mrb[2].mxu1 }
  0xde   :  { %v187_v15 = vpop.f32.mrb[3].mxu0  ;;  %v193_v16 = vpop.f32.mrb[3].mxu1 }
  0xe1   :  { %115 = vadd.xlane.f32.xlu0 %v114_v17 }
 0x16a   :  { %v113_v18 = vpop.xlane.xlu0 %112 }
 0x16e   :  { %v116_v19 = vpop.xlane.xlu0 %115 }
 0x16f   :  { %v117_v20 = vadd.f32 %v116_v19, %v113_v18 }
 0x171   :  { %v118_v21 = vmul.f32 0.0078125, %v117_v20 }
 0x173   :  { %v119_v22 = vsub.f32 %v61_v8, %v118_v21  ;;  %v120_v23 = vsub.f32 %v104_v9, %v118_v21 }
 0x175   :  { %v121_v24 = vmul.f32 %v119_v22, %v119_v22  ;;  %v122_v26 = vmul.f32 %v120_v23, %v120_v23 }
 0x177   :  { %v123_v25 = vsel %vm110_vm3, %v121_v24, 0.0  ;;  %v126_v27 = vsel %vm110_vm3, %v122_v26, 0.0 }
 0x178   :  { %124 = vadd.xlane.f32.xlu1 %v123_v25 }
 0x17c   :  { %127 = vadd.xlane.f32.xlu1 %v126_v27 }
 0x205   :  { %v125_v28 = vpop.xlane.xlu1 %124 }
 0x209   :  { %v128_v29 = vpop.xlane.xlu1 %127 }
 0x20a   :  { %v129_v30 = vadd.f32 %v128_v29, %v125_v28 }
 0x20c   :  { %v130_v31 = vmul.f32 0.0078125, %v129_v30 }
 0x20e   :  { %v131_v32 = vadd.f32 1e-05, %v130_v31 }
 0x210   :  { %196 = vrsqrt.f32 %v131_v32 }
 0x21a   :  { %v197_v33 = vpop.eup %196 }
 0x21b   :  { %v134_v34 = vmul.f32 %v197_v33, %v120_v23  ;;  %v133_v35 = vmul.f32 %v197_v33, %v119_v22 }
 0x21d   :  { %v136_v36 = vmax.f32 %v134_v34, 0.0  ;;  %v135_v37 = vmax.f32 %v133_v35, 0.0 }
 0x21f   :  { %v145_v38 = vsel %vm110_vm3, %v136_v36, 0.0  ;;  %v138_v39 = vpack.c.bf16 %v136_v36, %v136_v36  ;;  %v142_v40 = vsel %vm110_vm3, %v135_v37, 0.0  ;;  %v137_v41 = vpack.c.bf16 %v135_v37, %v135_v37 }
 0x220   :  { %146 = vadd.xlane.f32.xlu1 %v145_v38  ;;  %143 = vadd.xlane.f32.xlu0 %v142_v40 }
 0x221   :  { %141 = vst.msk [vmem:[%s246_s2 + $0x4] sm:$0xf] %vm139_vm4, %v138_v39  ;;  %140 = vst.msk [vmem:[%s246_s2] sm:$0xf] %vm139_vm4, %v137_v41 }
 0x2ad   :  { %v147_v46 = vpop.xlane.xlu1 %146  ;;  %v144_v47 = vpop.xlane.xlu0 %143 }
 0x2ae   :  { %v150_v48 = vmul.f32 0.015625, %v147_v46  ;;  %v149_v49 = vmul.f32 0.015625, %v144_v47 }
 0x2b0   :  { %v162_v50 = vrot.slane %v150_v48, %v157_v45  ;;  %v158_v51 = vrot.slane %v149_v49, %v157_v45 }
 0x2b2   :  { %v164_v52 = vsel %vm163_vm5, %v162_v50, %v158_v51 }
 0x2b3   :  { %167 = vst.msk [vmem:[%s247_s3] sm:$0x3] %vm166_vm6, %v164_v52 }

// kernel: align_module_gau_2.3
= control target key start
LH: loop header
LB: loop body
LE: loop exit
PB: predicated region body
PF: predicated region fallthrough
CT: control target
= control target key end

     0   :  { %11 = vsyncpa [#allocation4], 0  ;;  %s6414_s0 = inlined_call_operand.vmem [shape: bf16[2,18,4,18], index: 0, kind: input, shape index: {}]   ;;  %s6415_s1 = inlined_call_operand.vmem [shape: bf16[8,36], index: 1, kind: input, shape index: {}]   ;;  %s6416_s2 = inlined_call_operand.vmem [shape: bf16[2,8,8,8], index: 2, kind: input, shape index: {}]   ;;  %s6417_s3 = inlined_call_operand.vmem [shape: f32[2,8,1], index: 3, kind: input, shape index: {}]   ;;  %s6418_s4 = inlined_call_operand.vmem [shape: bf16[16,8], index: 4, kind: input, shape index: {}]   ;;  %s6419_s5 = inlined_call_operand.vmem [shape: bf16[8,16], index: 5, kind: input, shape index: {}]   ;;  %s6420_s6 = inlined_call_operand.hbm [shape: f32[2,8,16,16], index: 6, kind: output, shape index: {}]  }
   0x1   :  { %13 = vsyncpa [#allocation4 + $0x1], 0  ;;  %s5137_s21 = smov 0   ;;  %s5139_s22 = smov 0  }
   0x2   :  { %s5141_s23 = smov 0   ;;  %s5143_s24 = smov 0  }
   0x3 LB: > { %s5158_s25 = sadd.s32 4294967295, %s5091_s24   ;;  %s4280_s26 = sadd.s32 4294967294, %s5091_s24   ;;  %s5091_s24 = sphi %s5143_s24, %s6426_s24   ;;  %s5087_s23 = sphi %s5141_s23, %s6425_s23   ;;  %s5083_s22 = sphi %s5139_s22, %s6424_s22   ;;  %s5079_s21 = sphi %s5137_s21, %s6423_s21  }
   0x4   : > { %s5162_s27 = sadd.s32 1, %s5091_s24   ;;  %s167_s28 = sadd.s32 1, %s5087_s23 }
   0x5   : > { %s164_s29 = ssub.s32 %s5091_s24, %s5162_s27  ;;  %p177_p0 = scmp.ne.s32.totalorder %s5087_s23, %s5083_s22 }
   0x6   : > { %p165_p1 = scmp.eq.s32.totalorder %s164_s29, 0  ;;  %p178_p2 = scmp.eq.s32.totalorder %s5158_s25, 1 }
   0x7   : > { %p183_p3 = scmp.ne.s32.totalorder %s5083_s22, %s5079_s21  ;;  %p184_p4 = scmp.eq.s32.totalorder %s4280_s26, 1 }
   0x8   : > { %s5173_s30 = scalar_select %p165_p1, %s5087_s23, %s167_s28  }
   0x9   : > { %p5175_p5 = por %p178_p2, %p177_p0  ;;  %p5179_p6 = por %p184_p4, %p183_p3 }
   0xa   : > { %p4283_p7 = scmp.ge.s32.totalorder %s5091_s24, 1  ;;  %p234_p8 = scmp.lt.s32.totalorder %s5091_s24, 3 }
   0xc   : > { %p235_p9 = pnand %p4283_p7, %p234_p8 }
   0xd   : > { %p273_p10 = scmp.lt.s32.totalorder (!%p235_p9), %s5158_s25, 1  ;;  %v357_v0 = vlaneseq (!%p235_p9)  ;;  %v5093_v1 = vmov (!%p235_p9), 1983009808   ;;  %s5094_s14 = smov (!%p235_p9), 127   ;;  %v5096_v13 = vmov (!%p235_p9), 0.0   ;;  %vm5097_vm0 = vmmov (!%p235_p9), 0  }
   0xe   : > { %238 = sbr.rel (%p235_p9) target bundleno = 822 (0x336), region = 44  ;;  %v355_v2 = vunpack.c.l.s4 (!%p235_p9), %v5093_v1  ;;  %s5095_s15 = smov (!%p235_p9), 126   ;;  %4643 = vmatprep.subr.bf16.mxu0 (!%p235_p9), %v5096_v13  ;;  %4653 = vmatprep.subr.bf16.mxu1 (!%p235_p9), %v5096_v13  ;;  %vm304_vm1 = vcmask (!%p235_p9), 123904   ;;  %vm529_vm2 = vcmask (!%p235_p9), 125954   ;;  %vm1944_vm3 = vcmask (!%p235_p9), 1041408  }
   0xf   : > { %v358_v4 = vshrl.u32 (!%p235_p9), %v357_v0, 7  ;;  %4649 = vmatprep.mubr.msk.bf16.mxu0 (!%p235_p9), %vm5097_vm0, %v5096_v13  ;;  %4659 = vmatprep.mubr.msk.bf16.mxu1 (!%p235_p9), %vm5097_vm0, %v5096_v13  ;;  %vm1940_vm4 = vcmask (!%p235_p9), 293888   ;;  %vm2900_vm5 = vcmask (!%p235_p9), 1043456   ;;  %vm2887_vm6 = vcmask (!%p235_p9), 64512   ;;  %s270_s17 = sand.u32 (!%p235_p9), 1, %s5083_s22   ;;  %s4557_s20 = sshll.u32 (!%p235_p9), %s5158_s25, 11 }
  0x10   : > { %v356_v3 = vunpack.c.0.s8 (!%p235_p9), %v355_v2  ;;  %vm3442_vm7 = vcmask (!%p235_p9), 1041409   ;;  %vm3448_vm8 = vcmask (!%p235_p9), 1043459   ;;  %vm3451_vm9 = vcmask (!%p235_p9), 1044484   ;;  %s4284_s18 = sshll.u32 (!%p235_p9), %s270_s17, 7 }
  0x11   : > { %vm3454_vm10 = vcmask (!%p235_p9), 1045509   ;;  %vm3457_vm11 = vcmask (!%p235_p9), 1046534   ;;  %vm3460_vm12 = vcmask (!%p235_p9), 1047559   ;;  %vm3676_vm13 = vcmask (!%p235_p9), 130050  }
  0x12   : > { %v5196_v6 = vsub.s32 (!%p235_p9), %v356_v3, %v358_v4  ;;  %vm3445_vm14 = vcmask (!%p235_p9), 1042434   ;;  %vm3478_vm15 = vcmask (!%p235_p9), 130048  }
  0x15   : > { %s5187_s9 = scalar_select %p273_p10, %s5158_s25, 1 }
  0x16   : > { %s6373_s25 = scalar_lea.sflag [#allocation4], %s270_s17 }
  0x17   : > { %s4862_s10 = smul.u32 36, %s5187_s9  ;;  %s4548_s16 = sshll.u32 %s5187_s9, 5 }
  0x18   : > { %s5427_s19 = scalar_lea.vmem %s6416_s2, %s4548_s16  ;;  %s4288_s28 = sshll.u32 %s5187_s9, 3 }
  0x19   : > { %s5193_s13 = scalar_lea.vmem %s6414_s0, %s4862_s10  ;;  %s286_s11 = scalar_lea.vmem %s6417_s3, %s4288_s28 }
  0x1a   : > { %v4337_v5 = vld.sshfl [vmem:[%s5193_s13 + $0x2] sm:$0x3 pattern:$0x76325410]  ;;  %v288_v34 = vld [vmem:[%s5193_s13] sm:$0x3]  ;;  %s6364_s10 = scalar_lea.hbm %s6420_s6, %s4557_s20 }
  0x1b   : > { %1091 = vrot.lane.b32.xlu1 %v4337_v5, %s5094_s14  ;;  %v4289_v7 = vld.sshfl [vmem:[%s5193_s13] sm:$0x3 pattern:$0x76325410]  ;;  %305 = vst.msk [vmem:[#allocation2] sm:$0x3] %vm304_vm1, %v288_v34 }
  0x1c   : > { %690 = vrot.lane.b32.xlu0 %v4289_v7, %s5095_s15  ;;  %v4911_v8 = vld [vmem:[%s5193_s13 + $0x2] ss:$0 sps:$4 sm:$0x33]   ;;  %v4912_v9 = vld [vmem:[%s5193_s13] ss:$0 sps:$4 sm:$0x33]  }
  0x1d   : > { %v1194_v10 = vrot.slane %v4911_v8, %v5196_v6  ;;  %v360_v11 = vrot.slane %v4912_v9, %v5196_v6  ;;  %v4913_v12 = vld [vmem:[%s5193_s13 + $0x4] ss:$0 sps:$4 sm:$0x33]   ;;  %v4915_v18 = vld [vmem:[%s5193_s13 + $0x6] ss:$0 sps:$4 sm:$0x33]  }
  0x1e   : > { %v1451_v14 = vrot.slane %v4913_v12, %v5196_v6  ;;  %v4914_v15 = vld [vmem:[%s5193_s13 + $0x4] ss:$0 sps:$4 sm:$0x33]   ;;  %v1210_v19 = vrot.slane %v4915_v18, %v5196_v6  ;;  %v4916_v20 = vld [vmem:[%s5193_s13 + $0x8] ss:$0 sps:$4 sm:$0x33]  }
  0x1f   : > { %1315 = vrot.lane.b32.xlu1 %v1194_v10, %s5095_s15  ;;  %v5213_v16 = vld.sshfl [vmem:[%s5193_s13 + $0x4] sm:$0x3 pattern:$0x76325410]  ;;  %v376_v17 = vrot.slane %v4914_v15, %v5196_v6  ;;  %v1467_v22 = vrot.slane %v4916_v20, %v5196_v6  ;;  %v4371_v44 = vld [vmem:[%s5193_s13 + $0x8] sm:$0x3] }
  0x20   : > { %481 = vrot.lane.b32.xlu0 %v360_v11, %s5094_s14  ;;  %v4339_v21 = vld.sshfl [vmem:[%s5193_s13 + $0x6] sm:$0x3 pattern:$0x76325410]  ;;  %v4369_v37 = vld [vmem:[%s5193_s13 + $0x4] sm:$0x3] }
  0x21   : > { %v4917_v23 = vld [vmem:[%s5193_s13 + $0x8] ss:$0 sps:$4 sm:$0x33]   ;;  %v4918_v26 = vld [vmem:[%s5193_s13 + $0xa] ss:$0 sps:$4 sm:$0x33]  }
  0x22   : > { %v5235_v24 = vld.sshfl [vmem:[%s5193_s13 + $0x8] sm:$0x3 pattern:$0x76325410]  ;;  %v392_v25 = vrot.slane %v4917_v23, %v5196_v6  ;;  %v1226_v27 = vrot.slane %v4918_v26, %v5196_v6  ;;  %1396 = vst.msk [vmem:[#allocation2 + $0xc] sm:$0x3] %vm304_vm1, %v4369_v37 }
  0x23   : > { %1780 = vrot.lane.b32.xlu1 %v5213_v16, %s5095_s15  ;;  %v4919_v28 = vld [vmem:[%s5193_s13 + $0xc] ss:$0 sps:$4 sm:$0x33]   ;;  %v4921_v33 = vld [vmem:[%s5193_s13 + $0xe] ss:$0 sps:$4 sm:$0x33]  }
  0x24   : > { %1572 = vrot.lane.b32.xlu0 %v1451_v14, %s5094_s14  ;;  %v4341_v29 = vld.sshfl [vmem:[%s5193_s13 + $0xa] sm:$0x3 pattern:$0x76325410]  ;;  %v1483_v30 = vrot.slane %v4919_v28, %v5196_v6  ;;  %v290_v41 = vld [vmem:[%s5193_s13 + $0x4] sm:$0x3]  ;;  %v1242_v42 = vrot.slane %v4921_v33, %v5196_v6 }
  0x25   : > { %v4920_v31 = vld [vmem:[%s5193_s13 + $0xc] ss:$0 sps:$4 sm:$0x33]   ;;  %v4936_v36 = vld [vmem:[%s5193_s13 + $0x2] ss:$0 sps:$4 sm:$0x33]  }
  0x26   : > { %v5253_v32 = vld.sshfl [vmem:[%s5193_s13 + $0xc] sm:$0x3 pattern:$0x76325410]  ;;  %v408_v35 = vrot.slane %v4920_v31, %v5196_v6  ;;  %v794_v38 = vrot.slane %v4936_v36, %v5196_v6  ;;  %307 = vst.msk [vmem:[#allocation2 + $0x28] sm:$0x3] %vm304_vm1, %v290_v41 }
  0x27   : > { %694 = vrot.lane.b32.xlu1 %v5213_v16, %s5095_s15  ;;  %v4343_v39 = vld.sshfl [vmem:[%s5193_s13 + $0xe] sm:$0x3 pattern:$0x76325410]  ;;  %1398 = vst.msk [vmem:[#allocation2 + $0x34] sm:$0x3] %vm304_vm1, %v4371_v44 }
  0x28   : > { %485 = vrot.lane.b32.xlu0 %v376_v17, %s5094_s14  ;;  %v4922_v40 = vld [vmem:[%s5193_s13 + $0x10] ss:$0 sps:$4 sm:$0x33]   ;;  %931 = vst.msk [vmem:[#allocation2 + $0x4] sm:$0xc] %vm529_vm2, %v794_v38  ;;  %s5099_s9 = smov [#allocation3]  }
  0x29   : > { %v4942_v43 = vld [vmem:[%s5193_s13 + $0x6] ss:$0 sps:$4 sm:$0x33]   ;;  %v4923_v45 = vld [vmem:[%s5193_s13 + $0x10] ss:$0 sps:$4 sm:$0x33]   ;;  %v1499_v49 = vrot.slane %v4922_v40, %v5196_v6 }
  0x2a   : > { %v810_v46 = vrot.slane %v4942_v43, %v5196_v6  ;;  %v292_v47 = vld [vmem:[%s5193_s13 + $0x8] sm:$0x3]  ;;  %v4373_v48 = vld [vmem:[%s5193_s13 + $0xc] sm:$0x3]  ;;  %v424_v56 = vrot.slane %v4923_v45, %v5196_v6  ;;  %v4375_v57 = vld [vmem:[%s5193_s13 + $0x10] sm:$0x3] }
  0x2b   : > { %1319 = vrot.lane.b32.xlu1 %v1210_v19, %s5095_s15  ;;  %309 = vst.msk [vmem:[#allocation2 + $0x50] sm:$0x3] %vm304_vm1, %v292_v47  ;;  %v4948_v50 = vld [vmem:[%s5193_s13 + $0xa] ss:$0 sps:$4 sm:$0x33]   ;;  %s5033_s12 = sshll.u32 %s5099_s9, 4  ;;  %s5034_s12 = int_to_ptr.vmem [resolvable:$false] %s5033_s12 }
  0x2c   : > { %1095 = vrot.lane.b32.xlu0 %v4339_v21, %s5094_s14  ;;  %933 = vst.msk [vmem:[#allocation2 + $0x2c] sm:$0xc] %vm529_vm2, %v810_v46  ;;  %v5290_v51 = vld.sshfl [vmem:[%s5193_s13 + $0x10] sm:$0x3 pattern:$0x76325410]  ;;  %v826_v53 = vrot.slane %v4948_v50, %v5196_v6 }
  0x2d   : > { %1400 = vst.msk [vmem:[#allocation2 + $0x5c] sm:$0x3] %vm304_vm1, %v4373_v48  ;;  %v4924_v52 = vld [vmem:[%s5193_s13 + $0x12] ss:$0 sps:$4 sm:$0x33]  }
  0x2e   : > { %v294_v54 = vld [vmem:[%s5193_s13 + $0xc] sm:$0x3]  ;;  %v4954_v55 = vld [vmem:[%s5193_s13 + $0xe] ss:$0 sps:$4 sm:$0x33]   ;;  %v1258_v63 = vrot.slane %v4924_v52, %v5196_v6 }
  0x2f   : > { %1784 = vrot.lane.b32.xlu1 %v5235_v24, %s5095_s15  ;;  %311 = vst.msk [vmem:[#allocation2 + $0x78] sm:$0x3] %vm304_vm1, %v294_v54  ;;  %v842_v58 = vrot.slane %v4954_v55, %v5196_v6  ;;  %1402 = vst.msk [vmem:[#allocation2 + $0x84] sm:$0x3] %vm304_vm1, %v4375_v57  ;;  %v296_v60 = vld [vmem:[%s5193_s13 + $0x10] sm:$0x3] }
  0x30   : > { %1576 = vrot.lane.b32.xlu0 %v1467_v22, %s5094_s14  ;;  %935 = vst.msk [vmem:[#allocation2 + $0x54] sm:$0xc] %vm529_vm2, %v826_v53  ;;  %v4925_v59 = vld [vmem:[%s5193_s13 + $0x14] ss:$0 sps:$4 sm:$0x33]  }
  0x31   : > { %v5308_v61 = vld.sshfl [vmem:[%s5193_s13 + $0x12] sm:$0x3 pattern:$0x76325410]  ;;  %937 = vst.msk [vmem:[#allocation2 + $0x7c] sm:$0xc] %vm529_vm2, %v842_v58  ;;  %v1515_v5 = vrot.slane %v4925_v59, %v5196_v6 }
  0x32   : > { %313 = vst.msk [vmem:[#allocation2 + $0xa0] sm:$0x3] %vm304_vm1, %v296_v60  ;;  %v4960_v62 = vld [vmem:[%s5193_s13 + $0x12] ss:$0 sps:$4 sm:$0x33]  }
  0x33   : > { %698 = vrot.lane.b32.xlu1 %v5235_v24, %s5095_s15  ;;  %v4377_v0 = vld [vmem:[%s5193_s13 + $0x14] sm:$0x3]  ;;  %v858_v1 = vrot.slane %v4960_v62, %v5196_v6  ;;  %v4966_v3 = vld [vmem:[%s5193_s13 + $0x16] ss:$0 sps:$4 sm:$0x33]  }
  0x34   : > { %489 = vrot.lane.b32.xlu0 %v392_v25, %s5094_s14  ;;  %1404 = vst.msk [vmem:[#allocation2 + $0xac] sm:$0x3] %vm304_vm1, %v4377_v0  ;;  %v298_v2 = vld [vmem:[%s5193_s13 + $0x14] sm:$0x3]  ;;  %v874_v8 = vrot.slane %v4966_v3, %v5196_v6  ;;  %v4379_v9 = vld [vmem:[%s5193_s13 + $0x18] sm:$0x3] }
  0x35   : > { %315 = vst.msk [vmem:[#allocation2 + $0xc8] sm:$0x3] %vm304_vm1, %v298_v2  ;;  %v5324_v4 = vld.sshfl [vmem:[%s5193_s13 + $0x14] sm:$0x3 pattern:$0x76325410] }
  0x36   : > { %939 = vst.msk [vmem:[#allocation2 + $0xa4] sm:$0xc] %vm529_vm2, %v858_v1  ;;  %v4926_v7 = vld [vmem:[%s5193_s13 + $0x14] ss:$0 sps:$4 sm:$0x33]  }
  0x37   : > { %1323 = vrot.lane.b32.xlu1 %v1226_v27, %s5095_s15  ;;  %941 = vst.msk [vmem:[#allocation2 + $0xcc] sm:$0xc] %vm529_vm2, %v874_v8  ;;  %v4972_v10 = vld [vmem:[%s5193_s13 + $0x1a] ss:$0 sps:$4 sm:$0x33]   ;;  %v440_v11 = vrot.slane %v4926_v7, %v5196_v6 }
  0x38   : > { %1099 = vrot.lane.b32.xlu0 %v4341_v29, %s5094_s14  ;;  %1406 = vst.msk [vmem:[#allocation2 + $0xd4] sm:$0x3] %vm304_vm1, %v4379_v9  ;;  %v4927_v12 = vld [vmem:[%s5193_s13 + $0x16] ss:$0 sps:$4 sm:$0x33]   ;;  %v890_v14 = vrot.slane %v4972_v10, %v5196_v6 }
  0x39   : > { %v4928_v15 = vld [vmem:[%s5193_s13 + $0x18] ss:$0 sps:$4 sm:$0x33]   ;;  %v1274_v18 = vrot.slane %v4927_v12, %v5196_v6  ;;  %v4381_v23 = vld [vmem:[%s5193_s13 + $0x1c] sm:$0x3] }
  0x3a   : > { %v300_v17 = vld [vmem:[%s5193_s13 + $0x18] sm:$0x3]  ;;  %943 = vst.msk [vmem:[#allocation2 + $0xf4] sm:$0xc] %vm529_vm2, %v890_v14  ;;  %v1531_v20 = vrot.slane %v4928_v15, %v5196_v6  ;;  %v302_v29 = vld [vmem:[%s5193_s13 + $0x1c] sm:$0x3] }
  0x3b   : > { %1788 = vrot.lane.b32.xlu1 %v5253_v32, %s5095_s15  ;;  %317 = vst.msk [vmem:[#allocation2 + $0xf0] sm:$0x3] %vm304_vm1, %v300_v17  ;;  %v5352_v19 = vld.sshfl [vmem:[%s5193_s13 + $0x16] sm:$0x3 pattern:$0x76325410] }
  0x3c   : > { %1580 = vrot.lane.b32.xlu0 %v1483_v30, %s5094_s14  ;;  %v4929_v21 = vld [vmem:[%s5193_s13 + $0x18] ss:$0 sps:$4 sm:$0x33]   ;;  %1408 = vst.msk [vmem:[#allocation2 + $0xfc] sm:$0x3] %vm304_vm1, %v4381_v23 }
  0x3d   : > { %v5360_v22 = vld.sshfl [vmem:[%s5193_s13 + $0x18] sm:$0x3 pattern:$0x76325410]  ;;  %v456_v26 = vrot.slane %v4929_v21, %v5196_v6  ;;  %319 = vst.msk [vmem:[#allocation2 + $0x118] sm:$0x3] %vm304_vm1, %v302_v29 }
  0x3e   : > { %v4978_v25 = vld [vmem:[%s5193_s13 + $0x1e] ss:$0 sps:$4 sm:$0x33]   ;;  %v4930_v27 = vld [vmem:[%s5193_s13 + $0x1a] ss:$0 sps:$4 sm:$0x33]  }
  0x3f   : > { %702 = vrot.lane.b32.xlu1 %v5253_v32, %s5095_s15  ;;  %v906_v28 = vrot.slane %v4978_v25, %v5196_v6  ;;  %v1290_v30 = vrot.slane %v4930_v27, %v5196_v6  ;;  %v4931_v31 = vld [vmem:[%s5193_s13 + $0x1c] ss:$0 sps:$4 sm:$0x33]   ;;  %v4383_v37 = vld [vmem:[%s5193_s13 + $0x20] sm:$0x3] }
  0x40   : > { %493 = vrot.lane.b32.xlu0 %v408_v35, %s5094_s14  ;;  %v5380_v33 = vld.sshfl [vmem:[%s5193_s13 + $0x1a] sm:$0x3 pattern:$0x76325410]  ;;  %v1547_v34 = vrot.slane %v4931_v31, %v5196_v6  ;;  %1410 = vst.msk [vmem:[#allocation2 + $0x124] sm:$0x3] %vm304_vm1, %v4383_v37 }
  0x41   : > { %945 = vst.msk [vmem:[#allocation2 + $0x11c] sm:$0xc] %vm529_vm2, %v906_v28  ;;  %v4932_v35 = vld [vmem:[%s5193_s13 + $0x1c] ss:$0 sps:$4 sm:$0x33]  }
  0x42   : > { %v5388_v36 = vld.sshfl [vmem:[%s5193_s13 + $0x1c] sm:$0x3 pattern:$0x76325410]  ;;  %v472_v38 = vrot.slane %v4932_v35, %v5196_v6  ;;  %v5489_v31 = vld [vmem:[%s6415_s1] sm:$0xf] }
  0x43   : > { %1327 = vrot.lane.b32.xlu1 %v1242_v42, %s5095_s15  ;;  %v4934_v41 = vld [vmem:[%s5193_s13 + $0x20] ss:$0 sps:$4 sm:$0x33]   ;;  %v4935_v44 = vld [vmem:[%s5193_s13 + $0x2] ss:$0 sps:$4 sm:$0x33]  }
  0x44   : > { %1103 = vrot.lane.b32.xlu0 %v4343_v39, %s5094_s14  ;;  %v4933_v39 = vld [vmem:[%s5193_s13 + $0x1e] ss:$0 sps:$4 sm:$0x33]   ;;  %v1563_v43 = vrot.slane %v4934_v41, %v5196_v6  ;;  %v368_v46 = vrot.slane %v4935_v44, %v5196_v6  ;;  %v4983_v47 = vld [vmem:[%s5193_s13 + $0x4] ss:$0 sps:$4 sm:$0x33]  }
  0x45   : > { %v1306_v40 = vrot.slane %v4933_v39, %v5196_v6  ;;  %v5403_v42 = vld.sshfl [vmem:[%s5193_s13 + $0x1e] sm:$0x3 pattern:$0x76325410]  ;;  %v1202_v52 = vrot.slane %v4983_v47, %v5196_v6 }
  0x46   : > { %v5411_v45 = vld.sshfl [vmem:[%s5193_s13 + $0x20] sm:$0x3 pattern:$0x76325410] }
  0x47   : > { %1792 = vrot.lane.b32.xlu1 %v5290_v51, %s5095_s15  ;;  %v4290_v48 = vld.sshfl [vmem:[%s5193_s13 + $0x2] sm:$0x3 pattern:$0x76325410] }
  0x48   : > { %1584 = vrot.lane.b32.xlu0 %v1499_v49, %s5094_s14  ;;  %v5098_v49 = vmov 0   ;;  %v4939_v50 = vld [vmem:[%s5193_s13 + $0x6] ss:$0 sps:$4 sm:$0x33]  }
  0x49   : > { %4910 = vset.pattern.permute.xlu0 %v5098_v49  ;;  %v4941_v53 = vld [vmem:[%s5193_s13 + $0x6] ss:$0 sps:$4 sm:$0x33]   ;;  %v1459_v55 = vrot.slane %v4939_v50, %v5196_v6  ;;  %v4986_v57 = vld [vmem:[%s5193_s13 + $0x8] ss:$0 sps:$4 sm:$0x33]  }
  0x4a   : > { %v4418_v54 = vld.sshfl [vmem:[%s5193_s13 + $0x6] sm:$0x3 pattern:$0x76325410] }
  0x4b   : > { %706 = vrot.lane.b32.xlu1 %v5290_v51, %s5095_s15  ;;  %v4945_v58 = vld [vmem:[%s5193_s13 + $0xa] ss:$0 sps:$4 sm:$0x33]   ;;  %v4957_v27 = vld [vmem:[%s5193_s13 + $0x12] ss:$0 sps:$4 sm:$0x33]  }
  0x4c   : > { %497 = vrot.lane.b32.xlu0 %v424_v56, %s5094_s14  ;;  %v384_v56 = vrot.slane %v4941_v53, %v5196_v6  ;;  %v1475_v59 = vrot.slane %v4945_v58, %v5196_v6  ;;  %v4947_v60 = vld [vmem:[%s5193_s13 + $0xa] ss:$0 sps:$4 sm:$0x33]   ;;  %v4959_v35 = vld [vmem:[%s5193_s13 + $0x12] ss:$0 sps:$4 sm:$0x33]  }
  0x4d   : > { %v400_v1 = vrot.slane %v4947_v60, %v5196_v6  ;;  %v4422_v12 = vld.sshfl [vmem:[%s5193_s13 + $0xe] sm:$0x3 pattern:$0x76325410] }
  0x4e   : > { %v4991_v41 = vld [vmem:[%s5193_s13 + $0x14] ss:$0 sps:$4 sm:$0x33]   ;;  %v4963_v49 = vld [vmem:[%s5193_s13 + $0x16] ss:$0 sps:$4 sm:$0x33]  }
  0x4f   : > { %1331 = vrot.lane.b32.xlu1 %v1258_v63, %s5095_s15  ;;  %v4420_v63 = vld.sshfl [vmem:[%s5193_s13 + $0xa] sm:$0x3 pattern:$0x76325410]  ;;  %v1523_v53 = vrot.slane %v4963_v49, %v5196_v6 }
  0x50   : > { %1107 = vrot.lane.b32.xlu0 %v5308_v61, %s5094_s14  ;;  %v4992_v58 = vld [vmem:[%s5193_s13 + $0x18] ss:$0 sps:$4 sm:$0x33]  }
  0x53   : > { %1796 = vrot.lane.b32.xlu1 %v5324_v4, %s5095_s15 }
  0x54   : > { %1588 = vrot.lane.b32.xlu0 %v1515_v5, %s5094_s14  ;;  %v4951_v5 = vld [vmem:[%s5193_s13 + $0xe] ss:$0 sps:$4 sm:$0x33]  }
  0x55   : > { %v1491_v10 = vrot.slane %v4951_v5, %v5196_v6  ;;  %v4971_v5 = vld [vmem:[%s5193_s13 + $0x1a] ss:$0 sps:$4 sm:$0x33]  }
  0x57   : > { %710 = vrot.lane.b32.xlu1 %v5324_v4, %s5095_s15 }
  0x58   : > { %501 = vrot.lane.b32.xlu0 %v440_v11, %s5094_s14  ;;  %v4953_v11 = vld [vmem:[%s5193_s13 + $0xe] ss:$0 sps:$4 sm:$0x33]  }
  0x5b   : > { %1335 = vrot.lane.b32.xlu1 %v1274_v18, %s5095_s15  ;;  %v416_v18 = vrot.slane %v4953_v11, %v5196_v6 }
  0x5c   : > { %1111 = vrot.lane.b32.xlu0 %v5352_v19, %s5094_s14 }
  0x5f   : > { %1800 = vrot.lane.b32.xlu1 %v5360_v22, %s5095_s15 }
  0x60   : > { %1592 = vrot.lane.b32.xlu0 %v1531_v20, %s5094_s14 }
  0x63   : > { %714 = vrot.lane.b32.xlu1 %v5360_v22, %s5095_s15 }
  0x64   : > { %505 = vrot.lane.b32.xlu0 %v456_v26, %s5094_s14 }
  0x67   : > { %1339 = vrot.lane.b32.xlu1 %v1290_v30, %s5095_s15 }
  0x68   : > { %1115 = vrot.lane.b32.xlu0 %v5380_v33, %s5094_s14 }
  0x6b   : > { %1804 = vrot.lane.b32.xlu1 %v5388_v36, %s5095_s15 }
  0x6c   : > { %1596 = vrot.lane.b32.xlu0 %v1547_v34, %s5094_s14  ;;  %v1507_v34 = vrot.slane %v4957_v27, %v5196_v6  ;;  %v4995_v27 = vld [vmem:[%s5193_s13 + $0x4] ss:$0 sps:$4 sm:$0x33]  }
  0x6f   : > { %718 = vrot.lane.b32.xlu1 %v5388_v36, %s5095_s15 }
  0x70   : > { %509 = vrot.lane.b32.xlu0 %v472_v38, %s5094_s14 }
  0x73   : > { %1343 = vrot.lane.b32.xlu1 %v1306_v40, %s5095_s15  ;;  %v4298_v40 = vld.sshfl [vmem:[%s5193_s13 + $0x12] sm:$0x3 pattern:$0x76325410] }
  0x74   : > { %1119 = vrot.lane.b32.xlu0 %v5403_v42, %s5094_s14 }
  0x77   : > { %1808 = vrot.lane.b32.xlu1 %v5411_v45, %s5095_s15 }
  0x78   : > { %1600 = vrot.lane.b32.xlu0 %v1563_v43, %s5094_s14 }
  0x7b   : > { %692 = vrot.lane.b32.xlu1 %v4290_v48, %s5095_s15 }
  0x7c   : > { %483 = vrot.lane.b32.xlu0 %v368_v46, %s5094_s14 }
  0x7f   : > { %1317 = vrot.lane.b32.xlu1 %v1202_v52, %s5095_s15 }
  0x80   : > { %1093 = vrot.lane.b32.xlu0 %v5213_v16, %s5094_s14  ;;  %v1218_v16 = vrot.slane %v4986_v57, %v5196_v6 }
  0x83   : > { %1782 = vrot.lane.b32.xlu1 %v4418_v54, %s5095_s15 }
  0x84   : > { %1574 = vrot.lane.b32.xlu0 %v1459_v55, %s5094_s14 }
  0x87   : > { %696 = vrot.lane.b32.xlu1 %v4418_v54, %s5095_s15  ;;  %v4965_v54 = vld [vmem:[%s5193_s13 + $0x16] ss:$0 sps:$4 sm:$0x33]  }
  0x88   : > { %487 = vrot.lane.b32.xlu0 %v384_v56, %s5094_s14 }
  0x8b   : > { %1321 = vrot.lane.b32.xlu1 %v1218_v16, %s5095_s15 }
  0x8c   : > { %1097 = vrot.lane.b32.xlu0 %v5235_v24, %s5094_s14  ;;  %v4989_v24 = vld [vmem:[%s5193_s13 + $0xc] ss:$0 sps:$4 sm:$0x33]  }
  0x8d   : > { %v1092_v62 = vpop.permute.xlu1 %1091  ;;  %v1234_v7 = vrot.slane %v4989_v24, %v5196_v6 }
  0x8e   : > { %1139 = vst.msk [vmem:[#allocation2 + $0x8] sm:$0x3] %vm304_vm1, %v1092_v62  ;;  %v691_v0 = vpop.permute.xlu0 %690 }
  0x8f   : > { %738 = vst.msk [vmem:[#allocation2 + $0x4] sm:$0x3] %vm304_vm1, %v691_v0  ;;  %1786 = vrot.lane.b32.xlu1 %v4420_v63, %s5095_s15  ;;  %v4969_v0 = vld [vmem:[%s5193_s13 + $0x1a] ss:$0 sps:$4 sm:$0x33]  }
  0x90   : > { %1578 = vrot.lane.b32.xlu0 %v1475_v59, %s5094_s14 }
  0x91   : > { %v1316_v2 = vpop.permute.xlu1 %1315 }
  0x92   : > { %v482_v3 = vpop.permute.xlu0 %481  ;;  %1363 = vst.msk [vmem:[#allocation2 + $0x8] sm:$0xc] %vm529_vm2, %v1316_v2  ;;  %v1282_v2 = vrot.slane %v4992_v58, %v5196_v6 }
  0x93   : > { %530 = vst.msk [vmem:[#allocation2] sm:$0xc] %vm529_vm2, %v482_v3  ;;  %700 = vrot.lane.b32.xlu1 %v4420_v63, %s5095_s15  ;;  %v1539_v3 = vrot.slane %v4969_v0, %v5196_v6 }
  0x94   : > { %491 = vrot.lane.b32.xlu0 %v400_v1, %s5094_s14 }
  0x95   : > { %v1781_v8 = vpop.permute.xlu1 %1780 }
  0x96   : > { %v1573_v9 = vpop.permute.xlu0 %1572  ;;  %1828 = vst.msk [vmem:[#allocation2 + $0x10] sm:$0x3] %vm304_vm1, %v1781_v8 }
  0x97   : > { %1620 = vst.msk [vmem:[#allocation2 + $0xc] sm:$0xc] %vm529_vm2, %v1573_v9  ;;  %1325 = vrot.lane.b32.xlu1 %v1234_v7, %s5095_s15 }
  0x98   : > { %1101 = vrot.lane.b32.xlu0 %v5253_v32, %s5094_s14  ;;  %v4990_v32 = vld [vmem:[%s5193_s13 + $0x10] ss:$0 sps:$4 sm:$0x33]  }
  0x99   : > { %v695_v14 = vpop.permute.xlu1 %694  ;;  %v1250_v28 = vrot.slane %v4990_v32, %v5196_v6 }
  0x9a   : > { %v486_v15 = vpop.permute.xlu0 %485  ;;  %v4937_v17 = vld [vmem:[#allocation2] sm:$0xff]   ;;  %740 = vst.msk [vmem:[#allocation2 + $0x2c] sm:$0x3] %vm304_vm1, %v695_v14 }
  0x9b   : > { %532 = vst.msk [vmem:[#allocation2 + $0x28] sm:$0xc] %vm529_vm2, %v486_v15  ;;  %4644 = vmatpush3.bf16.msra.mxu0 %v4937_v17  ;;  %1790 = vrot.lane.b32.xlu1 %v4422_v12, %s5095_s15  ;;  %v4975_v17 = vld [vmem:[%s5193_s13 + $0x1e] ss:$0 sps:$4 sm:$0x33]  }
  0x9c   : > { %1582 = vrot.lane.b32.xlu0 %v1491_v10, %s5094_s14  ;;  %4645 = vmatprep.subr.bf16.mxu0 %v5096_v13 }
  0x9d   : > { %v1320_v20 = vpop.permute.xlu1 %1319  ;;  %v4940_v25 = vld [vmem:[#allocation2 + $0x10] ss:$0 sps:$4 sm:$0x33]  }
  0x9e   : > { %v1096_v21 = vpop.permute.xlu0 %1095  ;;  %v4938_v23 = vld [vmem:[#allocation2 + $0x8] sm:$0xff]   ;;  %1365 = vst.msk [vmem:[#allocation2 + $0x30] sm:$0xc] %vm529_vm2, %v1320_v20  ;;  %v1946_v26 = vsel %vm1944_vm3, %v4940_v25, 0 }
  0x9f   : > { %1141 = vst.msk [vmem:[#allocation2 + $0x30] sm:$0x3] %vm304_vm1, %v1096_v21  ;;  %4646 = vmatpush3.bf16.msra.mxu0 %v4938_v23  ;;  %704 = vrot.lane.b32.xlu1 %v4422_v12, %s5095_s15  ;;  %v1555_v21 = vrot.slane %v4975_v17, %v5196_v6  ;;  %v4977_v23 = vld [vmem:[%s5193_s13 + $0x1e] ss:$0 sps:$4 sm:$0x33]  }
  0xa0   : > { %495 = vrot.lane.b32.xlu0 %v416_v18, %s5094_s14  ;;  %4647 = vmatprep.subr.bf16.mxu0 %v5096_v13 }
  0xa1   : > { %v1785_v29 = vpop.permute.xlu1 %1784 }
  0xa2   : > { %v1577_v30 = vpop.permute.xlu0 %1576  ;;  %1830 = vst.msk [vmem:[#allocation2 + $0x38] sm:$0x3] %vm304_vm1, %v1785_v29  ;;  %v4943_v39 = vld [vmem:[#allocation2 + $0x28] sm:$0xff]   ;;  %v4994_v29 = vld [vmem:[%s5193_s13 + $0x20] ss:$0 sps:$4 sm:$0x33]  }
  0xa3   : > { %1622 = vst.msk [vmem:[#allocation2 + $0x34] sm:$0xc] %vm529_vm2, %v1577_v30  ;;  %4648 = vmatpush3.bf16.msra.mxu0 %v1946_v26  ;;  %1329 = vrot.lane.b32.xlu1 %v1250_v28, %s5095_s15  ;;  %v480_v28 = vrot.slane %v4977_v23, %v5196_v6 }
  0xa4   : > { %1105 = vrot.lane.b32.xlu0 %v5290_v51, %s5094_s14  ;;  %4663 = vmatprep.subr.bf16.mxu0 %v5096_v13  ;;  %v432_v51 = vrot.slane %v4959_v35, %v5196_v6 }
  0xa5   : > { %v699_v37 = vpop.permute.xlu1 %698 }
  0xa6   : > { %v490_v38 = vpop.permute.xlu0 %489  ;;  %742 = vst.msk [vmem:[#allocation2 + $0x54] sm:$0x3] %vm304_vm1, %v699_v37  ;;  %4650 = vmatmul.mubr.msk.bf16.vlgmr.msra.gmra.mrb[0].mxu0 %vm1940_vm4, %v5489_v31  ;;  %v802_v37 = vrot.slane %v4995_v27, %v5196_v6 }
  0xa7   : > { %534 = vst.msk [vmem:[#allocation2 + $0x50] sm:$0xc] %vm529_vm2, %v490_v38  ;;  %4664 = vmatpush3.bf16.msra.mxu0 %v4943_v39  ;;  %4669 = vmatprep.mubr.msk.bf16.mxu0 %vm5097_vm0, %v5096_v13 }
  0xa8   : > { %4665 = vmatprep.subr.bf16.mxu0 %v5096_v13  ;;  %1586 = vrot.lane.b32.xlu0 %v1507_v34, %s5094_s14  ;;  %932 = vst.msk [vmem:[#allocation2 + $0x18] sm:$0xc] %vm529_vm2, %v802_v37 }
  0xa9   : > { %v1324_v43 = vpop.permute.xlu1 %1323  ;;  %1794 = vrot.lane.b32.xlu1 %v5308_v61, %s5095_s15  ;;  %v4946_v47 = vld [vmem:[#allocation2 + $0x38] ss:$0 sps:$4 sm:$0x33]   ;;  %v1266_v61 = vrot.slane %v4991_v41, %v5196_v6 }
  0xaa   : > { %v1100_v44 = vpop.permute.xlu0 %1099  ;;  %v4944_v46 = vld [vmem:[#allocation2 + $0x30] sm:$0xff]   ;;  %1367 = vst.msk [vmem:[#allocation2 + $0x58] sm:$0xc] %vm529_vm2, %v1324_v43  ;;  %v2062_v48 = vsel %vm1944_vm3, %v4946_v47, 0  ;;  %v1314_v43 = vrot.slane %v4994_v29, %v5196_v6 }
  0xab   : > { %1143 = vst.msk [vmem:[#allocation2 + $0x58] sm:$0x3] %vm304_vm1, %v1100_v44  ;;  %4666 = vmatpush3.bf16.msra.mxu0 %v4944_v46  ;;  %v4987_v29 = vld [vmem:[%s5427_s19 + $0x10] sm:$0xff]  }
  0xac   : > { %4667 = vmatprep.subr.bf16.mxu0 %v5096_v13  ;;  %499 = vrot.lane.b32.xlu0 %v432_v51, %s5094_s14  ;;  %v4981_v51 = vld [vmem:[%s5193_s13 + $0x22] ss:$0 sps:$4 sm:$0x33]  }
  0xad   : > { %v1789_v50 = vpop.permute.xlu1 %1788  ;;  %708 = vrot.lane.b32.xlu1 %v4298_v40, %s5095_s15  ;;  %v1571_v44 = vrot.slane %v4981_v51, %v5196_v6  ;;  %v4374_v51 = vld [vmem:[%s5193_s13 + $0xe] sm:$0x3] }
  0xae   : > { %v1581_v52 = vpop.permute.xlu0 %1580  ;;  %1832 = vst.msk [vmem:[#allocation2 + $0x60] sm:$0x3] %vm304_vm1, %v1789_v50  ;;  %v4949_v57 = vld [vmem:[#allocation2 + $0x50] sm:$0xff]   ;;  %1401 = vst.msk [vmem:[#allocation2 + $0x70] sm:$0x3] %vm304_vm1, %v4374_v51 }
  0xaf   : > { %1624 = vst.msk [vmem:[#allocation2 + $0x5c] sm:$0xc] %vm529_vm2, %v1581_v52  ;;  %4668 = vmatpush3.bf16.msra.mxu0 %v2062_v48 }
  0xb0   : > { %4683 = vmatprep.subr.bf16.mxu0 %v5096_v13  ;;  %1109 = vrot.lane.b32.xlu0 %v5324_v4, %s5094_s14  ;;  %v448_v4 = vrot.slane %v4965_v54, %v5196_v6 }
  0xb1   : > { %v703_v55 = vpop.permute.xlu1 %702  ;;  %1333 = vrot.lane.b32.xlu1 %v1266_v61, %s5095_s15 }
  0xb2   : > { %v494_v56 = vpop.permute.xlu0 %493  ;;  %744 = vst.msk [vmem:[#allocation2 + $0x7c] sm:$0x3] %vm304_vm1, %v703_v55  ;;  %4670 = vmatmul.mubr.msk.bf16.vlgmr.msra.gmra.mrb[4].mxu0 %vm1940_vm4, %v5489_v31 }
  0xb3   : > { %536 = vst.msk [vmem:[#allocation2 + $0x78] sm:$0xc] %vm529_vm2, %v494_v56  ;;  %4684 = vmatpush3.bf16.msra.mxu0 %v4949_v57  ;;  %4689 = vmatprep.mubr.msk.bf16.mxu0 %vm5097_vm0, %v5096_v13 }
  0xb4   : > { %4685 = vmatprep.subr.bf16.mxu0 %v5096_v13  ;;  %1590 = vrot.lane.b32.xlu0 %v1523_v53, %s5094_s14 }
  0xb5   : > { %v1328_v16 = vpop.permute.xlu1 %1327  ;;  %1798 = vrot.lane.b32.xlu1 %v5352_v19, %s5095_s15  ;;  %v4952_v62 = vld [vmem:[#allocation2 + $0x60] ss:$0 sps:$4 sm:$0x33]  }
  0xb6   : > { %v1104_v59 = vpop.permute.xlu0 %1103  ;;  %v4950_v60 = vld [vmem:[#allocation2 + $0x58] sm:$0xff]   ;;  %1369 = vst.msk [vmem:[#allocation2 + $0x80] sm:$0xc] %vm529_vm2, %v1328_v16  ;;  %v2178_v63 = vsel %vm1944_vm3, %v4952_v62, 0 }
  0xb7   : > { %1145 = vst.msk [vmem:[#allocation2 + $0x80] sm:$0x3] %vm304_vm1, %v1104_v59  ;;  %4686 = vmatpush3.bf16.msra.mxu0 %v4950_v60 }
  0xb8   : > { %4687 = vmatprep.subr.bf16.mxu0 %v5096_v13  ;;  %503 = vrot.lane.b32.xlu0 %v448_v4, %s5094_s14 }
  0xb9   : > { %v1793_v1 = vpop.permute.xlu1 %1792  ;;  %712 = vrot.lane.b32.xlu1 %v5352_v19, %s5095_s15  ;;  %v464_v19 = vrot.slane %v4971_v5, %v5196_v6 }
  0xba   : > { %v1585_v24 = vpop.permute.xlu0 %1584  ;;  %1834 = vst.msk [vmem:[#allocation2 + $0x88] sm:$0x3] %vm304_vm1, %v1793_v1  ;;  %v4955_v9 = vld [vmem:[#allocation2 + $0x78] sm:$0xff]   ;;  %v4370_v1 = vld [vmem:[%s5193_s13 + $0x6] sm:$0x3] }
  0xbb   : > { %1626 = vst.msk [vmem:[#allocation2 + $0x84] sm:$0xc] %vm529_vm2, %v1585_v24  ;;  %4688 = vmatpush3.bf16.msra.mxu0 %v2178_v63 }
  0xbc   : > { %4703 = vmatprep.subr.bf16.mxu0 %v5096_v13  ;;  %1113 = vrot.lane.b32.xlu0 %v5360_v22, %s5094_s14  ;;  %v4993_v22 = vld [vmem:[%s5193_s13 + $0x1c] ss:$0 sps:$4 sm:$0x33]   ;;  %1397 = vst.msk [vmem:[#allocation2 + $0x20] sm:$0x3] %vm304_vm1, %v4370_v1 }
  0xbd   : > { %v707_v7 = vpop.permute.xlu1 %706  ;;  %1337 = vrot.lane.b32.xlu1 %v1282_v2, %s5095_s15  ;;  %v1298_v20 = vrot.slane %v4993_v22, %v5196_v6 }
  0xbe   : > { %v498_v8 = vpop.permute.xlu0 %497  ;;  %746 = vst.msk [vmem:[#allocation2 + $0xa4] sm:$0x3] %vm304_vm1, %v707_v7  ;;  %4690 = vmatmul.mubr.msk.bf16.vlgmr.msra.gmra.mrb[8].mxu0 %vm1940_vm4, %v5489_v31 }
  0xbf   : > { %538 = vst.msk [vmem:[#allocation2 + $0xa0] sm:$0xc] %vm529_vm2, %v498_v8  ;;  %4704 = vmatpush3.bf16.msra.mxu0 %v4955_v9  ;;  %4709 = vmatprep.mubr.msk.bf16.mxu0 %vm5097_vm0, %v5096_v13 }
  0xc0   : > { %4705 = vmatprep.subr.bf16.mxu0 %v5096_v13  ;;  %1594 = vrot.lane.b32.xlu0 %v1539_v3, %s5094_s14 }
  0xc1   : > { %v1332_v10 = vpop.permute.xlu1 %1331  ;;  %1802 = vrot.lane.b32.xlu1 %v5380_v33, %s5095_s15  ;;  %v4958_v14 = vld [vmem:[#allocation2 + $0x88] ss:$0 sps:$4 sm:$0x33]  }
  0xc2   : > { %v1108_v11 = vpop.permute.xlu0 %1107  ;;  %v4956_v12 = vld [vmem:[#allocation2 + $0x80] sm:$0xff]   ;;  %1371 = vst.msk [vmem:[#allocation2 + $0xa8] sm:$0xc] %vm529_vm2, %v1332_v10  ;;  %v2294_v15 = vsel %vm1944_vm3, %v4958_v14, 0 }
  0xc3   : > { %1147 = vst.msk [vmem:[#allocation2 + $0xa8] sm:$0x3] %vm304_vm1, %v1108_v11  ;;  %4706 = vmatpush3.bf16.msra.mxu0 %v4956_v12  ;;  %v2866_v10 = vld [vmem:[%s6419_s5] sm:$0xf]  ;;  %v291_v11 = vld [vmem:[%s5193_s13 + $0x6] sm:$0x3] }
  0xc4   : > { %4707 = vmatprep.subr.bf16.mxu0 %v5096_v13  ;;  %507 = vrot.lane.b32.xlu0 %v464_v19, %s5094_s14  ;;  %v4999_v19 = vld [vmem:[%s5193_s13 + $0x8] ss:$0 sps:$4 sm:$0x33]   ;;  %308 = vst.msk [vmem:[#allocation2 + $0x3c] sm:$0x3] %vm304_vm1, %v291_v11 }
  0xc5   : > { %v1797_v18 = vpop.permute.xlu1 %1796  ;;  %716 = vrot.lane.b32.xlu1 %v5380_v33, %s5095_s15  ;;  %v818_v12 = vrot.slane %v4999_v19, %v5196_v6  ;;  %v299_v11 = vld [vmem:[%s5193_s13 + $0x16] sm:$0x3] }
  0xc6   : > { %v1589_v32 = vpop.permute.xlu0 %1588  ;;  %1836 = vst.msk [vmem:[#allocation2 + $0xb0] sm:$0x3] %vm304_vm1, %v1797_v18  ;;  %v4961_v26 = vld [vmem:[#allocation2 + $0xa0] sm:$0xff]   ;;  %316 = vst.msk [vmem:[#allocation2 + $0xdc] sm:$0x3] %vm304_vm1, %v299_v11 }
  0xc7   : > { %1628 = vst.msk [vmem:[#allocation2 + $0xac] sm:$0xc] %vm529_vm2, %v1589_v32  ;;  %4708 = vmatpush3.bf16.msra.mxu0 %v2294_v15  ;;  %934 = vst.msk [vmem:[#allocation2 + $0x40] sm:$0xc] %vm529_vm2, %v818_v12  ;;  %v4984_v18 = vld [vmem:[%s5427_s19] sm:$0xff]   ;;  %v2902_v32 = vsel %vm2900_vm5, %v2866_v10, 0 }
  0xc8   : > { %4723 = vmatprep.subr.bf16.mxu0 %v5096_v13  ;;  %1117 = vrot.lane.b32.xlu0 %v5388_v36, %s5094_s14  ;;  %v289_v36 = vld [vmem:[%s5193_s13 + $0x2] sm:$0x3] }
  0xc9   : > { %v711_v25 = vpop.permute.xlu1 %710  ;;  %1341 = vrot.lane.b32.xlu1 %v1298_v20, %s5095_s15  ;;  %306 = vst.msk [vmem:[#allocation2 + $0x14] sm:$0x3] %vm304_vm1, %v289_v36  ;;  %v4372_v20 = vld [vmem:[%s5193_s13 + $0xa] sm:$0x3] }
  0xca   : > { %v502_v33 = vpop.permute.xlu0 %501  ;;  %748 = vst.msk [vmem:[#allocation2 + $0xcc] sm:$0x3] %vm304_vm1, %v711_v25  ;;  %4710 = vmatmul.mubr.msk.bf16.vlgmr.msra.gmra.mrb[12].mxu0 %vm1940_vm4, %v5489_v31  ;;  %1399 = vst.msk [vmem:[#allocation2 + $0x48] sm:$0x3] %vm304_vm1, %v4372_v20  ;;  %v4985_v25 = vld [vmem:[%s5427_s19 + $0x8] sm:$0xff]  }
  0xcb   : > { %540 = vst.msk [vmem:[#allocation2 + $0xc8] sm:$0xc] %vm529_vm2, %v502_v33  ;;  %4724 = vmatpush3.bf16.msra.mxu0 %v4961_v26  ;;  %4729 = vmatprep.mubr.msk.bf16.mxu0 %vm5097_vm0, %v5096_v13 }
  0xcc   : > { %4725 = vmatprep.subr.bf16.mxu0 %v5096_v13  ;;  %1598 = vrot.lane.b32.xlu0 %v1555_v21, %s5094_s14 }
  0xcd   : > { %v1336_v30 = vpop.permute.xlu1 %1335  ;;  %1806 = vrot.lane.b32.xlu1 %v5403_v42, %s5095_s15  ;;  %v4964_v38 = vld [vmem:[#allocation2 + $0xb0] ss:$0 sps:$4 sm:$0x33]  }
  0xce   : > { %v1112_v34 = vpop.permute.xlu0 %1111  ;;  %v4962_v35 = vld [vmem:[#allocation2 + $0xa8] sm:$0xff]   ;;  %1373 = vst.msk [vmem:[#allocation2 + $0xd0] sm:$0xc] %vm529_vm2, %v1336_v30  ;;  %v2410_v39 = vsel %vm1944_vm3, %v4964_v38, 0 }
  0xcf   : > { %1149 = vst.msk [vmem:[#allocation2 + $0xd0] sm:$0x3] %vm304_vm1, %v1112_v34  ;;  %4726 = vmatpush3.bf16.msra.mxu0 %v4962_v35  ;;  %v293_v34 = vld [vmem:[%s5193_s13 + $0xa] sm:$0x3] }
  0xd0   : > { %4727 = vmatprep.subr.bf16.mxu0 %v5096_v13  ;;  %511 = vrot.lane.b32.xlu0 %v480_v28, %s5094_s14  ;;  %v5003_v28 = vld [vmem:[%s5193_s13 + $0xc] ss:$0 sps:$4 sm:$0x33]   ;;  %310 = vst.msk [vmem:[#allocation2 + $0x64] sm:$0x3] %vm304_vm1, %v293_v34 }
  0xd1   : > { %v1801_v40 = vpop.permute.xlu1 %1800  ;;  %720 = vrot.lane.b32.xlu1 %v5403_v42, %s5095_s15  ;;  %v4432_v42 = vld.sshfl [vmem:[%s5193_s13 + $0x22] sm:$0x3 pattern:$0x76325410]  ;;  %v834_v35 = vrot.slane %v5003_v28, %v5196_v6 }
  0xd2   : > { %v1593_v41 = vpop.permute.xlu0 %1592  ;;  %1838 = vst.msk [vmem:[#allocation2 + $0xd8] sm:$0x3] %vm304_vm1, %v1801_v40  ;;  %v4967_v48 = vld [vmem:[#allocation2 + $0xc8] sm:$0xff]  }
  0xd3   : > { %1630 = vst.msk [vmem:[#allocation2 + $0xd4] sm:$0xc] %vm529_vm2, %v1593_v41  ;;  %4728 = vmatpush3.bf16.msra.mxu0 %v2410_v39  ;;  %936 = vst.msk [vmem:[#allocation2 + $0x68] sm:$0xc] %vm529_vm2, %v834_v35  ;;  %v4382_v35 = vld [vmem:[%s5193_s13 + $0x1e] sm:$0x3] }
  0xd4   : > { %4743 = vmatprep.subr.bf16.mxu0 %v5096_v13  ;;  %1121 = vrot.lane.b32.xlu0 %v5411_v45, %s5094_s14  ;;  %v3355_v45 = vld [vmem:[%s286_s11] sm:$0xff]  ;;  %1409 = vst.msk [vmem:[#allocation2 + $0x110] sm:$0x3] %vm304_vm1, %v4382_v35 }
  0xd5   : > { %v715_v46 = vpop.permute.xlu1 %714  ;;  %1345 = vrot.lane.b32.xlu1 %v1314_v43, %s5095_s15  ;;  %v4988_v43 = vld [vmem:[%s5427_s19 + $0x18] sm:$0xff]   ;;  %s5973_s19 = scalar_lea.vmem [#allocation3], %s4284_s18 }
  0xd6   : > { %v506_v47 = vpop.permute.xlu0 %505  ;;  %750 = vst.msk [vmem:[#allocation2 + $0xf4] sm:$0x3] %vm304_vm1, %v715_v46  ;;  %4730 = vmatmul.mubr.msk.bf16.vlgmr.msra.gmra.mrb[16].mxu0 %vm1940_vm4, %v5489_v31  ;;  %s4194_s26 = sshll.u32 %s5973_s19, 4  ;;  %s6366_s26 = int_to_ptr.vmem [resolvable:$true] %s4194_s26 }
  0xd7   : > { %542 = vst.msk [vmem:[#allocation2 + $0xf0] sm:$0xc] %vm529_vm2, %v506_v47  ;;  %4744 = vmatpush3.bf16.msra.mxu0 %v4967_v48  ;;  %4749 = vmatprep.mubr.msk.bf16.mxu0 %vm5097_vm0, %v5096_v13  ;;  %s5029_s11 = scalar_lea.vmem %s6366_s26, 2048  ;;  %p5036_p0 = scmp.lt.s32.totalorder %s6366_s26, %s5034_s12 }
  0xd8   : > { %4745 = vmatprep.subr.bf16.mxu0 %v5096_v13  ;;  %1602 = vrot.lane.b32.xlu0 %v1571_v44, %s5094_s14  ;;  %p5030_p11 = scmp.ne.s32.totalorder %s6366_s26, %s5029_s11  ;;  %s5035_s14 = scalar_lea.vmem %s5034_s12, 4096 }
  0xd9   : > { %v1340_v49 = vpop.permute.xlu1 %1339  ;;  %1810 = vrot.lane.b32.xlu1 %v4432_v42, %s5095_s15  ;;  %v4970_v61 = vld [vmem:[#allocation2 + $0xd8] ss:$0 sps:$4 sm:$0x33]   ;;  %v5007_v42 = vld [vmem:[%s5193_s13 + $0x10] ss:$0 sps:$4 sm:$0x33]   ;;  %p5037_p1 = scmp.lt.s32.totalorder %s5035_s14, %s5029_s11 }
  0xda   : > { %v1116_v50 = vpop.permute.xlu0 %1115  ;;  %v4968_v52 = vld [vmem:[#allocation2 + $0xd0] sm:$0xff]   ;;  %1375 = vst.msk [vmem:[#allocation2 + $0xf8] sm:$0xc] %vm529_vm2, %v1340_v49  ;;  %v2526_v53 = vsel %vm1944_vm3, %v4970_v61, 0  ;;  %v295_v49 = vld [vmem:[%s5193_s13 + $0xe] sm:$0x3]  ;;  %p5031_p12 = pnand %p5030_p11, %p5175_p5 }
  0xdb   : > { %1151 = vst.msk [vmem:[#allocation2 + $0xf8] sm:$0x3] %vm304_vm1, %v1116_v50  ;;  %4746 = vmatpush3.bf16.msra.mxu0 %v4968_v52  ;;  %v850_v50 = vrot.slane %v5007_v42, %v5196_v6  ;;  %312 = vst.msk [vmem:[#allocation2 + $0x8c] sm:$0x3] %vm304_vm1, %v295_v49  ;;  %v4384_v42 = vld [vmem:[%s5193_s13 + $0x22] sm:$0x3]  ;;  %p5038_p2 = por %p5037_p1, %p5036_p0 }
  0xdc   : > { %4747 = vmatprep.subr.bf16.mxu0 %v5096_v13  ;;  %3358 = vperm.xlu0 %4910, %v3355_v45   ;;  %1411 = vst.msk [vmem:[#allocation2 + $0x138] sm:$0x3] %vm304_vm1, %v4384_v42  ;;  %p5032_p13 = pneg %p5031_p12 }
  0xdd   : > { %v1805_v54 = vpop.permute.xlu1 %1804  ;;  %938 = vst.msk [vmem:[#allocation2 + $0x90] sm:$0xc] %vm529_vm2, %v850_v50  ;;  %v5028_v50 = vld [vmem:[%s6415_s1] sm:$0xf] }
  0xde   : > { %v1597_v55 = vpop.permute.xlu0 %1596  ;;  %1840 = vst.msk [vmem:[#allocation2 + $0x100] sm:$0x3] %vm304_vm1, %v1805_v54  ;;  %v4973_v4 = vld [vmem:[#allocation2 + $0xf0] sm:$0xff]   ;;  %p5039_p3 = pnand %p5038_p2, %p5032_p13 }
  0xdf   : > { %1632 = vst.msk [vmem:[#allocation2 + $0xfc] sm:$0xc] %vm529_vm2, %v1597_v55  ;;  %4748 = vmatpush3.bf16.msra.mxu0 %v2526_v53  ;;  %v4376_v54 = vld [vmem:[%s5193_s13 + $0x12] sm:$0x3] }
  0xe0   : > { %4763 = vmatprep.subr.bf16.mxu0 %v5096_v13  ;;  %1403 = vst.msk [vmem:[#allocation2 + $0x98] sm:$0x3] %vm304_vm1, %v4376_v54 }
  0xe1   : > { %v719_v56 = vpop.permute.xlu1 %718 }
  0xe2   : > { %v510_v57 = vpop.permute.xlu0 %509  ;;  %752 = vst.msk [vmem:[#allocation2 + $0x11c] sm:$0x3] %vm304_vm1, %v719_v56  ;;  %4750 = vmatmul.mubr.msk.bf16.vlgmr.msra.gmra.mrb[20].mxu0 %vm1940_vm4, %v5489_v31 }
  0xe3   : > { %544 = vst.msk [vmem:[#allocation2 + $0x118] sm:$0xc] %vm529_vm2, %v510_v57  ;;  %4764 = vmatpush3.bf16.msra.mxu0 %v4973_v4  ;;  %4769 = vmatprep.mubr.msk.bf16.mxu0 %vm5097_vm0, %v5096_v13 }
  0xe4   : > { %4765 = vmatprep.subr.bf16.mxu0 %v5096_v13 }
  0xe5   : > { %v1344_v58 = vpop.permute.xlu1 %1343  ;;  %v4976_v60 = vld [vmem:[#allocation2 + $0x100] ss:$0 sps:$4 sm:$0x33]  }
  0xe6   : > { %v1120_v16 = vpop.permute.xlu0 %1119  ;;  %v4974_v59 = vld [vmem:[#allocation2 + $0xf8] sm:$0xff]   ;;  %1377 = vst.msk [vmem:[#allocation2 + $0x120] sm:$0xc] %vm529_vm2, %v1344_v58  ;;  %v2642_v62 = vsel %vm1944_vm3, %v4976_v60, 0 }
  0xe7   : > { %1153 = vst.msk [vmem:[#allocation2 + $0x120] sm:$0x3] %vm304_vm1, %v1120_v16  ;;  %4766 = vmatpush3.bf16.msra.mxu0 %v4974_v59  ;;  %v5011_v58 = vld [vmem:[%s5193_s13 + $0x14] ss:$0 sps:$4 sm:$0x33]  }
  0xe8   : > { %4767 = vmatprep.subr.bf16.mxu0 %v5096_v13  ;;  %v866_v60 = vrot.slane %v5011_v58, %v5196_v6 }
  0xe9   : > { %v1809_v0 = vpop.permute.xlu1 %1808 }
  0xea   : > { %v1601_v63 = vpop.permute.xlu0 %1600  ;;  %1842 = vst.msk [vmem:[#allocation2 + $0x128] sm:$0x3] %vm304_vm1, %v1809_v0  ;;  %v4979_v24 = vld [vmem:[#allocation2 + $0x118] sm:$0xff]  }
  0xeb   : > { %1634 = vst.msk [vmem:[#allocation2 + $0x124] sm:$0xc] %vm529_vm2, %v1601_v63  ;;  %4768 = vmatpush3.bf16.msra.mxu0 %v2642_v62  ;;  %v297_v63 = vld [vmem:[%s5193_s13 + $0x12] sm:$0x3]  ;;  %940 = vst.msk [vmem:[#allocation2 + $0xb8] sm:$0xc] %vm529_vm2, %v866_v60 }
  0xec   : > { %4783 = vmatprep.subr.bf16.mxu0 %v5096_v13  ;;  %314 = vst.msk [vmem:[#allocation2 + $0xb4] sm:$0x3] %vm304_vm1, %v297_v63 }
  0xed   : > { %v693_v3 = vpop.permute.xlu1 %692 }
  0xee   : > { %v484_v2 = vpop.permute.xlu0 %483  ;;  %4770 = vmatmul.mubr.msk.bf16.vlgmr.msra.gmra.mrb[24].mxu0 %vm1940_vm4, %v5489_v31  ;;  %739 = vst.msk [vmem:[#allocation2 + $0x18] sm:$0x3] %vm304_vm1, %v693_v3 }
  0xef   : > { %531 = vst.msk [vmem:[#allocation2 + $0x14] sm:$0xc] %vm529_vm2, %v484_v2  ;;  %4784 = vmatpush3.bf16.msra.mxu0 %v4979_v24  ;;  %4789 = vmatprep.mubr.msk.bf16.mxu0 %vm5097_vm0, %v5096_v13  ;;  %v4378_v2 = vld [vmem:[%s5193_s13 + $0x16] sm:$0x3] }
  0xf0   : > { %4785 = vmatprep.subr.bf16.mxu0 %v5096_v13  ;;  %1405 = vst.msk [vmem:[#allocation2 + $0xc0] sm:$0x3] %vm304_vm1, %v4378_v2 }
  0xf1   : > { %v1318_v8 = vpop.permute.xlu1 %1317  ;;  %v4982_v9 = vld [vmem:[#allocation2 + $0x128] ss:$0 sps:$4 sm:$0x33]  }
  0xf2   : > { %v4980_v5 = vld [vmem:[#allocation2 + $0x120] sm:$0xff]   ;;  %v1094_v7 = vpop.permute.xlu0 %1093  ;;  %1364 = vst.msk [vmem:[#allocation2 + $0x1c] sm:$0xc] %vm529_vm2, %v1318_v8  ;;  %v2758_v22 = vsel %vm1944_vm3, %v4982_v9, 0 }
  0xf3   : > { %1140 = vst.msk [vmem:[#allocation2 + $0x1c] sm:$0x3] %vm304_vm1, %v1094_v7  ;;  %4786 = vmatpush3.bf16.msra.mxu0 %v4980_v5  ;;  %v5015_v7 = vld [vmem:[%s5193_s13 + $0x18] ss:$0 sps:$4 sm:$0x33]  }
  0xf4   : > { %4787 = vmatprep.subr.bf16.mxu0 %v5096_v13 }
  0xf5   : > { %v1783_v15 = vpop.permute.xlu1 %1782 }
  0xf6   : > { %v1575_v14 = vpop.permute.xlu0 %1574  ;;  %v4996_v17 = vld [vmem:[#allocation2 + $0x14] sm:$0xff]   ;;  %1829 = vst.msk [vmem:[#allocation2 + $0x24] sm:$0x3] %vm304_vm1, %v1783_v15 }
  0xf7   : > { %1621 = vst.msk [vmem:[#allocation2 + $0x20] sm:$0xc] %vm529_vm2, %v1575_v14  ;;  %4788 = vmatpush3.bf16.msra.mxu0 %v2758_v22  ;;  %4654 = vmatpush3.bf16.msra.mxu1 %v4996_v17 }
  0xf8   : > { %4861 = vmatprep.subr.msk.bf16.mxu0 %vm2900_vm5, %v2866_v10  ;;  %4655 = vmatprep.subr.bf16.mxu1 %v5096_v13  ;;  %v882_v10 = vrot.slane %v5015_v7, %v5196_v6 }
  0xf9   : > { %v697_v23 = vpop.permute.xlu1 %696 }
  0xfa   : > { %v488_v21 = vpop.permute.xlu0 %487  ;;  %4790 = vmatmul.mubr.msk.bf16.vlgmr.msra.gmra.mrb[28].mxu0 %vm1940_vm4, %v5489_v31  ;;  %741 = vst.msk [vmem:[#allocation2 + $0x40] sm:$0x3] %vm304_vm1, %v697_v23 }
  0xfb   : > { %533 = vst.msk [vmem:[#allocation2 + $0x3c] sm:$0xc] %vm529_vm2, %v488_v21  ;;  %4804 = vmatpush3.bf16.msra.mxu0 %v2902_v32  ;;  %4805 = vmatprep.mubr.msk.bf16.mxu0 %vm2887_vm6, %v4984_v18  ;;  %942 = vst.msk [vmem:[#allocation2 + $0xe0] sm:$0xc] %vm529_vm2, %v882_v10  ;;  %v4380_v18 = vld [vmem:[%s5193_s13 + $0x1a] sm:$0x3] }
  0xfc   : > { %4825 = vmatprep.subr.bf16.mxu0 %v5096_v13  ;;  %1407 = vst.msk [vmem:[#allocation2 + $0xe8] sm:$0x3] %vm304_vm1, %v4380_v18  ;;  %v5019_v21 = vld [vmem:[%s5193_s13 + $0x1c] ss:$0 sps:$4 sm:$0x33]  }
  0xfd   : > { %v1322_v26 = vpop.permute.xlu1 %1321  ;;  %v4998_v27 = vld [vmem:[#allocation2 + $0x24] ss:$0 sps:$4 sm:$0x33]  }
  0xfe   : > { %v1098_v33 = vpop.permute.xlu0 %1097  ;;  %v4997_v36 = vld [vmem:[#allocation2 + $0x1c] sm:$0xff]   ;;  %1366 = vst.msk [vmem:[#allocation2 + $0x44] sm:$0xc] %vm529_vm2, %v1322_v26  ;;  %v2004_v30 = vsel %vm1944_vm3, %v4998_v27, 0  ;;  %v301_v27 = vld [vmem:[%s5193_s13 + $0x1a] sm:$0x3] }
  0xff   : > { %1142 = vst.msk [vmem:[#allocation2 + $0x44] sm:$0x3] %vm304_vm1, %v1098_v33  ;;  %4656 = vmatpush3.bf16.msra.mxu1 %v4997_v36  ;;  %v898_v36 = vrot.slane %v5019_v21, %v5196_v6  ;;  %318 = vst.msk [vmem:[#allocation2 + $0x104] sm:$0x3] %vm304_vm1, %v301_v27 }
 0x100   : > { %4657 = vmatprep.subr.bf16.mxu1 %v5096_v13 }
 0x101   : > { %v1787_v38 = vpop.permute.xlu1 %1786  ;;  %944 = vst.msk [vmem:[#allocation2 + $0x108] sm:$0xc] %vm529_vm2, %v898_v36 }
 0x102   : > { %v1579_v37 = vpop.permute.xlu0 %1578  ;;  %4806 = vmatmul.mubr.msk.bf16.vlgmr.msra.gmra.mrb[32].mxu0 %vm2887_vm6, %v4985_v25  ;;  %1831 = vst.msk [vmem:[#allocation2 + $0x4c] sm:$0x3] %vm304_vm1, %v1787_v38  ;;  %v5000_v39 = vld [vmem:[#allocation2 + $0x3c] sm:$0xff]  }
 0x103   : > { %1623 = vst.msk [vmem:[#allocation2 + $0x48] sm:$0xc] %vm529_vm2, %v1579_v37  ;;  %4809 = vmatprep.mubr.msk.bf16.mxu0 %vm2887_vm6, %v4987_v29  ;;  %4658 = vmatpush3.bf16.msra.mxu1 %v2004_v30 }
 0x104   : > { %4673 = vmatprep.subr.bf16.mxu1 %v5096_v13 }
 0x105   : > { %v701_v41 = vpop.permute.xlu1 %700 }
 0x106   : > { %v492_v40 = vpop.permute.xlu0 %491  ;;  %743 = vst.msk [vmem:[#allocation2 + $0x68] sm:$0x3] %vm304_vm1, %v701_v41  ;;  %4660 = vmatmul.mubr.msk.bf16.vlgmr.msra.gmra.mrb[0].mxu1 %vm1940_vm4, %v5489_v31 }
 0x107   : > { %535 = vst.msk [vmem:[#allocation2 + $0x64] sm:$0xc] %vm529_vm2, %v492_v40  ;;  %4674 = vmatpush3.bf16.msra.mxu1 %v5000_v39  ;;  %4679 = vmatprep.mubr.msk.bf16.mxu1 %vm5097_vm0, %v5096_v13  ;;  %v5023_v39 = vld [vmem:[%s5193_s13 + $0x20] ss:$0 sps:$4 sm:$0x33]  }
 0x108   : > { %4675 = vmatprep.subr.bf16.mxu1 %v5096_v13 }
 0x109   : > { %v1326_v46 = vpop.permute.xlu1 %1325  ;;  %v5002_v48 = vld [vmem:[#allocation2 + $0x4c] ss:$0 sps:$4 sm:$0x33]  }
 0x10a   : > { %v1102_v44 = vpop.permute.xlu0 %1101  ;;  %v5001_v47 = vld [vmem:[#allocation2 + $0x44] sm:$0xff]   ;;  %4810 = vmatmul.mubr.msk.bf16.gmra.mrb[36].mxu0 %vm2887_vm6, %v4988_v43  ;;  %1368 = vst.msk [vmem:[#allocation2 + $0x6c] sm:$0xc] %vm529_vm2, %v1326_v46  ;;  %v2120_v45 = vsel %vm1944_vm3, %v5002_v48, 0 }
 0x10b   : > { %1144 = vst.msk [vmem:[#allocation2 + $0x6c] sm:$0x3] %vm304_vm1, %v1102_v44  ;;  %4676 = vmatpush3.bf16.msra.mxu1 %v5001_v47  ;;  %4827 = vmatprep.mubr.msk.bf16.mxu0 %vm5097_vm0, %v5096_v13  ;;  %v914_v44 = vrot.slane %v5023_v39, %v5196_v6 }
 0x10c   : > { %4677 = vmatprep.subr.bf16.mxu1 %v5096_v13 }
 0x10d   : > { %v1791_v61 = vpop.permute.xlu1 %1790  ;;  %946 = vst.msk [vmem:[#allocation2 + $0x130] sm:$0xc] %vm529_vm2, %v914_v44 }
 0x10e   : > { %v1583_v52 = vpop.permute.xlu0 %1582  ;;  %1833 = vst.msk [vmem:[#allocation2 + $0x74] sm:$0x3] %vm304_vm1, %v1791_v61  ;;  %v5004_v53 = vld [vmem:[#allocation2 + $0x64] sm:$0xff]  }
 0x10f   : > { %1625 = vst.msk [vmem:[#allocation2 + $0x70] sm:$0xc] %vm529_vm2, %v1583_v52  ;;  %4678 = vmatpush3.bf16.msra.mxu1 %v2120_v45 }
 0x110   : > { %4693 = vmatprep.subr.bf16.mxu1 %v5096_v13 }
 0x111   : > { %v705_v56 = vpop.permute.xlu1 %704 }
 0x112   : > { %v496_v55 = vpop.permute.xlu0 %495  ;;  %4680 = vmatmul.mubr.msk.bf16.vlgmr.msra.gmra.mrb[4].mxu1 %vm1940_vm4, %v5489_v31  ;;  %745 = vst.msk [vmem:[#allocation2 + $0x90] sm:$0x3] %vm304_vm1, %v705_v56 }
 0x113   : > { %537 = vst.msk [vmem:[#allocation2 + $0x8c] sm:$0xc] %vm529_vm2, %v496_v55  ;;  %4694 = vmatpush3.bf16.msra.mxu1 %v5004_v53  ;;  %4699 = vmatprep.mubr.msk.bf16.mxu1 %vm5097_vm0, %v5096_v13 }
 0x114   : > { %4695 = vmatprep.subr.bf16.mxu1 %v5096_v13 }
 0x115   : > { %v1330_v16 = vpop.permute.xlu1 %1329  ;;  %v5006_v59 = vld [vmem:[#allocation2 + $0x74] ss:$0 sps:$4 sm:$0x33]  }
 0x116   : > { %v1106_v57 = vpop.permute.xlu0 %1105  ;;  %v5005_v4 = vld [vmem:[#allocation2 + $0x6c] sm:$0xff]   ;;  %1370 = vst.msk [vmem:[#allocation2 + $0x94] sm:$0xc] %vm529_vm2, %v1330_v16  ;;  %v2236_v62 = vsel %vm1944_vm3, %v5006_v59, 0 }
 0x117   : > { %1146 = vst.msk [vmem:[#allocation2 + $0x94] sm:$0x3] %vm304_vm1, %v1106_v57  ;;  %4696 = vmatpush3.bf16.msra.mxu1 %v5005_v4 }
 0x118   : > { %4697 = vmatprep.subr.bf16.mxu1 %v5096_v13 }
 0x11a   : > { %v1587_v0 = vpop.permute.xlu0 %1586  ;;  %v5008_v24 = vld [vmem:[#allocation2 + $0x8c] sm:$0xff]  }
 0x11b   : > { %1627 = vst.msk [vmem:[#allocation2 + $0x98] sm:$0xc] %vm529_vm2, %v1587_v0  ;;  %v1795_v1 = vpop.permute.xlu1 %1794  ;;  %4698 = vmatpush3.bf16.msra.mxu1 %v2236_v62 }
 0x11c   : > { %1835 = vst.msk [vmem:[#allocation2 + $0x9c] sm:$0x3] %vm304_vm1, %v1795_v1  ;;  %4713 = vmatprep.subr.bf16.mxu1 %v5096_v13 }
 0x11e   : > { %v500_v3 = vpop.permute.xlu0 %499  ;;  %4700 = vmatmul.mubr.msk.bf16.vlgmr.msra.gmra.mrb[8].mxu1 %vm1940_vm4, %v5489_v31 }
 0x11f   : > { %539 = vst.msk [vmem:[#allocation2 + $0xb4] sm:$0xc] %vm529_vm2, %v500_v3  ;;  %v709_v5 = vpop.permute.xlu1 %708  ;;  %4714 = vmatpush3.bf16.msra.mxu1 %v5008_v24  ;;  %4719 = vmatprep.mubr.msk.bf16.mxu1 %vm5097_vm0, %v5096_v13 }
 0x120   : > { %747 = vst.msk [vmem:[#allocation2 + $0xb8] sm:$0x3] %vm304_vm1, %v709_v5  ;;  %4715 = vmatprep.subr.bf16.mxu1 %v5096_v13 }
 0x122   : > { %v1110_v8 = vpop.permute.xlu0 %1109  ;;  %v5009_v9 = vld [vmem:[#allocation2 + $0x94] sm:$0xff]  }
 0x123   : > { %1148 = vst.msk [vmem:[#allocation2 + $0xbc] sm:$0x3] %vm304_vm1, %v1110_v8  ;;  %v1334_v19 = vpop.permute.xlu1 %1333  ;;  %v5010_v22 = vld [vmem:[#allocation2 + $0x9c] ss:$0 sps:$4 sm:$0x33]   ;;  %4716 = vmatpush3.bf16.msra.mxu1 %v5009_v9 }
 0x124   : > { %1372 = vst.msk [vmem:[#allocation2 + $0xbc] sm:$0xc] %vm529_vm2, %v1334_v19  ;;  %4717 = vmatprep.subr.bf16.mxu1 %v5096_v13  ;;  %v2352_v12 = vsel %vm1944_vm3, %v5010_v22, 0 }
 0x126   : > { %v1591_v14 = vpop.permute.xlu0 %1590 }
 0x127   : > { %1629 = vst.msk [vmem:[#allocation2 + $0xc0] sm:$0xc] %vm529_vm2, %v1591_v14  ;;  %v1799_v15 = vpop.permute.xlu1 %1798  ;;  %4718 = vmatpush3.bf16.msra.mxu1 %v2352_v12  ;;  %v5012_v17 = vld [vmem:[#allocation2 + $0xb4] sm:$0xff]  }
 0x128   : > { %1837 = vst.msk [vmem:[#allocation2 + $0xc4] sm:$0x3] %vm304_vm1, %v1799_v15  ;;  %4733 = vmatprep.subr.bf16.mxu1 %v5096_v13 }
 0x12a   : > { %v504_v32 = vpop.permute.xlu0 %503  ;;  %4720 = vmatmul.mubr.msk.bf16.vlgmr.msra.gmra.mrb[12].mxu1 %vm1940_vm4, %v5489_v31 }
 0x12b   : > { %541 = vst.msk [vmem:[#allocation2 + $0xdc] sm:$0xc] %vm529_vm2, %v504_v32  ;;  %v713_v20 = vpop.permute.xlu1 %712  ;;  %4734 = vmatpush3.bf16.msra.mxu1 %v5012_v17  ;;  %4739 = vmatprep.mubr.msk.bf16.mxu1 %vm5097_vm0, %v5096_v13 }
 0x12c   : > { %749 = vst.msk [vmem:[#allocation2 + $0xe0] sm:$0x3] %vm304_vm1, %v713_v20  ;;  %4735 = vmatprep.subr.bf16.mxu1 %v5096_v13 }
 0x12e   : > { %v1114_v23 = vpop.permute.xlu0 %1113  ;;  %v5013_v25 = vld [vmem:[#allocation2 + $0xbc] sm:$0xff]  }
 0x12f   : > { %1150 = vst.msk [vmem:[#allocation2 + $0xe4] sm:$0x3] %vm304_vm1, %v1114_v23  ;;  %v1338_v33 = vpop.permute.xlu1 %1337  ;;  %v5014_v26 = vld [vmem:[#allocation2 + $0xc4] ss:$0 sps:$4 sm:$0x33]   ;;  %4736 = vmatpush3.bf16.msra.mxu1 %v5013_v25 }
 0x130   : > { %1374 = vst.msk [vmem:[#allocation2 + $0xe4] sm:$0xc] %vm529_vm2, %v1338_v33  ;;  %4737 = vmatprep.subr.bf16.mxu1 %v5096_v13  ;;  %v2468_v28 = vsel %vm1944_vm3, %v5014_v26, 0 }
 0x132   : > { %v1595_v29 = vpop.permute.xlu0 %1594 }
 0x133   : > { %1631 = vst.msk [vmem:[#allocation2 + $0xe8] sm:$0xc] %vm529_vm2, %v1595_v29  ;;  %v1803_v30 = vpop.permute.xlu1 %1802  ;;  %4738 = vmatpush3.bf16.msra.mxu1 %v2468_v28  ;;  %v5016_v34 = vld [vmem:[#allocation2 + $0xdc] sm:$0xff]  }
 0x134   : > { %1839 = vst.msk [vmem:[#allocation2 + $0xec] sm:$0x3] %vm304_vm1, %v1803_v30  ;;  %4753 = vmatprep.subr.bf16.mxu1 %v5096_v13 }
 0x136   : > { %v508_v37 = vpop.permute.xlu0 %507  ;;  %4740 = vmatmul.mubr.msk.bf16.vlgmr.msra.gmra.mrb[16].mxu1 %vm1940_vm4, %v5489_v31  ;;  %v303_v31 = vld [vmem:[%s5193_s13 + $0x1e] sm:$0x3] }
 0x137   : > { %543 = vst.msk [vmem:[#allocation2 + $0x104] sm:$0xc] %vm529_vm2, %v508_v37  ;;  %v717_v38 = vpop.permute.xlu1 %716  ;;  %4754 = vmatpush3.bf16.msra.mxu1 %v5016_v34  ;;  %4759 = vmatprep.mubr.msk.bf16.mxu1 %vm5097_vm0, %v5096_v13 }
 0x138   : > { %751 = vst.msk [vmem:[#allocation2 + $0x108] sm:$0x3] %vm304_vm1, %v717_v38  ;;  %4755 = vmatprep.subr.bf16.mxu1 %v5096_v13  ;;  %320 = vst.msk [vmem:[#allocation2 + $0x12c] sm:$0x3] %vm304_vm1, %v303_v31 }
 0x13a   : > { %v1118_v51 = vpop.permute.xlu0 %1117  ;;  %v5017_v40 = vld [vmem:[#allocation2 + $0xe4] sm:$0xff]  }
 0x13b   : > { %1152 = vst.msk [vmem:[#allocation2 + $0x10c] sm:$0x3] %vm304_vm1, %v1118_v51  ;;  %v1342_v41 = vpop.permute.xlu1 %1341  ;;  %v5018_v43 = vld [vmem:[#allocation2 + $0xec] ss:$0 sps:$4 sm:$0x33]   ;;  %4756 = vmatpush3.bf16.msra.mxu1 %v5017_v40  ;;  %v5027_v40 = vld [vmem:[%s6418_s4] sm:$0xff]  }
 0x13c   : > { %1376 = vst.msk [vmem:[#allocation2 + $0x10c] sm:$0xc] %vm529_vm2, %v1342_v41  ;;  %4757 = vmatprep.subr.bf16.mxu1 %v5096_v13  ;;  %v2584_v46 = vsel %vm1944_vm3, %v5018_v43, 0 }
 0x13e   : > { %v1599_v47 = vpop.permute.xlu0 %1598 }
 0x13f   : > { %1633 = vst.msk [vmem:[#allocation2 + $0x110] sm:$0xc] %vm529_vm2, %v1599_v47  ;;  %v1807_v48 = vpop.permute.xlu1 %1806  ;;  %4758 = vmatpush3.bf16.msra.mxu1 %v2584_v46  ;;  %v5020_v6 = vld [vmem:[#allocation2 + $0x104] sm:$0xff]  }
 0x140   : > { %1841 = vst.msk [vmem:[#allocation2 + $0x114] sm:$0x3] %vm304_vm1, %v1807_v48  ;;  %4773 = vmatprep.subr.bf16.mxu1 %v5096_v13 }
 0x142   : > { %v512_v45 = vpop.permute.xlu0 %511  ;;  %4760 = vmatmul.mubr.msk.bf16.vlgmr.msra.gmra.mrb[20].mxu1 %vm1940_vm4, %v5028_v50 }
 0x143   : > { %545 = vst.msk [vmem:[#allocation2 + $0x12c] sm:$0xc] %vm529_vm2, %v512_v45  ;;  %v721_v49 = vpop.permute.xlu1 %720  ;;  %4774 = vmatpush3.bf16.msra.mxu1 %v5020_v6  ;;  %4779 = vmatprep.mubr.msk.bf16.mxu1 %vm5097_vm0, %v5096_v13 }
 0x144   : > { %753 = vst.msk [vmem:[#allocation2 + $0x130] sm:$0x3] %vm304_vm1, %v721_v49  ;;  %4775 = vmatprep.subr.bf16.mxu1 %v5096_v13 }
 0x146   : > { %v1122_v52 = vpop.permute.xlu0 %1121  ;;  %v5021_v61 = vld [vmem:[#allocation2 + $0x10c] sm:$0xff]  }
 0x147   : > { %1154 = vst.msk [vmem:[#allocation2 + $0x134] sm:$0x3] %vm304_vm1, %v1122_v52  ;;  %v1346_v53 = vpop.permute.xlu1 %1345  ;;  %v5022_v54 = vld [vmem:[#allocation2 + $0x114] ss:$0 sps:$4 sm:$0x33]   ;;  %4776 = vmatpush3.bf16.msra.mxu1 %v5021_v61 }
 0x148   : > { %1378 = vst.msk [vmem:[#allocation2 + $0x134] sm:$0xc] %vm529_vm2, %v1346_v53  ;;  %4777 = vmatprep.subr.bf16.mxu1 %v5096_v13  ;;  %v2700_v55 = vsel %vm1944_vm3, %v5022_v54, 0 }
 0x14a   : > { %v1603_v56 = vpop.permute.xlu0 %1602 }
 0x14b   : > { %1635 = vst.msk [vmem:[#allocation2 + $0x138] sm:$0xc] %vm529_vm2, %v1603_v56  ;;  %v1811_v57 = vpop.permute.xlu1 %1810  ;;  %4778 = vmatpush3.bf16.msra.mxu1 %v2700_v55  ;;  %v5024_v4 = vld [vmem:[#allocation2 + $0x12c] sm:$0xff]   ;;  %vm3579_vm2 = vcmask 122880  }
 0x14c   : > { %1843 = vst.msk [vmem:[#allocation2 + $0x13c] sm:$0x3] %vm304_vm1, %v1811_v57  ;;  %4793 = vmatprep.subr.bf16.mxu1 %v5096_v13 }
 0x14e   : > { %4780 = vmatmul.mubr.msk.bf16.vlgmr.msra.gmra.mrb[24].mxu1 %vm1940_vm4, %v5028_v50 }
 0x14f   : > { %4794 = vmatpush3.bf16.msra.mxu1 %v5024_v4  ;;  %4799 = vmatprep.mubr.msk.bf16.mxu1 %vm5097_vm0, %v5096_v13 }
 0x150   : > { %4795 = vmatprep.subr.bf16.mxu1 %v5096_v13 }
 0x152   : > { %v5025_v58 = vld [vmem:[#allocation2 + $0x134] sm:$0xff]  }
 0x153   : > { %v5026_v16 = vld [vmem:[#allocation2 + $0x13c] ss:$0 sps:$4 sm:$0x33]   ;;  %4796 = vmatpush3.bf16.msra.mxu1 %v5025_v58 }
 0x154   : > { %4797 = vmatprep.subr.bf16.mxu1 %v5096_v13  ;;  %v2816_v59 = vsel %vm1944_vm3, %v5026_v16, 0  ;;  %vm3878_vm3 = vcmask 125952  }
 0x157   : > { %4798 = vmatpush3.bf16.msra.mxu1 %v2816_v59 }
 0x158   : > { %4813 = vmatprep.subr.bf16.mxu1 %v5096_v13 }
 0x15a   : > { %4800 = vmatmul.mubr.msk.bf16.vlgmr.msra.gmra.mrb[28].mxu1 %vm1940_vm4, %v5028_v50  ;;  %vm3775_vm4 = vcmask 130051  }
 0x15b   : > { %4815 = vmatprep.mubr.msk.bf16.mxu1 %vm5097_vm0, %v5096_v13 }
 0x179   : > { %v5840_v60 = vpop.f32.mrb[0].mxu0 }
 0x17a   : > { %v4651_v62 = vpop.f32.mrb[1].mxu0 }
 0x17b   : > { %v1985_v63 = vpop.f32.mrb[2].mxu0 }
 0x17c   : > { %v4652_v0 = vpop.f32.mrb[3].mxu0 }
 0x185   : > { %v5842_v1 = vpop.f32.mrb[4].mxu0 }
 0x186   : > { %v4671_v24 = vpop.f32.mrb[5].mxu0 }
 0x187   : > { %v2101_v2 = vpop.f32.mrb[6].mxu0 }
 0x188   : > { %v4672_v3 = vpop.f32.mrb[7].mxu0 }
 0x191   : > { %v5844_v5 = vpop.f32.mrb[8].mxu0 }
 0x192   : > { %v4691_v7 = vpop.f32.mrb[9].mxu0 }
 0x193   : > { %v2217_v8 = vpop.f32.mrb[10].mxu0 }
 0x194   : > { %v4692_v9 = vpop.f32.mrb[11].mxu0 }
 0x19d   : > { %v5846_v19 = vpop.f32.mrb[12].mxu0 }
 0x19e   : > { %v4711_v22 = vpop.f32.mrb[13].mxu0 }
 0x19f   : > { %v2333_v10 = vpop.f32.mrb[14].mxu0 }
 0x1a0   : > { %v4712_v11 = vpop.f32.mrb[15].mxu0 }
 0x1a9   : > { %v5848_v12 = vpop.f32.mrb[16].mxu0 }
 0x1aa   : > { %v4731_v14 = vpop.f32.mrb[17].mxu0 }
 0x1ab   : > { %v2449_v15 = vpop.f32.mrb[18].mxu0 }
 0x1ac   : > { %v4732_v17 = vpop.f32.mrb[19].mxu0 }
 0x1b5   : > { %v5850_v18 = vpop.f32.mrb[20].mxu0 }
 0x1b6   : > { %v4751_v32 = vpop.f32.mrb[21].mxu0 }
 0x1b7   : > { %v2565_v20 = vpop.f32.mrb[22].mxu0 }
 0x1b8   : > { %v4752_v21 = vpop.f32.mrb[23].mxu0 }
 0x1c1   : > { %v5852_v23 = vpop.f32.mrb[24].mxu0 }
 0x1c2   : > { %v4771_v25 = vpop.f32.mrb[25].mxu0 }
 0x1c3   : > { %v2681_v33 = vpop.f32.mrb[26].mxu0 }
 0x1c4   : > { %v4772_v26 = vpop.f32.mrb[27].mxu0 }
 0x1cd   : > { %v5854_v36 = vpop.f32.mrb[28].mxu0 }
 0x1ce   : > { %v4791_v27 = vpop.f32.mrb[29].mxu0 }
 0x1cf   : > { %v2797_v28 = vpop.f32.mrb[30].mxu0 }
 0x1d0   : > { %v4792_v29 = vpop.f32.mrb[31].mxu0 }
 0x1d5   : > { %v4807_v30 = vpop.f32.mrb[32].mxu0 }
 0x1d6   : > { %v4551_v34 = vpack.c.bf16 %v4807_v30, %v4807_v30  ;;  %v2938_v35 = vpop.f32.mrb[33].mxu0 }
 0x1d7   : > { %v4549_v37 = vpack.c.bf16 %v2938_v35, %v2938_v35  ;;  %v4808_v38 = vpop.f32.mrb[34].mxu0 }
 0x1d8   : > { %v3092_v39 = vsel %vm2900_vm5, %v4551_v34, 0  ;;  %v2941_v51 = vpop.f32.mrb[35].mxu0  ;;  %v4552_v61 = vpack.c.bf16 %v4808_v38, %v4808_v38  ;;  %v3359_v34 = vpop.permute.xlu0 %3358 }
 0x1d9   : > { %v3004_v41 = vsel %vm2900_vm5, %v4549_v37, 0  ;;  %v4550_v43 = vpack.c.bf16 %v2941_v51, %v2941_v51  ;;  %4826 = vmatpush3.bf16.msra.mxu0 %v3092_v39  ;;  %v5861_v44 = vpop.f32.mrb[0].mxu1  ;;  %v5896_v35 = vmul.f32 %v3359_v34, %v5842_v1  ;;  %v5899_v37 = vmul.f32 %v3359_v34, %v5840_v60 }
 0x1da   : > { %4814 = vmatpush3.bf16.msra.mxu1 %v3004_v41  ;;  %4837 = vmatprep.subr.bf16.mxu0 %v5096_v13  ;;  %v4661_v31 = vpop.f32.mrb[1].mxu1  ;;  %v3136_v55 = vsel %vm2900_vm5, %v4552_v61, 0  ;;  %v5902_v38 = vmul.f32 %v3359_v34, %v5844_v5  ;;  %v5905_v39 = vmul.f32 %v3359_v34, %v5846_v19  ;;  %v5908_v51 = vmul.f32 %v3359_v34, %v5848_v12 }
 0x1db   : > { %4819 = vmatprep.subr.bf16.mxu1 %v5096_v13  ;;  %v2043_v46 = vpop.f32.mrb[2].mxu1  ;;  %v3048_v48 = vsel %vm2900_vm5, %v4550_v43, 0  ;;  %v5914_v41 = vmul.f32 %v3359_v34, %v5852_v23  ;;  %v5917_v1 = vmul.f32 %v3359_v34, %v5854_v36  ;;  %v5920_v60 = vmul.f32 %v3359_v34, %v5861_v44 }
 0x1dc   : > { %4828 = vmatmul.mubr.msk.bf16.vlgmr.msra.gmra.mrb[40].mxu0 %vm2887_vm6, %v5027_v40  ;;  %v4662_v47 = vpop.f32.mrb[3].mxu1 }
 0x1dd   : > { %v4811_v6 = vpop.f32.mrb[36].mxu0  ;;  %4816 = vmatmul.mubr.msk.bf16.vlgmr.msra.gmra.mrb[32].mxu1 %vm2887_vm6, %v5027_v40  ;;  %4839 = vmatprep.mubr.msk.bf16.mxu0 %vm5097_vm0, %v5096_v13 }
 0x1de   : > { %v2954_v42 = vpop.f32.mrb[37].mxu0  ;;  %4820 = vmatpush3.bf16.msra.mxu1 %v3048_v48  ;;  %4821 = vmatprep.mubr.msk.bf16.mxu1 %vm5097_vm0, %v5096_v13  ;;  %v4555_v45 = vpack.c.bf16 %v4811_v6, %v4811_v6 }
 0x1df   : > { %v4553_v49 = vpack.c.bf16 %v2954_v42, %v2954_v42  ;;  %4831 = vmatprep.subr.bf16.mxu1 %v5096_v13  ;;  %v4812_v50 = vpop.f32.mrb[38].mxu0 }
 0x1e0   : > { %v2957_v52 = vpop.f32.mrb[39].mxu0  ;;  %v3268_v54 = vsel %vm2900_vm5, %v4555_v45, 0  ;;  %v4556_v62 = vpack.c.bf16 %v4812_v50, %v4812_v50 }
 0x1e1   : > { %v3180_v53 = vsel %vm2900_vm5, %v4553_v49, 0  ;;  %v4554_v4 = vpack.c.bf16 %v2957_v52, %v2957_v52 }
 0x1e2   : > { %4838 = vmatpush3.bf16.msra.mxu0 %v3180_v53  ;;  %v3312_v3 = vsel %vm2900_vm5, %v4556_v62, 0 }
 0x1e3   : > { %4849 = vmatprep.subr.bf16.mxu0 %v5096_v13  ;;  %v3224_v59 = vsel %vm2900_vm5, %v4554_v4, 0  ;;  %vm4075_vm5 = vcmask 130054  }
 0x1e5   : > { %4822 = vmatmul.mubr.msk.bf16.vlgmr.msra.gmra.mrb[36].mxu1 %vm2887_vm6, %v5027_v40  ;;  %4840 = vmatmul.mubr.msk.bf16.vlgmr.msra.gmra.mrb[44].mxu0 %vm2887_vm6, %v5027_v40  ;;  %v2156_v56 = vpop.f32.mrb[4].mxu1 }
 0x1e6   : > { %4832 = vmatpush3.bf16.msra.mxu1 %v3136_v55  ;;  %4850 = vmatpush3.bf16.msra.mxu0 %v3268_v54  ;;  %v4681_v57 = vpop.f32.mrb[5].mxu1  ;;  %v5922_v5 = vmul.f32 %v3359_v34, %v2156_v56 }
 0x1e7   : > { %4833 = vmatprep.mubr.msk.bf16.mxu1 %vm5097_vm0, %v5096_v13  ;;  %4851 = vmatprep.mubr.msk.bf16.mxu0 %vm5097_vm0, %v5096_v13  ;;  %v2159_v58 = vpop.f32.mrb[6].mxu1 }
 0x1e8   : > { %4843 = vmatprep.subr.bf16.mxu1 %v5096_v13  ;;  %v4682_v16 = vpop.f32.mrb[7].mxu1 }
 0x1ed   : > { %4834 = vmatmul.mubr.msk.bf16.vlgmr.msra.gmra.mrb[40].mxu1 %vm2887_vm6, %v5027_v40  ;;  %4852 = vmatmul.mubr.msk.bf16.vlgmr.msra.gmra.mrb[48].mxu0 %vm2887_vm6, %v5027_v40 }
 0x1ee   : > { %4844 = vmatpush3.bf16.msra.mxu1 %v3224_v59  ;;  %4845 = vmatprep.mubr.msk.bf16.mxu1 %vm5097_vm0, %v5096_v13 }
 0x1ef   : > { %4855 = vmatprep.subr.bf16.mxu1 %v5096_v13 }
 0x1f1   : > { %v2272_v63 = vpop.f32.mrb[8].mxu1 }
 0x1f2   : > { %v4701_v0 = vpop.f32.mrb[9].mxu1  ;;  %v5924_v43 = vmul.f32 %v3359_v34, %v2272_v63 }
 0x1f3   : > { %v2275_v24 = vpop.f32.mrb[10].mxu1 }
 0x1f4   : > { %v4702_v2 = vpop.f32.mrb[11].mxu1 }
 0x1f5   : > { %4846 = vmatmul.mubr.msk.bf16.vlgmr.msra.gmra.mrb[44].mxu1 %vm2887_vm6, %v5027_v40 }
 0x1f6   : > { %4856 = vmatpush3.bf16.msra.mxu1 %v3312_v3  ;;  %4857 = vmatprep.mubr.msk.bf16.mxu1 %vm5097_vm0, %v5096_v13  ;;  %vm3576_vm0 = vcmask 130049  }
 0x1fd   : > { %4858 = vmatmul.mubr.msk.bf16.vlgmr.msra.gmra.mrb[48].mxu1 %vm2887_vm6, %v5027_v40  ;;  %v2388_v7 = vpop.f32.mrb[12].mxu1  ;;  %v5911_v40 = vmul.f32 %v3359_v34, %v5850_v18  ;;  %vm3778_vm6 = vcmask 124928  }
 0x1fe   : > { %v4721_v8 = vpop.f32.mrb[13].mxu1  ;;  %v5926_v19 = vmul.f32 %v3359_v34, %v2388_v7 }
 0x1ff   : > { %v2391_v9 = vpop.f32.mrb[14].mxu1 }
 0x200   : > { %v4722_v22 = vpop.f32.mrb[15].mxu1 }
 0x209   : > { %v2504_v10 = vpop.f32.mrb[16].mxu1 }
 0x20a   : > { %v4741_v11 = vpop.f32.mrb[17].mxu1  ;;  %v5928_v12 = vmul.f32 %v3359_v34, %v2504_v10 }
 0x20b   : > { %v2507_v14 = vpop.f32.mrb[18].mxu1 }
 0x20c   : > { %v4742_v15 = vpop.f32.mrb[19].mxu1 }
 0x215   : > { %v2620_v17 = vpop.f32.mrb[20].mxu1 }
 0x216   : > { %v4761_v32 = vpop.f32.mrb[21].mxu1  ;;  %v5930_v31 = vmul.f32 %v3359_v34, %v2620_v17 }
 0x217   : > { %v2623_v20 = vpop.f32.mrb[22].mxu1 }
 0x218   : > { %v4762_v21 = vpop.f32.mrb[23].mxu1 }
 0x221   : > { %v2736_v25 = vpop.f32.mrb[24].mxu1 }
 0x222   : > { %v4781_v33 = vpop.f32.mrb[25].mxu1  ;;  %v5932_v18 = vmul.f32 %v3359_v34, %v2736_v25 }
 0x223   : > { %v2739_v26 = vpop.f32.mrb[26].mxu1 }
 0x224   : > { %v4782_v27 = vpop.f32.mrb[27].mxu1 }
 0x22d   : > { %v2852_v28 = vpop.f32.mrb[28].mxu1 }
 0x22e   : > { %v4801_v13 = vpop.f32.mrb[29].mxu1  ;;  %v5934_v23 = vmul.f32 %v3359_v34, %v2852_v28 }
 0x22f   : > { %v2855_v29 = vpop.f32.mrb[30].mxu1 }
 0x230   : > { %v4802_v30 = vpop.f32.mrb[31].mxu1 }
 0x2af   : > { %v3128_v36 = vpop.f32.mrb[40].mxu0 }
 0x2b0   : > { %v3583_v44 = vrot.slane %v3128_v36, 6  ;;  %v3584_v46 = vrot.slane %v3128_v36, 7  ;;  %v3585_v47 = vrot.slane %v3128_v36, 1  ;;  %v3586_v48 = vrot.slane %v3128_v36, 2  ;;  %v3040_v6 = vpop.f32.mrb[32].mxu1  ;;  %v4829_v42 = vpop.f32.mrb[41].mxu0 }
 0x2b1   : > { %v3587_v45 = vrot.slane %v3128_v36, 3  ;;  %v3588_v49 = vrot.slane %v3128_v36, 4  ;;  %v3589_v50 = vrot.slane %v3128_v36, 5  ;;  %v3615_v52 = vadd.f32 %v5896_v35, %v3128_v36  ;;  %v4817_v61 = vpop.f32.mrb[33].mxu1  ;;  %v5937_v53 = vpop.f32.mrb[42].mxu0 }
 0x2b2   : > { %v3613_v54 = vadd.f32 %v3583_v44, %v5899_v37  ;;  %v3614_v55 = vadd.f32 %v3584_v46, %v5920_v60  ;;  %v3616_v56 = vadd.f32 %v3585_v47, %v5922_v5  ;;  %v3617_v57 = vadd.f32 %v3586_v48, %v5902_v38  ;;  %v5943_v4 = vpop.f32.mrb[34].mxu1  ;;  %v4830_v58 = vpop.f32.mrb[43].mxu0 }
 0x2b3   : > { %v3618_v16 = vadd.f32 %v3587_v45, %v5924_v43  ;;  %v3619_v59 = vadd.f32 %v3588_v49, %v5905_v39  ;;  %v3620_v62 = vadd.f32 %v3589_v50, %v5926_v19  ;;  %v3647_v63 = vrot.slane %v3615_v52, 6  ;;  %v4818_v0 = vpop.f32.mrb[35].mxu1 }
 0x2b4   : > { %v3645_v24 = vrot.slane %v3614_v55, 7  ;;  %v3649_v2 = vrot.slane %v3616_v56, 5  ;;  %v3651_v3 = vrot.slane %v3617_v57, 4  ;;  %v3379_v7 = vrot.slane %v3040_v6, 1 }
 0x2b5   : > { %v3653_v8 = vrot.slane %v3618_v16, 3  ;;  %v3655_v9 = vrot.slane %v3619_v59, 2  ;;  %v3656_v22 = vrot.slane %v3620_v62, 1  ;;  %v3380_v10 = vrot.slane %v3040_v6, 2 }
 0x2b6   : > { %v3646_v11 = vsel %vm3448_vm8, %v3645_v24, %v3613_v54  ;;  %v3381_v14 = vrot.slane %v3040_v6, 3  ;;  %v3382_v15 = vrot.slane %v3040_v6, 4  ;;  %v3383_v17 = vrot.slane %v3040_v6, 5 }
 0x2b7   : > { %v3648_v32 = vsel %vm3451_vm9, %v3647_v63, %v3646_v11  ;;  %v3657_v20 = vsel %vm3442_vm7, %v3656_v22, %v3655_v9  ;;  %v3384_v21 = vrot.slane %v3040_v6, 6  ;;  %v3385_v25 = vrot.slane %v3040_v6, 7 }
 0x2b8   : > { %v3650_v33 = vsel %vm3454_vm10, %v3649_v2, %v3648_v32  ;;  %v3409_v26 = vadd.f32 %v5899_v37, %v3040_v6  ;;  %v3410_v27 = vadd.f32 %v3379_v7, %v5920_v60  ;;  %v3411_v28 = vadd.f32 %v3380_v10, %v5896_v35  ;;  %v5958_v13 = vpop.f32.mrb[36].mxu1  ;;  %v5960_v29 = vpop.f32.mrb[44].mxu0 }
 0x2b9   : > { %v3652_v30 = vsel %vm3457_vm11, %v3651_v3, %v3650_v33  ;;  %v3412_v34 = vadd.f32 %v3381_v14, %v5922_v5  ;;  %v3413_v36 = vadd.f32 %v3382_v15, %v5902_v38  ;;  %v3414_v44 = vadd.f32 %v3383_v17, %v5924_v43  ;;  %v4823_v46 = vpop.f32.mrb[37].mxu1  ;;  %v4841_v47 = vpop.f32.mrb[45].mxu0 }
 0x2ba   : > { %v3654_v48 = vsel %vm3460_vm12, %v3653_v8, %v3652_v30  ;;  %v3415_v6 = vadd.f32 %v3384_v21, %v5905_v39  ;;  %v3416_v42 = vadd.f32 %v3385_v25, %v5926_v19  ;;  %v3441_v45 = vrot.slane %v3410_v27, 7  ;;  %v5969_v49 = vpop.f32.mrb[38].mxu1  ;;  %v5971_v50 = vpop.f32.mrb[46].mxu0 }
 0x2bb   : > { %4525 = vst.msk [vmem:[%s5973_s19 + $0x1e] sm:$0xfc] %vm3676_vm13, %v3654_v48  ;;  %v3444_v52 = vrot.slane %v3411_v28, 6  ;;  %v3447_v61 = vrot.slane %v3412_v34, 5  ;;  %v3450_v54 = vrot.slane %v3413_v36, 4  ;;  %v3453_v55 = vrot.slane %v3414_v44, 3 }
 0x2bc   : > { %v4824_v56 = vpop.f32.mrb[39].mxu1  ;;  %v4842_v57 = vpop.f32.mrb[47].mxu0  ;;  %v3443_v58 = vsel %vm3442_vm7, %v3441_v45, %v3409_v26  ;;  %v3456_v16 = vrot.slane %v3415_v6, 2  ;;  %v3459_v59 = vrot.slane %v3416_v42, 1  ;;  %v3590_v62 = vrot.slane %v5937_v53, 6 }
 0x2bd   : > { %v3446_v63 = vsel %vm3445_vm14, %v3444_v52, %v3443_v58  ;;  %v3591_v0 = vrot.slane %v5937_v53, 7  ;;  %v3592_v24 = vrot.slane %v5937_v53, 1  ;;  %v3593_v2 = vrot.slane %v5937_v53, 2 }
 0x2be   : > { %v3449_v3 = vsel %vm3448_vm8, %v3447_v61, %v3446_v63  ;;  %v3594_v7 = vrot.slane %v5937_v53, 3  ;;  %v3595_v8 = vrot.slane %v5937_v53, 4  ;;  %v3596_v9 = vrot.slane %v5937_v53, 5 }
 0x2bf   : > { %v3452_v22 = vsel %vm3451_vm9, %v3450_v54, %v3449_v3  ;;  %v3621_v10 = vadd.f32 %v3590_v62, %v5908_v51  ;;  %v3622_v11 = vadd.f32 %v3591_v0, %v5928_v12  ;;  %v3623_v14 = vadd.f32 %v5911_v40, %v5937_v53 }
 0x2c0   : > { %v3455_v15 = vsel %vm3454_vm10, %v3453_v55, %v3452_v22  ;;  %v3624_v17 = vadd.f32 %v3592_v24, %v5930_v31  ;;  %v3625_v32 = vadd.f32 %v3593_v2, %v5914_v41  ;;  %v3626_v21 = vadd.f32 %v3594_v7, %v5932_v18  ;;  %v5996_v25 = vpop.f32.mrb[40].mxu1  ;;  %v5998_v33 = vpop.f32.mrb[48].mxu0 }
 0x2c1   : > { %v3458_v26 = vsel %vm3457_vm11, %v3456_v16, %v3455_v15  ;;  %v3627_v27 = vadd.f32 %v3595_v8, %v5917_v1  ;;  %v3628_v28 = vadd.f32 %v3596_v9, %v5934_v23  ;;  %v3658_v53 = vsel %vm3445_vm14, %v3621_v10, %v3657_v20  ;;  %v4835_v30 = vpop.f32.mrb[41].mxu1  ;;  %v4853_v34 = vpop.f32.mrb[49].mxu0 }
 0x2c2   : > { %v3461_v36 = vsel %vm3460_vm12, %v3459_v59, %v3458_v26  ;;  %v3659_v44 = vrot.slane %v3622_v11, 7  ;;  %v3661_v46 = vrot.slane %v3623_v14, 6  ;;  %v3663_v47 = vrot.slane %v3624_v17, 5  ;;  %v6005_v48 = vpop.f32.mrb[42].mxu1  ;;  %v6007_v6 = vpop.f32.mrb[50].mxu0 }
 0x2c3   : > { %3479 = vst.msk [vmem:[%s5973_s19] sm:$0xff] %vm3478_vm15, %v3461_v36  ;;  %v3665_v42 = vrot.slane %v3625_v32, 4  ;;  %v3667_v45 = vrot.slane %v3626_v21, 3  ;;  %v3669_v52 = vrot.slane %v3627_v27, 2  ;;  %v3670_v61 = vrot.slane %v3628_v28, 1  ;;  %v4836_v54 = vpop.f32.mrb[43].mxu1 }
 0x2c4   : > { %v4854_v20 = vpop.f32.mrb[51].mxu0  ;;  %v3660_v55 = vsel %vm3448_vm8, %v3659_v44, %v3658_v53  ;;  %v3386_v56 = vrot.slane %v5943_v4, 1  ;;  %v3387_v57 = vrot.slane %v5943_v4, 2  ;;  %v3388_v58 = vrot.slane %v5943_v4, 3 }
 0x2c5   : > { %v3662_v16 = vsel %vm3451_vm9, %v3661_v46, %v3660_v55  ;;  %v3671_v59 = vsel %vm3442_vm7, %v3670_v61, %v3669_v52  ;;  %v3389_v62 = vrot.slane %v5943_v4, 4  ;;  %v3390_v63 = vrot.slane %v5943_v4, 5 }
 0x2c6   : > { %v3664_v0 = vsel %vm3454_vm10, %v3663_v47, %v3662_v16  ;;  %4527 = vst.msk [vmem:[%s5973_s19 + $0x2e] sm:$0x3] %vm304_vm1, %v3671_v59  ;;  %v3391_v24 = vrot.slane %v5943_v4, 6  ;;  %v3392_v2 = vrot.slane %v5943_v4, 7  ;;  %v3417_v3 = vadd.f32 %v5908_v51, %v5943_v4 }
 0x2c7   : > { %v3666_v7 = vsel %vm3457_vm11, %v3665_v42, %v3664_v0  ;;  %v3418_v8 = vadd.f32 %v3386_v56, %v5928_v12  ;;  %v3419_v9 = vadd.f32 %v3387_v57, %v5911_v40  ;;  %v3420_v22 = vadd.f32 %v3388_v58, %v5930_v31 }
 0x2c8   : > { %v3668_v10 = vsel %vm3460_vm12, %v3667_v45, %v3666_v7  ;;  %v3421_v11 = vadd.f32 %v3389_v62, %v5914_v41  ;;  %v3422_v14 = vadd.f32 %v3390_v63, %v5932_v18  ;;  %v3423_v15 = vadd.f32 %v3391_v24, %v5917_v1  ;;  %v6034_v17 = vpop.f32.mrb[44].mxu1 }
 0x2c9   : > { %4526 = vst.msk [vmem:[%s5973_s19 + $0x26] sm:$0xff] %vm3478_vm15, %v3668_v10  ;;  %v3424_v4 = vadd.f32 %v3392_v2, %v5934_v23  ;;  %v3462_v32 = vrot.slane %v3418_v8, 7  ;;  %v3464_v21 = vrot.slane %v3419_v9, 6  ;;  %v3466_v26 = vrot.slane %v3420_v22, 5  ;;  %v4847_v27 = vpop.f32.mrb[45].mxu1 }
 0x2ca   : > { %v3468_v28 = vrot.slane %v3421_v11, 4  ;;  %v3470_v53 = vrot.slane %v3422_v14, 3  ;;  %v3472_v30 = vrot.slane %v3423_v15, 2  ;;  %v3483_v34 = vrot.slane %v5958_v13, 7  ;;  %v6040_v36 = vpop.f32.mrb[46].mxu1 }
 0x2cb   : > { %v3463_v44 = vsel %vm3442_vm7, %v3462_v32, %v3417_v3  ;;  %v3474_v46 = vrot.slane %v3424_v4, 1  ;;  %v3484_v47 = vrot.slane %v5958_v13, 1  ;;  %v3485_v42 = vrot.slane %v5958_v13, 2  ;;  %v4848_v45 = vpop.f32.mrb[47].mxu1 }
 0x2cc   : > { %v3465_v52 = vsel %vm3445_vm14, %v3464_v21, %v3463_v44  ;;  %v3486_v61 = vrot.slane %v5958_v13, 3  ;;  %v3487_v54 = vrot.slane %v5958_v13, 4  ;;  %v3488_v20 = vrot.slane %v5958_v13, 5 }
 0x2cd   : > { %v3467_v55 = vsel %vm3448_vm8, %v3466_v26, %v3465_v52  ;;  %v3489_v56 = vrot.slane %v5958_v13, 6  ;;  %v3513_v57 = vadd.f32 %v3483_v34, %v5899_v37  ;;  %v3514_v58 = vadd.f32 %v5920_v60, %v5958_v13 }
 0x2ce   : > { %v3469_v16 = vsel %vm3451_vm9, %v3468_v28, %v3467_v55  ;;  %v3515_v59 = vadd.f32 %v3484_v47, %v5896_v35  ;;  %v3516_v62 = vadd.f32 %v3485_v42, %v5922_v5  ;;  %v3517_v63 = vadd.f32 %v3486_v61, %v5902_v38 }
 0x2cf   : > { %v3471_v0 = vsel %vm3454_vm10, %v3470_v53, %v3469_v16  ;;  %v3518_v24 = vadd.f32 %v3487_v54, %v5924_v43  ;;  %v3519_v2 = vadd.f32 %v3488_v20, %v5905_v39  ;;  %v6062_v3 = vadd.f32 %v3489_v56, %v5926_v19 }
 0x2d0   : > { %v3473_v13 = vsel %vm3457_vm11, %v3472_v30, %v3471_v0  ;;  %v3545_v7 = vrot.slane %v3514_v58, 7  ;;  %v3547_v8 = vrot.slane %v3515_v59, 6  ;;  %v3549_v9 = vrot.slane %v3516_v62, 5  ;;  %v6065_v22 = vpop.f32.mrb[48].mxu1 }
 0x2d1   : > { %v3475_v10 = vsel %vm3460_vm12, %v3474_v46, %v3473_v13  ;;  %v3551_v11 = vrot.slane %v3517_v63, 4  ;;  %v3553_v14 = vrot.slane %v3518_v24, 3  ;;  %v3555_v15 = vrot.slane %v3519_v2, 2  ;;  %v4859_v4 = vpop.f32.mrb[49].mxu1 }
 0x2d2   : > { %vm3875_vm1 = vcmask 130052   ;;  %3480 = vst.msk [vmem:[%s5973_s19 + $0x8] sm:$0xff] %vm3478_vm15, %v3475_v10  ;;  %v3546_v32 = vsel %vm3445_vm14, %v3545_v7, %v3513_v57  ;;  %v3557_v21 = vrot.slane %v6062_v3, 1  ;;  %v3782_v26 = vrot.slane %v5960_v29, 4  ;;  %v6074_v28 = vpop.f32.mrb[50].mxu1 }
 0x2d3   : > { %v3783_v27 = vrot.slane %v5960_v29, 5  ;;  %v3548_v53 = vsel %vm3448_vm8, %v3547_v8, %v3546_v32  ;;  %v3784_v30 = vrot.slane %v5960_v29, 6  ;;  %v3785_v34 = vrot.slane %v5960_v29, 7  ;;  %v4860_v46 = vpop.f32.mrb[51].mxu1 }
 0x2d4   : > { %v3786_v44 = vrot.slane %v5960_v29, 1  ;;  %v3550_v47 = vsel %vm3451_vm9, %v3549_v9, %v3548_v53  ;;  %v3787_v42 = vrot.slane %v5960_v29, 2  ;;  %v3788_v45 = vrot.slane %v5960_v29, 3 }
 0x2d5   : > { %v3812_v52 = vadd.f32 %v3782_v26, %v5899_v37  ;;  %v3552_v61 = vsel %vm3454_vm10, %v3551_v11, %v3550_v47  ;;  %v3813_v54 = vadd.f32 %v3783_v27, %v5920_v60  ;;  %v3814_v20 = vadd.f32 %v3784_v30, %v5896_v35 }
 0x2d6   : > { %v3815_v55 = vadd.f32 %v3785_v34, %v5922_v5  ;;  %v3554_v56 = vsel %vm3457_vm11, %v3553_v14, %v3552_v61  ;;  %v3816_v57 = vadd.f32 %v5902_v38, %v5960_v29  ;;  %v3817_v58 = vadd.f32 %v3786_v44, %v5924_v43 }
 0x2d7   : > { %v3818_v16 = vadd.f32 %v3787_v42, %v5905_v39  ;;  %v3556_v59 = vsel %vm3460_vm12, %v3555_v15, %v3554_v56  ;;  %v3819_v62 = vadd.f32 %v3788_v45, %v5926_v19  ;;  %v3844_v63 = vrot.slane %v3813_v54, 7 }
 0x2d8   : > { %v3846_v0 = vrot.slane %v3814_v20, 6  ;;  %4522 = vst.msk [vmem:[%s5973_s19 + $0xf] sm:$0xfe] %vm3576_vm0, %v3556_v59  ;;  %v3848_v24 = vrot.slane %v3815_v55, 5  ;;  %v3850_v2 = vrot.slane %v3816_v57, 4  ;;  %v3851_v3 = vrot.slane %v3817_v58, 3 }
 0x2d9   : > { %v3853_v13 = vrot.slane %v3818_v16, 2  ;;  %v3845_v29 = vsel %vm3454_vm10, %v3844_v63, %v3812_v52  ;;  %v3855_v7 = vrot.slane %v3819_v62, 1  ;;  %v3490_v8 = vrot.slane %v5969_v49, 7 }
 0x2da   : > { %v3491_v9 = vrot.slane %v5969_v49, 1  ;;  %v3847_v10 = vsel %vm3457_vm11, %v3846_v0, %v3845_v29  ;;  %v3852_v11 = vsel %vm3442_vm7, %v3851_v3, %v3850_v2  ;;  %v3492_v14 = vrot.slane %v5969_v49, 2 }
 0x2db   : > { %v3493_v15 = vrot.slane %v5969_v49, 3  ;;  %v3849_v4 = vsel %vm3460_vm12, %v3848_v24, %v3847_v10  ;;  %v3854_v32 = vsel %vm3445_vm14, %v3853_v13, %v3852_v11  ;;  %v3494_v26 = vrot.slane %v5969_v49, 4 }
 0x2dc   : > { %v3495_v27 = vrot.slane %v5969_v49, 5  ;;  %v3856_v53 = vsel %vm3448_vm8, %v3855_v7, %v3854_v32  ;;  %4531 = vst.msk [vmem:[%s5973_s19 + $0x3c] sm:$0xf0] %vm3875_vm1, %v3849_v4  ;;  %v3496_v30 = vrot.slane %v5969_v49, 6  ;;  %v3521_v34 = vadd.f32 %v3490_v8, %v5908_v51 }
 0x2dd   : > { %v3522_v44 = vadd.f32 %v5928_v12, %v5969_v49  ;;  %v3523_v46 = vadd.f32 %v3491_v9, %v5911_v40  ;;  %v3524_v47 = vadd.f32 %v3492_v14, %v5930_v31  ;;  %v3525_v42 = vadd.f32 %v3493_v15, %v5914_v41 }
 0x2de   : > { %v3526_v45 = vadd.f32 %v3494_v26, %v5932_v18  ;;  %v3527_v52 = vadd.f32 %v3495_v27, %v5917_v1  ;;  %v3528_v61 = vadd.f32 %v3496_v30, %v5934_v23  ;;  %v3558_v54 = vsel %vm3442_vm7, %v3521_v34, %v3557_v21 }
 0x2df   : > { %v3559_v20 = vrot.slane %v3522_v44, 7  ;;  %v3561_v55 = vrot.slane %v3523_v46, 6  ;;  %v3563_v56 = vrot.slane %v3524_v47, 5  ;;  %v3565_v57 = vrot.slane %v3525_v42, 4 }
 0x2e0   : > { %v3567_v49 = vrot.slane %v3526_v45, 3  ;;  %v3569_v16 = vrot.slane %v3527_v52, 2  ;;  %v3571_v59 = vrot.slane %v3528_v61, 1  ;;  %v3789_v62 = vrot.slane %v5971_v50, 4 }
 0x2e1   : > { %v3560_v58 = vsel %vm3445_vm14, %v3559_v20, %v3558_v54  ;;  %v3790_v0 = vrot.slane %v5971_v50, 5  ;;  %v3791_v24 = vrot.slane %v5971_v50, 6  ;;  %v3792_v21 = vrot.slane %v5971_v50, 7 }
 0x2e2   : > { %v3562_v63 = vsel %vm3448_vm8, %v3561_v55, %v3560_v58  ;;  %4524 = vst.msk [vmem:[%s5973_s19 + $0x1f] sm:$0x1] %vm3579_vm2, %v3571_v59  ;;  %v3793_v3 = vrot.slane %v5971_v50, 1  ;;  %v3794_v13 = vrot.slane %v5971_v50, 2  ;;  %v3795_v29 = vrot.slane %v5971_v50, 3 }
 0x2e3   : > { %v3564_v2 = vsel %vm3451_vm9, %v3563_v56, %v3562_v63  ;;  %v3820_v8 = vadd.f32 %v3789_v62, %v5908_v51  ;;  %v3821_v9 = vadd.f32 %v3790_v0, %v5928_v12  ;;  %v3822_v10 = vadd.f32 %v3791_v24, %v5911_v40 }
 0x2e4   : > { %v3566_v7 = vsel %vm3454_vm10, %v3565_v57, %v3564_v2  ;;  %v3823_v14 = vadd.f32 %v3792_v21, %v5930_v31  ;;  %v3824_v15 = vadd.f32 %v5914_v41, %v5971_v50  ;;  %v3825_v4 = vadd.f32 %v3793_v3, %v5932_v18 }
 0x2e5   : > { %v3568_v11 = vsel %vm3457_vm11, %v3567_v49, %v3566_v7  ;;  %v3826_v26 = vadd.f32 %v3794_v13, %v5917_v1  ;;  %v3827_v27 = vadd.f32 %v3795_v29, %v5934_v23  ;;  %v3857_v30 = vsel %vm3451_vm9, %v3820_v8, %v3856_v53 }
 0x2e6   : > { %v3570_v32 = vsel %vm3460_vm12, %v3569_v16, %v3568_v11  ;;  %v3858_v34 = vrot.slane %v3821_v9, 7  ;;  %v3860_v44 = vrot.slane %v3822_v10, 6  ;;  %v3862_v46 = vrot.slane %v3823_v14, 5 }
 0x2e7   : > { %4523 = vst.msk [vmem:[%s5973_s19 + $0x17] sm:$0xff] %vm3478_vm15, %v3570_v32  ;;  %v3864_v47 = vrot.slane %v3824_v15, 4  ;;  %v3865_v42 = vrot.slane %v3825_v4, 3  ;;  %v3867_v45 = vrot.slane %v3826_v26, 2  ;;  %v3869_v52 = vrot.slane %v3827_v27, 1 }
 0x2e8   : > { %v3682_v50 = vrot.slane %v5996_v25, 5  ;;  %v3859_v61 = vsel %vm3454_vm10, %v3858_v34, %v3857_v30  ;;  %v3683_v54 = vrot.slane %v5996_v25, 6  ;;  %v3684_v20 = vrot.slane %v5996_v25, 7 }
 0x2e9   : > { %v3685_v53 = vrot.slane %v5996_v25, 1  ;;  %v3861_v55 = vsel %vm3457_vm11, %v3860_v44, %v3859_v61  ;;  %v3866_v56 = vsel %vm3442_vm7, %v3865_v42, %v3864_v47  ;;  %v3686_v57 = vrot.slane %v5996_v25, 2 }
 0x2ea   : > { %v3687_v49 = vrot.slane %v5996_v25, 3  ;;  %v3863_v58 = vsel %vm3460_vm12, %v3862_v46, %v3861_v55  ;;  %v3868_v16 = vsel %vm3445_vm14, %v3867_v45, %v3866_v56  ;;  %v3688_v59 = vrot.slane %v5996_v25, 4 }
 0x2eb   : > { %v3712_v62 = vadd.f32 %v3682_v50, %v5899_v37  ;;  %v3870_v63 = vsel %vm3448_vm8, %v3869_v52, %v3868_v16  ;;  %4532 = vst.msk [vmem:[%s5973_s19 + $0x44] sm:$0xff] %vm3478_vm15, %v3863_v58  ;;  %v3713_v0 = vadd.f32 %v3683_v54, %v5920_v60  ;;  %v3714_v24 = vadd.f32 %v3684_v20, %v5896_v35 }
 0x2ec   : > { %v3715_v21 = vadd.f32 %v5922_v5, %v5996_v25  ;;  %4533 = vst.msk [vmem:[%s5973_s19 + $0x4c] sm:$0xf] %vm3878_vm3, %v3870_v63  ;;  %v3716_v2 = vadd.f32 %v3685_v53, %v5902_v38  ;;  %v3717_v3 = vadd.f32 %v3686_v57, %v5924_v43  ;;  %v3718_v13 = vadd.f32 %v3687_v49, %v5905_v39 }
 0x2ed   : > { %v3719_v29 = vadd.f32 %v3688_v59, %v5926_v19  ;;  %v3744_v7 = vrot.slane %v3713_v0, 7  ;;  %v3746_v8 = vrot.slane %v3714_v24, 6  ;;  %v3982_v10 = vrot.slane %v5998_v33, 2 }
 0x2ee   : > { %v3748_v9 = vrot.slane %v3715_v21, 5  ;;  %v3750_v11 = vrot.slane %v3716_v2, 4  ;;  %v3752_v14 = vrot.slane %v3717_v3, 3  ;;  %v3753_v15 = vrot.slane %v3718_v13, 2 }
 0x2ef   : > { %v3755_v25 = vrot.slane %v3719_v29, 1  ;;  %v3745_v4 = vsel %vm3451_vm9, %v3744_v7, %v3712_v62  ;;  %v3983_v32 = vrot.slane %v5998_v33, 3  ;;  %v3984_v26 = vrot.slane %v5998_v33, 4 }
 0x2f0   : > { %v3985_v27 = vrot.slane %v5998_v33, 5  ;;  %v3747_v30 = vsel %vm3454_vm10, %v3746_v8, %v3745_v4  ;;  %v3754_v34 = vsel %vm3442_vm7, %v3753_v15, %v3752_v14  ;;  %v3986_v44 = vrot.slane %v5998_v33, 6 }
 0x2f1   : > { %v3987_v46 = vrot.slane %v5998_v33, 7  ;;  %v3749_v47 = vsel %vm3457_vm11, %v3748_v9, %v3747_v30  ;;  %v3756_v42 = vsel %vm3445_vm14, %v3755_v25, %v3754_v34  ;;  %v3988_v45 = vrot.slane %v5998_v33, 1 }
 0x2f2   : > { %v4012_v52 = vadd.f32 %v3982_v10, %v5899_v37  ;;  %v3751_v50 = vsel %vm3460_vm12, %v3750_v11, %v3749_v47  ;;  %v4013_v61 = vadd.f32 %v3983_v32, %v5920_v60  ;;  %v4014_v54 = vadd.f32 %v3984_v26, %v5896_v35 }
 0x2f3   : > { %v4015_v20 = vadd.f32 %v3985_v27, %v5922_v5  ;;  %4528 = vst.msk [vmem:[%s5973_s19 + $0x2d] sm:$0xf8] %vm3775_vm4, %v3751_v50  ;;  %v4016_v53 = vadd.f32 %v3986_v44, %v5902_v38  ;;  %v4017_v55 = vadd.f32 %v3987_v46, %v5924_v43  ;;  %v4018_v56 = vadd.f32 %v5905_v39, %v5998_v33 }
 0x2f4   : > { %v4019_v57 = vadd.f32 %v3988_v45, %v5926_v19  ;;  %v4044_v49 = vrot.slane %v4013_v61, 7  ;;  %v4046_v58 = vrot.slane %v4014_v54, 6  ;;  %v3689_v59 = vrot.slane %v6005_v48, 5 }
 0x2f5   : > { %v4047_v16 = vrot.slane %v4015_v20, 5  ;;  %v4049_v62 = vrot.slane %v4016_v53, 4  ;;  %v4051_v63 = vrot.slane %v4017_v55, 3  ;;  %v4053_v0 = vrot.slane %v4018_v56, 2 }
 0x2f6   : > { %v4055_v24 = vrot.slane %v4019_v57, 1  ;;  %v4045_v21 = vsel %vm3460_vm12, %v4044_v49, %v4012_v52  ;;  %v3690_v3 = vrot.slane %v6005_v48, 6  ;;  %v3691_v33 = vrot.slane %v6005_v48, 7 }
 0x2f7   : > { %v4048_v2 = vsel %vm3442_vm7, %v4047_v16, %v4046_v58  ;;  %4537 = vst.msk [vmem:[%s5973_s19 + $0x5a] sm:$0xc0] %vm4075_vm5, %v4045_v21  ;;  %v3692_v29 = vrot.slane %v6005_v48, 1  ;;  %v3693_v7 = vrot.slane %v6005_v48, 2  ;;  %v3694_v8 = vrot.slane %v6005_v48, 3 }
 0x2f8   : > { %v4050_v13 = vsel %vm3445_vm14, %v4049_v62, %v4048_v2  ;;  %v3695_v10 = vrot.slane %v6005_v48, 4  ;;  %v3720_v11 = vadd.f32 %v3689_v59, %v5908_v51  ;;  %v3721_v14 = vadd.f32 %v3690_v3, %v5928_v12 }
 0x2f9   : > { %v4052_v9 = vsel %vm3448_vm8, %v4051_v63, %v4050_v13  ;;  %v3722_v25 = vadd.f32 %v3691_v33, %v5911_v40  ;;  %v3723_v4 = vadd.f32 %v5930_v31, %v6005_v48  ;;  %v3724_v32 = vadd.f32 %v3692_v29, %v5914_v41 }
 0x2fa   : > { %v4054_v15 = vsel %vm3451_vm9, %v4053_v0, %v4052_v9  ;;  %v3725_v27 = vadd.f32 %v3693_v7, %v5932_v18  ;;  %v3726_v30 = vadd.f32 %v3694_v8, %v5917_v1  ;;  %v3727_v34 = vadd.f32 %v3695_v10, %v5934_v23 }
 0x2fb   : > { %v4056_v26 = vsel %vm3454_vm10, %v4055_v24, %v4054_v15  ;;  %v3757_v44 = vsel %vm3448_vm8, %v3720_v11, %v3756_v42  ;;  %v3758_v46 = vrot.slane %v3721_v14, 7  ;;  %v3760_v47 = vrot.slane %v3722_v25, 6 }
 0x2fc   : > { %v3762_v45 = vrot.slane %v3723_v4, 5  ;;  %v3764_v52 = vrot.slane %v3724_v32, 4  ;;  %v3766_v50 = vrot.slane %v3725_v27, 3  ;;  %v3767_v61 = vrot.slane %v3726_v30, 2 }
 0x2fd   : > { %v3769_v48 = vrot.slane %v3727_v34, 1  ;;  %v3759_v54 = vsel %vm3451_vm9, %v3758_v46, %v3757_v44  ;;  %v3989_v20 = vrot.slane %v6007_v6, 2  ;;  %v3990_v53 = vrot.slane %v6007_v6, 3 }
 0x2fe   : > { %v3991_v55 = vrot.slane %v6007_v6, 4  ;;  %v3761_v56 = vsel %vm3454_vm10, %v3760_v47, %v3759_v54  ;;  %v3768_v42 = vsel %vm3442_vm7, %v3767_v61, %v3766_v50  ;;  %v3992_v57 = vrot.slane %v6007_v6, 5 }
 0x2ff   : > { %v3993_v49 = vrot.slane %v6007_v6, 6  ;;  %v3763_v58 = vsel %vm3457_vm11, %v3762_v45, %v3761_v56  ;;  %v3770_v16 = vsel %vm3445_vm14, %v3769_v48, %v3768_v42  ;;  %v3994_v59 = vrot.slane %v6007_v6, 7 }
 0x300   : > { %v3995_v62 = vrot.slane %v6007_v6, 1  ;;  %vm4078_vm13 = vcmask 128000   ;;  %v3765_v63 = vsel %vm3460_vm12, %v3764_v52, %v3763_v58  ;;  %4530 = vst.msk [vmem:[%s5973_s19 + $0x3d] sm:$0x7] %vm3778_vm6, %v3770_v16  ;;  %v4020_v0 = vadd.f32 %v3989_v20, %v5908_v51 }
 0x301   : > { %v4021_v24 = vadd.f32 %v3990_v53, %v5928_v12  ;;  %v4022_v21 = vadd.f32 %v3991_v55, %v5911_v40  ;;  %4529 = vst.msk [vmem:[%s5973_s19 + $0x35] sm:$0xff] %vm3478_vm15, %v3765_v63  ;;  %v4023_v2 = vadd.f32 %v3992_v57, %v5930_v31  ;;  %v4024_v3 = vadd.f32 %v3993_v49, %v5914_v41 }
 0x302   : > { %v4025_v33 = vadd.f32 %v3994_v59, %v5932_v18  ;;  %v4026_v13 = vadd.f32 %v5917_v1, %v6007_v6  ;;  %v4027_v29 = vadd.f32 %v3995_v62, %v5934_v23  ;;  %v4057_v7 = vsel %vm3457_vm11, %v4020_v0, %v4056_v26 }
 0x303   : > { %v4058_v8 = vrot.slane %v4021_v24, 7  ;;  %v4060_v9 = vrot.slane %v4022_v21, 6  ;;  %vm3975_vm0 = vcmask 130053   ;;  %v4061_v10 = vrot.slane %v4023_v2, 5 }
 0x304   : > { %v4063_v11 = vrot.slane %v4024_v3, 4  ;;  %v4065_v14 = vrot.slane %v4025_v33, 3  ;;  %v4067_v15 = vrot.slane %v4026_v13, 2  ;;  %v4069_v4 = vrot.slane %v4027_v29, 1 }
 0x305   : > { %v4059_v25 = vsel %vm3460_vm12, %v4058_v8, %v4057_v7  ;;  %v3882_v32 = vrot.slane %v6034_v17, 3  ;;  %v3883_v27 = vrot.slane %v6034_v17, 4  ;;  %v4062_v6 = vsel %vm3442_vm7, %v4061_v10, %v4060_v9 }
 0x306   : > { %4538 = vst.msk [vmem:[%s5973_s19 + $0x62] sm:$0xff] %vm3478_vm15, %v4059_v25  ;;  %v3884_v26 = vrot.slane %v6034_v17, 5  ;;  %v3885_v30 = vrot.slane %v6034_v17, 6  ;;  %v3886_v34 = vrot.slane %v6034_v17, 7  ;;  %v4064_v44 = vsel %vm3445_vm14, %v4063_v11, %v4062_v6 }
 0x307   : > { %v3887_v46 = vrot.slane %v6034_v17, 1  ;;  %v3888_v47 = vrot.slane %v6034_v17, 2  ;;  %v3912_v45 = vadd.f32 %v3882_v32, %v5899_v37  ;;  %v4066_v52 = vsel %vm3448_vm8, %v4065_v14, %v4064_v44 }
 0x308   : > { %v3913_v50 = vadd.f32 %v3883_v27, %v5920_v60  ;;  %v3914_v61 = vadd.f32 %v3884_v26, %v5896_v35  ;;  %v3915_v48 = vadd.f32 %v3885_v30, %v5922_v5  ;;  %v4068_v54 = vsel %vm3451_vm9, %v4067_v15, %v4066_v52 }
 0x309   : > { %v3916_v20 = vadd.f32 %v3886_v34, %v5902_v38  ;;  %v3917_v53 = vadd.f32 %v5924_v43, %v6034_v17  ;;  %v3918_v55 = vadd.f32 %v3887_v46, %v5905_v39  ;;  %v4070_v56 = vsel %vm3454_vm10, %v4069_v4, %v4068_v54 }
 0x30a   : > { %v3919_v42 = vadd.f32 %v3888_v47, %v5926_v19  ;;  %v3944_v57 = vrot.slane %v3913_v50, 7  ;;  %v3946_v49 = vrot.slane %v3914_v61, 6  ;;  %4539 = vst.msk [vmem:[%s5973_s19 + $0x6a] sm:$0x3f] %vm4078_vm13, %v4070_v56  ;;  %v3948_v58 = vrot.slane %v3915_v48, 5 }
 0x30b   : > { %v3949_v16 = vrot.slane %v3916_v20, 4  ;;  %v3951_v59 = vrot.slane %v3917_v53, 3  ;;  %v3953_v62 = vrot.slane %v3918_v55, 2  ;;  %v3889_v17 = vrot.slane %v6040_v36, 3 }
 0x30c   : > { %v3945_v63 = vsel %vm3457_vm11, %v3944_v57, %v3912_v45  ;;  %v3955_v0 = vrot.slane %v3919_v42, 1  ;;  %v3890_v24 = vrot.slane %v6040_v36, 4  ;;  %v3891_v3 = vrot.slane %v6040_v36, 5 }
 0x30d   : > { %v3947_v21 = vsel %vm3460_vm12, %v3946_v49, %v3945_v63  ;;  %v3950_v2 = vsel %vm3442_vm7, %v3949_v16, %v3948_v58  ;;  %v3892_v33 = vrot.slane %v6040_v36, 6  ;;  %vm3978_vm1 = vcmask 126976  }
 0x30e   : > { %vm4175_vm2 = vcmask 130055   ;;  %v3952_v13 = vsel %vm3445_vm14, %v3951_v59, %v3950_v2  ;;  %4534 = vst.msk [vmem:[%s5973_s19 + $0x4b] sm:$0xe0] %vm3975_vm0, %v3947_v21  ;;  %v3893_v29 = vrot.slane %v6040_v36, 7  ;;  %v3894_v7 = vrot.slane %v6040_v36, 1 }
 0x30f   : > { %v3895_v8 = vrot.slane %v6040_v36, 2  ;;  %v3954_v9 = vsel %vm3448_vm8, %v3953_v62, %v3952_v13  ;;  %v3920_v10 = vadd.f32 %v3889_v17, %v5908_v51  ;;  %v3921_v11 = vadd.f32 %v3890_v24, %v5928_v12 }
 0x310   : > { %v3922_v14 = vadd.f32 %v3891_v3, %v5911_v40  ;;  %v3956_v15 = vsel %vm3451_vm9, %v3955_v0, %v3954_v9  ;;  %v3923_v25 = vadd.f32 %v3892_v33, %v5930_v31  ;;  %v3924_v4 = vadd.f32 %v3893_v29, %v5914_v41 }
 0x311   : > { %v3925_v32 = vadd.f32 %v5932_v18, %v6040_v36  ;;  %v3926_v27 = vadd.f32 %v3894_v7, %v5917_v1  ;;  %v3927_v6 = vadd.f32 %v3895_v8, %v5934_v23  ;;  %v3957_v26 = vsel %vm3454_vm10, %v3920_v10, %v3956_v15 }
 0x312   : > { %v3958_v30 = vrot.slane %v3921_v11, 7  ;;  %v3960_v34 = vrot.slane %v3922_v14, 6  ;;  %v3962_v44 = vrot.slane %v3923_v25, 5  ;;  %v3963_v46 = vrot.slane %v3924_v4, 4 }
 0x313   : > { %v3965_v47 = vrot.slane %v3925_v32, 3  ;;  %v3967_v52 = vrot.slane %v3926_v27, 2  ;;  %v3969_v50 = vrot.slane %v3927_v6, 1  ;;  %v4082_v61 = vrot.slane %v6065_v22, 1 }
 0x314   : > { %v3959_v45 = vsel %vm3457_vm11, %v3958_v30, %v3957_v26  ;;  %v3964_v48 = vsel %vm3442_vm7, %v3963_v46, %v3962_v44  ;;  %v4083_v54 = vrot.slane %v6065_v22, 2  ;;  %v4084_v20 = vrot.slane %v6065_v22, 3 }
 0x315   : > { %v3961_v36 = vsel %vm3460_vm12, %v3960_v34, %v3959_v45  ;;  %v3966_v53 = vsel %vm3445_vm14, %v3965_v47, %v3964_v48  ;;  %v4085_v55 = vrot.slane %v6065_v22, 4  ;;  %v4086_v56 = vrot.slane %v6065_v22, 5 }
 0x316   : > { %4535 = vst.msk [vmem:[%s5973_s19 + $0x53] sm:$0xff] %vm3478_vm15, %v3961_v36  ;;  %v4087_v42 = vrot.slane %v6065_v22, 6  ;;  %v3968_v57 = vsel %vm3448_vm8, %v3967_v52, %v3966_v53  ;;  %v4088_v49 = vrot.slane %v6065_v22, 7  ;;  %v4112_v58 = vadd.f32 %v4082_v61, %v5899_v37 }
 0x317   : > { %v4113_v16 = vadd.f32 %v4083_v54, %v5920_v60  ;;  %v3970_v59 = vsel %vm3451_vm9, %v3969_v50, %v3968_v57  ;;  %v4114_v62 = vadd.f32 %v4084_v20, %v5896_v35  ;;  %v4115_v63 = vadd.f32 %v4085_v55, %v5922_v5 }
 0x318   : > { %v4116_v0 = vadd.f32 %v4086_v56, %v5902_v38  ;;  %4536 = vst.msk [vmem:[%s5973_s19 + $0x5b] sm:$0x1f] %vm3978_vm1, %v3970_v59  ;;  %v4117_v17 = vadd.f32 %v4087_v42, %v5924_v43  ;;  %v4118_v24 = vadd.f32 %v4088_v49, %v5905_v39  ;;  %v4119_v21 = vadd.f32 %v5926_v19, %v6065_v22 }
 0x319   : > { %v4144_v37 = vrot.slane %v4113_v16, 7  ;;  %4540 = vst.msk [vmem:[%s5973_s19 + $0x69] sm:$0x80] %vm4175_vm2, %v4112_v58  ;;  %v4145_v60 = vrot.slane %v4114_v62, 6  ;;  %v4147_v2 = vrot.slane %v4115_v63, 5  ;;  %v4089_v5 = vrot.slane %v6074_v28, 1 }
 0x31a   : > { %v4149_v3 = vrot.slane %v4116_v0, 4  ;;  %v4151_v35 = vrot.slane %v4117_v17, 3  ;;  %v4153_v33 = vrot.slane %v4118_v24, 2  ;;  %v4090_v38 = vrot.slane %v6074_v28, 2 }
 0x31b   : > { %v4146_v13 = vsel %vm3442_vm7, %v4145_v60, %v4144_v37  ;;  %v4091_v43 = vrot.slane %v6074_v28, 3  ;;  %v4092_v39 = vrot.slane %v6074_v28, 4  ;;  %v4093_v19 = vrot.slane %v6074_v28, 5 }
 0x31c   : > { %v4148_v22 = vsel %vm3445_vm14, %v4147_v2, %v4146_v13  ;;  %v4155_v29 = vrot.slane %v4119_v21, 1  ;;  %v4094_v7 = vrot.slane %v6074_v28, 6  ;;  %v4095_v8 = vrot.slane %v6074_v28, 7 }
 0x31d   : > { %v4150_v9 = vsel %vm3448_vm8, %v4149_v3, %v4148_v22  ;;  %v4121_v10 = vadd.f32 %v4090_v38, %v5928_v12  ;;  %v4122_v11 = vadd.f32 %v4091_v43, %v5911_v40  ;;  %v4123_v14 = vadd.f32 %v4092_v39, %v5930_v31 }
 0x31e   : > { %v4152_v15 = vsel %vm3451_vm9, %v4151_v35, %v4150_v9  ;;  %v4120_v25 = vadd.f32 %v4089_v5, %v5908_v51  ;;  %v4124_v4 = vadd.f32 %v4093_v19, %v5914_v41  ;;  %v4125_v32 = vadd.f32 %v4094_v7, %v5932_v18 }
 0x31f   : > { %v4154_v27 = vsel %vm3454_vm10, %v4153_v33, %v4152_v15  ;;  %v4126_v6 = vadd.f32 %v4095_v8, %v5917_v1  ;;  %v4158_v12 = vrot.slane %v4121_v10, 7  ;;  %v4159_v26 = vrot.slane %v4122_v11, 6 }
 0x320   : > { %v4156_v40 = vsel %vm3457_vm11, %v4155_v29, %v4154_v27  ;;  %v4127_v31 = vadd.f32 %v5934_v23, %v6074_v28  ;;  %v4161_v30 = vrot.slane %v4123_v14, 5  ;;  %v4163_v41 = vrot.slane %v4124_v4, 4 }
 0x321   : > { %v4157_v34 = vsel %vm3460_vm12, %v4120_v25, %v4156_v40  ;;  %v4160_v51 = vsel %vm3442_vm7, %v4159_v26, %v4158_v12  ;;  %v4165_v1 = vrot.slane %v4125_v32, 3  ;;  %v4167_v46 = vrot.slane %v4126_v6, 2 }
 0x322   : > { %v4162_v18 = vsel %vm3445_vm14, %v4161_v30, %v4160_v51  ;;  %4541 = vst.msk [vmem:[%s5973_s19 + $0x71] sm:$0xff] %vm3478_vm15, %v4157_v34  ;;  %v4169_v28 = vrot.slane %v4127_v31, 1  ;;  %vm4178_vm12 = vcmask 129024  }
 0x323   : > { %v4164_v44 = vsel %vm3448_vm8, %v4163_v41, %v4162_v18 }
 0x324   : > { %v4166_v23 = vsel %vm3451_vm9, %v4165_v1, %v4164_v44 }
 0x325   : > { %v4168_v47 = vsel %vm3454_vm10, %v4167_v46, %v4166_v23 }
 0x326   : > { %v4170_v45 = vsel %vm3457_vm11, %v4169_v28, %v4168_v47 }
 0x327   : > { %4542 = vst.msk [vmem:[%s5973_s19 + $0x79] sm:$0x7f] %vm4178_vm12, %v4170_v45 }
 0x328   : > { %5042 = shalt.err (!%p5039_p3)
}
 0x329   : > { %s5043_s15 = scalar_lea.hbm %s6364_s10, 2048  ;;  %s5047_s17 = scalar_lea.hbm %s6420_s6, 4096 }
 0x32a   : > { %p5044_p4 = scmp.ne.s32.totalorder %s6364_s10, %s5043_s15  ;;  %p5048_p9 = scmp.lt.u32.totalorder %s6364_s10, %s6420_s6 }
 0x32b   : > { %p5049_p10 = scmp.lt.u32.totalorder %s5047_s17, %s5043_s15  ;;  %p5051_p12 = scmp.lt.u32.totalorder %s5043_s15, %s6364_s10 }
 0x32c   : > { %p5045_p7 = pnand %p5044_p4, %p5175_p5 }
 0x32d   : > { %p5050_p11 = por %p5049_p10, %p5048_p9 }
 0x32e   : > { %p5046_p8 = pneg %p5045_p7 }
 0x32f   : > { %p5052_p13 = por %p5051_p12, %p5050_p11 }
 0x331   : > { %p5053_p0 = pnand %p5052_p13, %p5046_p8 }
 0x333   : > { %5056 = shalt.err (!%p5053_p0)
}
 0x334   : > { %s5100_s20 = smov 128   ;;  %s5101_s28 = smov 8  }
 0x335   : > { %4863 = dma.vmem_to_hbm [thread:$0]  (%p5175_p5), %s6366_s26, 2048, %s6364_s10, %s6373_s25, %s5100_s20, %s5100_s20, %s5101_s28  }
 0x336 PF: > { %p4869_p1 = scmp.ge.s32.totalorder %s5091_s24, 2  ;;  %s4209_s29 = sand.u32 1, %s5079_s21  }
 0x337   : > { %s4210_s11 = scalar_lea.sflag [#allocation4], %s4209_s29 }
 0x338   : > { %p4866_p2 = pnand %p4869_p1, %p5179_p6 }
 0x33a   : > { %5074 = dma.done.wait (!%p4866_p2), %s4210_s11, 2048  }
 0x33b   : > { %5076 = vsyncadd (!%p4866_p2), %s4210_s11, 4294965248  ;;  %p16_p3 = scmp.ge.s32.totalorder %s5162_s27, 4   ;;  %s6423_s21 = smov %s5083_s22 }
 0x33c   : > { %s6424_s22 = smov %s5087_s23  ;;  %s6425_s23 = smov %s5173_s30 }
 0x33d   : > { %s6426_s24 = smov %s5162_s27  ;;  %18 = sbr.rel (!%p16_p3) target bundleno = 3 (0x3), region = 94 }
 0x344   :  { %4215 = vsyncpa [#allocation4], 1 }
 0x345   :  { %4217 = vsyncpa [#allocation4 + $0x1], 1 }

</bundles_post_ra>
